<compile_context>
chip_gen: v7x
topology: tpu7x:2x2x1
jax: 0.10.0
libtpu: 0.0.40
codegen_flags: <defaults>
</compile_context>

<pallas_src>
import jax
import jax.numpy as jnp
from jax import lax
from jax.experimental import pallas as pl
from jax.experimental.pallas import tpu as pltpu


# ----------------------------------------------------------------------------
# Fused BasicBlock kernel
# ----------------------------------------------------------------------------
def _make_block_kernel(b_blk, stride, Hout, Wout, has_proj, planes):
    K, s = 3, stride
    HW = Hout * Wout
    M = b_blk * HW                      # matmul M-dim batched over the block

    def kernel(x_ref, w1_ref, b1_ref, w2_ref, b2_ref, o_ref, mid_ref):
        cin = x_ref.shape[-1]

        # conv2 reads from a zero-haloed staging buffer.  Only the four
        # 1-pixel border strips need zeroing (the interior is fully rewritten
        # every step).  Done unconditionally: with "parallel" grid semantics
        # each core gets its own scratch, so a program_id(0)==0 guard would
        # leave the second core's halo uninitialized.
        zrow = jnp.zeros((b_blk, Wout + 2, planes), mid_ref.dtype)
        zcol = jnp.zeros((b_blk, Hout + 2, planes), mid_ref.dtype)
        mid_ref[:, 0, :, :] = zrow
        mid_ref[:, Hout + 1, :, :] = zrow
        mid_ref[:, :, 0, :] = zcol
        mid_ref[:, :, Wout + 1, :] = zcol

        # ---- conv1 (3x3, stride s) [+ fused 1x1 projection columns] --------
        # One bf16 MXU matmul per tap, M = b_blk*Hout*Wout rows, f32 accum.
        acc1 = None
        for dy in range(K):
            for dx in range(K):
                t = dy * K + dx
                ph = (dy % s) * s + (dx % s)          # stride phase of the tap
                tap = x_ref[:, ph,
                            pl.ds(dy // s, Hout),
                            pl.ds(dx // s, Wout), :]
                d = jnp.dot(tap.reshape(M, cin), w1_ref[t],
                            preferred_element_type=jnp.float32)
                acc1 = d if acc1 is None else acc1 + d
        acc1 = acc1 + b1_ref[...]                     # bias(es), f32

        if has_proj:
            h1 = jnp.maximum(acc1[:, :planes], 0.0)   # BN1 bias already added
            sc = acc1[:, planes:]                     # fused 1x1 proj + BN bias
        else:
            # Centre tap of the padded input == the (stride-subsampled) x.
            h1 = jnp.maximum(acc1, 0.0)
            ph_c = (1 % s) * s + (1 % s)
            sc = x_ref[:, ph_c, pl.ds(1 // s, Hout), pl.ds(1 // s, Wout), :]
            sc = sc.reshape(M, cin).astype(jnp.float32)

        # Stage conv1's activation (bf16) inside the zero halo; no HBM trip.
        mid_ref[:, pl.ds(1, Hout), pl.ds(1, Wout), :] = (
            h1.astype(mid_ref.dtype).reshape(b_blk, Hout, Wout, planes))

        # ---- conv2 (3x3, stride 1) + bias + residual + ReLU -----------------
        acc2 = None
        for dy in range(K):
            for dx in range(K):
                t = dy * K + dx
                tap = mid_ref[:, pl.ds(dy, Hout), pl.ds(dx, Wout), :]
                d = jnp.dot(tap.reshape(M, planes), w2_ref[t],
                            preferred_element_type=jnp.float32)
                acc2 = d if acc2 is None else acc2 + d
        out = jnp.maximum(acc2 + b2_ref[...] + sc, 0.0).astype(o_ref.dtype)

        # Lane-dense store: output block is (b_blk, planes, Hout*Wout), i.e.
        # NCHW with H*W merged into the lane axis.  2D transposes use the XLU.
        out = out.reshape(b_blk, HW, planes)
        for b in range(b_blk):
            o_ref[b] = out[b].T

    return kernel


# ----------------------------------------------------------------------------
# Batch-block / VMEM budget heuristic
# ----------------------------------------------------------------------------
def _round_up(x, m):
    return -(-x // m) * m


def _pick_batch_block(N, s, Hq, Wq, Hout, Wout, planes):
    """Largest divisor of N whose padded VMEM footprint fits a conservative
    budget (safe for v5e/v6e's 128 MiB and v7x's 64 MiB per-core VMEM).  No
    minimum-grid-length constraint: on single-TC chips fewer, fatter steps
    amortize the ~0.35us/step overhead and feed bigger matmuls."""
    lane = 128

    def footprint(b):
        hw = Hout * Wout
        x_blk = b * s * s * Hq * _round_up(Wq, 16) * lane * 2 * 2        # bf16, 2 bufs
        o_blk = b * _round_up(planes, 8) * _round_up(hw, lane) * 4 * 2   # f32, 2 bufs
        mid = b * (Hout + 2) * _round_up(Wout + 2, 16) * lane * 2        # bf16 scratch
        acc = b * hw * lane * 4 * 3                                      # live f32 values
        return x_blk + o_blk + mid + acc + (1 << 20)                     # + weights/slack

    budget = 12 * (1 << 20)
    fitting = [d for d in range(1, N + 1) if N % d == 0 and footprint(d) <= budget]
    b_blk = max(fitting) if fitting else 1
    vmem_limit = int(min(48 << 20, max(32 << 20, 2 * footprint(b_blk))))
    return b_blk, vmem_limit


# ----------------------------------------------------------------------------
# BasicBlock forward (NCHW in / NCHW out, like PyTorch)
# ----------------------------------------------------------------------------
def basic_block_forward(x_nchw, params, in_planes, planes, stride,
                        batch_block=None, compute_dtype=jnp.bfloat16):
    N, Cin, H, W = x_nchw.shape
    assert Cin == in_planes
    K, pad, s = 3, 1, stride
    Hout = (H + 2 * pad - K) // s + 1
    Wout = (W + 2 * pad - K) // s + 1
    has_proj = (s != 1) or (in_planes != planes)
    f32 = jnp.float32

    # Input glue (pure data movement, ~input-sized): NCHW -> NHWC, zero-pad,
    # split into s*s stride phases so every conv tap is a contiguous slice,
    # and cast the MXU operand to bf16 (halves the input DMA).
    x = jnp.transpose(x_nchw, (0, 2, 3, 1))
    Hq = -(-(H + 2 * pad) // s)
    Wq = -(-(W + 2 * pad) // s)
    xp = jnp.pad(x, ((0, 0),
                     (pad, Hq * s - H - pad),
                     (pad, Wq * s - W - pad),
                     (0, 0)))
    x_ph = xp.reshape(N, Hq, s, Wq, s, Cin).transpose(0, 2, 4, 1, 3, 5)
    x_ph = x_ph.reshape(N, s * s, Hq, Wq, Cin).astype(compute_dtype)

    # Fold BN scales into the conv weights; biases stay separate in f32.
    w1 = (params["w1"] * params["s1"][None, None, None, :]).astype(f32)
    w2 = (params["w2"] * params["s2"][None, None, None, :]).astype(f32)
    w1 = w1.reshape(K * K, Cin, planes)
    w2 = w2.reshape(K * K, planes, planes)
    if has_proj:
        # Fuse the 1x1 projection into conv1: extra output columns whose only
        # nonzero rows are the centre tap (t == 4), which reads x[s*i, s*j].
        ws = (params["ws"][0, 0] * params["ss"][None, :]).astype(f32)
        proj = jnp.zeros((K * K, Cin, planes), f32).at[4].set(ws)
        w1 = jnp.concatenate([w1, proj], axis=-1)            # (9, Cin, 2*planes)
        bias1 = jnp.concatenate([params["b1"], params["bs"]]).astype(f32)
    else:
        bias1 = params["b1"].astype(f32)
    ncols1 = w1.shape[-1]
    w1 = w1.astype(compute_dtype)
    w2 = w2.astype(compute_dtype)
    bias1 = bias1.reshape(1, ncols1)
    bias2 = params["b2"].astype(f32).reshape(1, planes)

    b_blk, vmem_limit = _pick_batch_block(N, s, Hq, Wq, Hout, Wout, planes)
    if batch_block is not None:
        b_blk = batch_block
    assert N % b_blk == 0

    kernel = _make_block_kernel(b_blk, s, Hout, Wout, has_proj, planes)
    out = pl.pallas_call(
        kernel,
        out_shape=jax.ShapeDtypeStruct((N, planes, Hout * Wout), x_nchw.dtype),
        grid=(N // b_blk,),
        in_specs=[
            pl.BlockSpec((b_blk, s * s, Hq, Wq, Cin), lambda i: (i, 0, 0, 0, 0)),
            pl.BlockSpec((K * K, Cin, ncols1), lambda i: (0, 0, 0)),
            pl.BlockSpec((1, ncols1), lambda i: (0, 0)),
            pl.BlockSpec((K * K, planes, planes), lambda i: (0, 0, 0)),
            pl.BlockSpec((1, planes), lambda i: (0, 0)),
        ],
        out_specs=pl.BlockSpec((b_blk, planes, Hout * Wout), lambda i: (i, 0, 0)),
        scratch_shapes=[pltpu.VMEM((b_blk, Hout + 2, Wout + 2, planes),
                                   compute_dtype)],
        compiler_params=pltpu.CompilerParams(
            dimension_semantics=("parallel",),
            vmem_limit_bytes=vmem_limit),
    )(x_ph, w1, bias1, w2, bias2)

    # (N, planes, Hout*Wout) is NCHW with H*W merged: a free reshape, no
    # output transpose needed in the wrapper.
    return out.reshape(N, planes, Hout, Wout)


# ----------------------------------------------------------------------------
# Deterministic parameter construction + pure-JAX (f32) reference
# ----------------------------------------------------------------------------
def _fold_bn(gamma, beta, mean, var, eps=1e-5):
    scale = gamma / jnp.sqrt(var + eps)
    return scale, beta - mean * scale


def make_params(key, in_planes, planes, has_proj):
    ks = jax.random.split(key, 7)
    zero = jnp.zeros((planes,), jnp.float32)
    one = jnp.ones((planes,), jnp.float32)
    p = {}
    p["w1"] = 0.1 * jax.random.normal(ks[0], (3, 3, in_planes, planes), jnp.float32)
    p["w2"] = 0.1 * jax.random.normal(ks[1], (3, 3, planes, planes), jnp.float32)
    g1 = 1.0 + 0.1 * jax.random.normal(ks[2], (planes,), jnp.float32)
    b1 = 0.1 * jax.random.normal(ks[3], (planes,), jnp.float32)
    g2 = 1.0 + 0.1 * jax.random.normal(ks[4], (planes,), jnp.float32)
    b2 = 0.1 * jax.random.normal(ks[5], (planes,), jnp.float32)
    p["s1"], p["b1"] = _fold_bn(g1, b1, zero, one)
    p["s2"], p["b2"] = _fold_bn(g2, b2, zero, one)
    if has_proj:
        kk = jax.random.split(ks[6], 3)
        p["ws"] = 0.1 * jax.random.normal(kk[0], (1, 1, in_planes, planes), jnp.float32)
        gs = 1.0 + 0.1 * jax.random.normal(kk[1], (planes,), jnp.float32)
        bs = 0.1 * jax.random.normal(kk[2], (planes,), jnp.float32)
        p["ss"], p["bs"] = _fold_bn(gs, bs, zero, one)
    return p


def reference_forward(x_nchw, params, in_planes, planes, stride):
    x = jnp.transpose(x_nchw, (0, 2, 3, 1))
    conv = lambda a, w, s, pad: lax.conv_general_dilated(
        a, w, (s, s), ((pad, pad), (pad, pad)),
        dimension_numbers=("NHWC", "HWIO", "NHWC"))
    out = jax.nn.relu(conv(x, params["w1"], stride, 1) * params["s1"] + params["b1"])
    out = conv(out, params["w2"], 1, 1) * params["s2"] + params["b2"]
    if stride != 1 or in_planes != planes:
        sc = conv(x, params["ws"], stride, 0) * params["ss"] + params["bs"]
    else:
        sc = x
    out = jax.nn.relu(out + sc)
    return jnp.transpose(out, (0, 3, 1, 2))


# ----------------------------------------------------------------------------
if __name__ == "__main__":
    key = jax.random.PRNGKey(0)
    kx, kp1, kp2 = jax.random.split(key, 3)

    ok = True
    # The kernel uses bf16 MXU operands (f32 accumulation), so allow ~1e-2
    # scale deviation versus the pure-f32 reference.
    ATOL = RTOL = 5e-2

    # Config 1: projection shortcut (stride=2, in_planes != planes)
    in_planes, planes, stride = 4, 8, 2
    x = jax.random.normal(kx, (2, in_planes, 16, 16), jnp.float32)   # NCHW
    params = make_params(kp1, in_planes, planes, has_proj=True)
    out = jax.block_until_ready(
        basic_block_forward(x, params, in_planes, planes, stride))
    ref = reference_forward(x, params, in_planes, planes, stride)
    ok &= bool(jnp.allclose(out, ref, atol=ATOL, rtol=RTOL))
    assert out.shape == (2, planes, 8, 8)

    # Config 2: identity shortcut (stride=1, in_planes == planes)
    in_planes2, planes2, stride2 = 4, 4, 1
    params2 = make_params(kp2, in_planes2, planes2, has_proj=False)
    out2 = jax.block_until_ready(
        basic_block_forward(x, params2, in_planes2, planes2, stride2))
    ref2 = reference_forward(x, params2, in_planes2, planes2, stride2)
    ok &= bool(jnp.allclose(out2, ref2, atol=ATOL, rtol=RTOL))
    assert out2.shape == (2, planes2, 16, 16)

    if ok:
        print("KERNEL_OK")
    else:
        raise SystemExit("mismatch vs reference")
</pallas_src>

<mosaic_0001>
module attributes {stable_mosaic.version = 11 : i64} {
  func.func @kernel(%arg0: i32, %arg1: memref<2x4x9x9x4xbf16, #tpu.memory_space<vmem>>, %arg2: memref<9x4x16xbf16, #tpu.memory_space<vmem>>, %arg3: memref<1x16xf32, #tpu.memory_space<vmem>>, %arg4: memref<9x8x8xbf16, #tpu.memory_space<vmem>>, %arg5: memref<1x8xf32, #tpu.memory_space<vmem>>, %arg6: memref<2x8x64xf32, #tpu.memory_space<vmem>>, %arg7: memref<2x10x10x8xbf16, #tpu.memory_space<vmem>>) attributes {dimension_semantics = [#tpu.dimension_semantics<parallel>], iteration_bounds = array<i64: 1>, scalar_prefetch = 0 : i64, scratch_operands = 1 : i64, tpu.core_type = #tpu.core_type<tc>, window_params = [{transform_indices = @transform_0, window_bounds = array<i64: 2, 4, 9, 9, 4>}, {pipeline_mode = #tpu.pipeline_mode<synchronous>, transform_indices = @transform_1, window_bounds = array<i64: 9, 4, 16>}, {pipeline_mode = #tpu.pipeline_mode<synchronous>, transform_indices = @transform_2, window_bounds = array<i64: 1, 16>}, {pipeline_mode = #tpu.pipeline_mode<synchronous>, transform_indices = @transform_3, window_bounds = array<i64: 9, 8, 8>}, {pipeline_mode = #tpu.pipeline_mode<synchronous>, transform_indices = @transform_4, window_bounds = array<i64: 1, 8>}, {transform_indices = @transform_5, window_bounds = array<i64: 2, 8, 64>}]} {
    %cst = arith.constant 0.000000e+00 : bf16
    %0 = vector.broadcast %cst : bf16 to vector<2x10x8xbf16>
    %cst_0 = arith.constant 0.000000e+00 : bf16
    %1 = vector.broadcast %cst_0 : bf16 to vector<2x10x8xbf16>
    %c0 = arith.constant 0 : index
    %c0_1 = arith.constant 0 : index
    %c0_2 = arith.constant 0 : index
    %c0_3 = arith.constant 0 : index
    %2 = vector.load %arg7[%c0, %c0_1, %c0_2, %c0_3] : memref<2x10x10x8xbf16, #tpu.memory_space<vmem>>, vector<2x1x10x8xbf16>
    %3 = vector.shape_cast %2 : vector<2x1x10x8xbf16> to vector<2x10x8xbf16>
    %4 = vector.shape_cast %0 : vector<2x10x8xbf16> to vector<2x1x10x8xbf16>
    tpu.vector_store %arg7[%c0, %c0_1, %c0_2, %c0_3], %4 {strides = array<i32>} : memref<2x10x10x8xbf16, #tpu.memory_space<vmem>>, vector<2x1x10x8xbf16>,
    %c0_4 = arith.constant 0 : index
    %c9 = arith.constant 9 : index
    %c0_5 = arith.constant 0 : index
    %c0_6 = arith.constant 0 : index
    %5 = vector.load %arg7[%c0_4, %c9, %c0_5, %c0_6] : memref<2x10x10x8xbf16, #tpu.memory_space<vmem>>, vector<2x1x10x8xbf16>
    %6 = vector.shape_cast %5 : vector<2x1x10x8xbf16> to vector<2x10x8xbf16>
    %7 = vector.shape_cast %0 : vector<2x10x8xbf16> to vector<2x1x10x8xbf16>
    tpu.vector_store %arg7[%c0_4, %c9, %c0_5, %c0_6], %7 {strides = array<i32>} : memref<2x10x10x8xbf16, #tpu.memory_space<vmem>>, vector<2x1x10x8xbf16>,
    %c0_7 = arith.constant 0 : index
    %c0_8 = arith.constant 0 : index
    %c0_9 = arith.constant 0 : index
    %c0_10 = arith.constant 0 : index
    %8 = vector.load %arg7[%c0_7, %c0_8, %c0_9, %c0_10] : memref<2x10x10x8xbf16, #tpu.memory_space<vmem>>, vector<2x10x1x8xbf16>
    %9 = vector.shape_cast %8 : vector<2x10x1x8xbf16> to vector<2x10x8xbf16>
    %10 = vector.shape_cast %1 : vector<2x10x8xbf16> to vector<2x10x1x8xbf16>
    tpu.vector_store %arg7[%c0_7, %c0_8, %c0_9, %c0_10], %10 {strides = array<i32>} : memref<2x10x10x8xbf16, #tpu.memory_space<vmem>>, vector<2x10x1x8xbf16>,
    %c0_11 = arith.constant 0 : index
    %c0_12 = arith.constant 0 : index
    %c9_13 = arith.constant 9 : index
    %c0_14 = arith.constant 0 : index
    %11 = vector.load %arg7[%c0_11, %c0_12, %c9_13, %c0_14] : memref<2x10x10x8xbf16, #tpu.memory_space<vmem>>, vector<2x10x1x8xbf16>
    %12 = vector.shape_cast %11 : vector<2x10x1x8xbf16> to vector<2x10x8xbf16>
    %13 = vector.shape_cast %1 : vector<2x10x8xbf16> to vector<2x10x1x8xbf16>
    tpu.vector_store %arg7[%c0_11, %c0_12, %c9_13, %c0_14], %13 {strides = array<i32>} : memref<2x10x10x8xbf16, #tpu.memory_space<vmem>>, vector<2x10x1x8xbf16>,
    %c0_15 = arith.constant 0 : index
    %c0_16 = arith.constant 0 : index
    %c0_17 = arith.constant 0 : index
    %c0_18 = arith.constant 0 : index
    %c0_19 = arith.constant 0 : index
    %14 = vector.load %arg1[%c0_15, %c0_16, %c0_17, %c0_18, %c0_19] : memref<2x4x9x9x4xbf16, #tpu.memory_space<vmem>>, vector<2x1x8x8x4xbf16>
    %15 = vector.shape_cast %14 : vector<2x1x8x8x4xbf16> to vector<2x8x8x4xbf16>
    %16 = vector.shape_cast %15 : vector<2x8x8x4xbf16> to vector<128x4xbf16>
    %c0_20 = arith.constant 0 : index
    %c0_21 = arith.constant 0 : index
    %c0_22 = arith.constant 0 : index
    %17 = vector.load %arg2[%c0_20, %c0_21, %c0_22] : memref<9x4x16xbf16, #tpu.memory_space<vmem>>, vector<1x4x16xbf16>
    %18 = vector.shape_cast %17 : vector<1x4x16xbf16> to vector<4x16xbf16>
    %cst_23 = arith.constant dense<0.000000e+00> : vector<128x16xf32>
    %19 = tpu.matmul %16, %18, %cst_23 {dimension_numbers = #tpu.dot_dimension_numbers<[1], [0], [0], [1], [0, 0, 1, 1], [], []>} : vector<128x4xbf16>, vector<4x16xbf16>, vector<128x16xf32> -> vector<128x16xf32>
    %c0_24 = arith.constant 0 : index
    %c1 = arith.constant 1 : index
    %c0_25 = arith.constant 0 : index
    %c0_26 = arith.constant 0 : index
    %c0_27 = arith.constant 0 : index
    %20 = vector.load %arg1[%c0_24, %c1, %c0_25, %c0_26, %c0_27] : memref<2x4x9x9x4xbf16, #tpu.memory_space<vmem>>, vector<2x1x8x8x4xbf16>
    %21 = vector.shape_cast %20 : vector<2x1x8x8x4xbf16> to vector<2x8x8x4xbf16>
    %22 = vector.shape_cast %21 : vector<2x8x8x4xbf16> to vector<128x4xbf16>
    %c1_28 = arith.constant 1 : index
    %c0_29 = arith.constant 0 : index
    %c0_30 = arith.constant 0 : index
    %23 = vector.load %arg2[%c1_28, %c0_29, %c0_30] : memref<9x4x16xbf16, #tpu.memory_space<vmem>>, vector<1x4x16xbf16>
    %24 = vector.shape_cast %23 : vector<1x4x16xbf16> to vector<4x16xbf16>
    %cst_31 = arith.constant dense<0.000000e+00> : vector<128x16xf32>
    %25 = tpu.matmul %22, %24, %cst_31 {dimension_numbers = #tpu.dot_dimension_numbers<[1], [0], [0], [1], [0, 0, 1, 1], [], []>} : vector<128x4xbf16>, vector<4x16xbf16>, vector<128x16xf32> -> vector<128x16xf32>
    %26 = arith.addf %19, %25 : vector<128x16xf32>
    %c0_32 = arith.constant 0 : index
    %c0_33 = arith.constant 0 : index
    %c0_34 = arith.constant 0 : index
    %c1_35 = arith.constant 1 : index
    %c0_36 = arith.constant 0 : index
    %27 = vector.load %arg1[%c0_32, %c0_33, %c0_34, %c1_35, %c0_36] : memref<2x4x9x9x4xbf16, #tpu.memory_space<vmem>>, vector<2x1x8x8x4xbf16>
    %28 = vector.shape_cast %27 : vector<2x1x8x8x4xbf16> to vector<2x8x8x4xbf16>
    %29 = vector.shape_cast %28 : vector<2x8x8x4xbf16> to vector<128x4xbf16>
    %c2 = arith.constant 2 : index
    %c0_37 = arith.constant 0 : index
    %c0_38 = arith.constant 0 : index
    %30 = vector.load %arg2[%c2, %c0_37, %c0_38] : memref<9x4x16xbf16, #tpu.memory_space<vmem>>, vector<1x4x16xbf16>
    %31 = vector.shape_cast %30 : vector<1x4x16xbf16> to vector<4x16xbf16>
    %cst_39 = arith.constant dense<0.000000e+00> : vector<128x16xf32>
    %32 = tpu.matmul %29, %31, %cst_39 {dimension_numbers = #tpu.dot_dimension_numbers<[1], [0], [0], [1], [0, 0, 1, 1], [], []>} : vector<128x4xbf16>, vector<4x16xbf16>, vector<128x16xf32> -> vector<128x16xf32>
    %33 = arith.addf %26, %32 : vector<128x16xf32>
    %c0_40 = arith.constant 0 : index
    %c2_41 = arith.constant 2 : index
    %c0_42 = arith.constant 0 : index
    %c0_43 = arith.constant 0 : index
    %c0_44 = arith.constant 0 : index
    %34 = vector.load %arg1[%c0_40, %c2_41, %c0_42, %c0_43, %c0_44] : memref<2x4x9x9x4xbf16, #tpu.memory_space<vmem>>, vector<2x1x8x8x4xbf16>
    %35 = vector.shape_cast %34 : vector<2x1x8x8x4xbf16> to vector<2x8x8x4xbf16>
    %36 = vector.shape_cast %35 : vector<2x8x8x4xbf16> to vector<128x4xbf16>
    %c3 = arith.constant 3 : index
    %c0_45 = arith.constant 0 : index
    %c0_46 = arith.constant 0 : index
    %37 = vector.load %arg2[%c3, %c0_45, %c0_46] : memref<9x4x16xbf16, #tpu.memory_space<vmem>>, vector<1x4x16xbf16>
    %38 = vector.shape_cast %37 : vector<1x4x16xbf16> to vector<4x16xbf16>
    %cst_47 = arith.constant dense<0.000000e+00> : vector<128x16xf32>
    %39 = tpu.matmul %36, %38, %cst_47 {dimension_numbers = #tpu.dot_dimension_numbers<[1], [0], [0], [1], [0, 0, 1, 1], [], []>} : vector<128x4xbf16>, vector<4x16xbf16>, vector<128x16xf32> -> vector<128x16xf32>
    %40 = arith.addf %33, %39 : vector<128x16xf32>
    %c0_48 = arith.constant 0 : index
    %c3_49 = arith.constant 3 : index
    %c0_50 = arith.constant 0 : index
    %c0_51 = arith.constant 0 : index
    %c0_52 = arith.constant 0 : index
    %41 = vector.load %arg1[%c0_48, %c3_49, %c0_50, %c0_51, %c0_52] : memref<2x4x9x9x4xbf16, #tpu.memory_space<vmem>>, vector<2x1x8x8x4xbf16>
    %42 = vector.shape_cast %41 : vector<2x1x8x8x4xbf16> to vector<2x8x8x4xbf16>
    %43 = vector.shape_cast %42 : vector<2x8x8x4xbf16> to vector<128x4xbf16>
    %c4 = arith.constant 4 : index
    %c0_53 = arith.constant 0 : index
    %c0_54 = arith.constant 0 : index
    %44 = vector.load %arg2[%c4, %c0_53, %c0_54] : memref<9x4x16xbf16, #tpu.memory_space<vmem>>, vector<1x4x16xbf16>
    %45 = vector.shape_cast %44 : vector<1x4x16xbf16> to vector<4x16xbf16>
    %cst_55 = arith.constant dense<0.000000e+00> : vector<128x16xf32>
    %46 = tpu.matmul %43, %45, %cst_55 {dimension_numbers = #tpu.dot_dimension_numbers<[1], [0], [0], [1], [0, 0, 1, 1], [], []>} : vector<128x4xbf16>, vector<4x16xbf16>, vector<128x16xf32> -> vector<128x16xf32>
    %47 = arith.addf %40, %46 : vector<128x16xf32>
    %c0_56 = arith.constant 0 : index
    %c2_57 = arith.constant 2 : index
    %c0_58 = arith.constant 0 : index
    %c1_59 = arith.constant 1 : index
    %c0_60 = arith.constant 0 : index
    %48 = vector.load %arg1[%c0_56, %c2_57, %c0_58, %c1_59, %c0_60] : memref<2x4x9x9x4xbf16, #tpu.memory_space<vmem>>, vector<2x1x8x8x4xbf16>
    %49 = vector.shape_cast %48 : vector<2x1x8x8x4xbf16> to vector<2x8x8x4xbf16>
    %50 = vector.shape_cast %49 : vector<2x8x8x4xbf16> to vector<128x4xbf16>
    %c5 = arith.constant 5 : index
    %c0_61 = arith.constant 0 : index
    %c0_62 = arith.constant 0 : index
    %51 = vector.load %arg2[%c5, %c0_61, %c0_62] : memref<9x4x16xbf16, #tpu.memory_space<vmem>>, vector<1x4x16xbf16>
    %52 = vector.shape_cast %51 : vector<1x4x16xbf16> to vector<4x16xbf16>
    %cst_63 = arith.constant dense<0.000000e+00> : vector<128x16xf32>
    %53 = tpu.matmul %50, %52, %cst_63 {dimension_numbers = #tpu.dot_dimension_numbers<[1], [0], [0], [1], [0, 0, 1, 1], [], []>} : vector<128x4xbf16>, vector<4x16xbf16>, vector<128x16xf32> -> vector<128x16xf32>
    %54 = arith.addf %47, %53 : vector<128x16xf32>
    %c0_64 = arith.constant 0 : index
    %c0_65 = arith.constant 0 : index
    %c1_66 = arith.constant 1 : index
    %c0_67 = arith.constant 0 : index
    %c0_68 = arith.constant 0 : index
    %55 = vector.load %arg1[%c0_64, %c0_65, %c1_66, %c0_67, %c0_68] : memref<2x4x9x9x4xbf16, #tpu.memory_space<vmem>>, vector<2x1x8x8x4xbf16>
    %56 = vector.shape_cast %55 : vector<2x1x8x8x4xbf16> to vector<2x8x8x4xbf16>
    %57 = vector.shape_cast %56 : vector<2x8x8x4xbf16> to vector<128x4xbf16>
    %c6 = arith.constant 6 : index
    %c0_69 = arith.constant 0 : index
    %c0_70 = arith.constant 0 : index
    %58 = vector.load %arg2[%c6, %c0_69, %c0_70] : memref<9x4x16xbf16, #tpu.memory_space<vmem>>, vector<1x4x16xbf16>
    %59 = vector.shape_cast %58 : vector<1x4x16xbf16> to vector<4x16xbf16>
    %cst_71 = arith.constant dense<0.000000e+00> : vector<128x16xf32>
    %60 = tpu.matmul %57, %59, %cst_71 {dimension_numbers = #tpu.dot_dimension_numbers<[1], [0], [0], [1], [0, 0, 1, 1], [], []>} : vector<128x4xbf16>, vector<4x16xbf16>, vector<128x16xf32> -> vector<128x16xf32>
    %61 = arith.addf %54, %60 : vector<128x16xf32>
    %c0_72 = arith.constant 0 : index
    %c1_73 = arith.constant 1 : index
    %c1_74 = arith.constant 1 : index
    %c0_75 = arith.constant 0 : index
    %c0_76 = arith.constant 0 : index
    %62 = vector.load %arg1[%c0_72, %c1_73, %c1_74, %c0_75, %c0_76] : memref<2x4x9x9x4xbf16, #tpu.memory_space<vmem>>, vector<2x1x8x8x4xbf16>
    %63 = vector.shape_cast %62 : vector<2x1x8x8x4xbf16> to vector<2x8x8x4xbf16>
    %64 = vector.shape_cast %63 : vector<2x8x8x4xbf16> to vector<128x4xbf16>
    %c7 = arith.constant 7 : index
    %c0_77 = arith.constant 0 : index
    %c0_78 = arith.constant 0 : index
    %65 = vector.load %arg2[%c7, %c0_77, %c0_78] : memref<9x4x16xbf16, #tpu.memory_space<vmem>>, vector<1x4x16xbf16>
    %66 = vector.shape_cast %65 : vector<1x4x16xbf16> to vector<4x16xbf16>
    %cst_79 = arith.constant dense<0.000000e+00> : vector<128x16xf32>
    %67 = tpu.matmul %64, %66, %cst_79 {dimension_numbers = #tpu.dot_dimension_numbers<[1], [0], [0], [1], [0, 0, 1, 1], [], []>} : vector<128x4xbf16>, vector<4x16xbf16>, vector<128x16xf32> -> vector<128x16xf32>
    %68 = arith.addf %61, %67 : vector<128x16xf32>
    %c0_80 = arith.constant 0 : index
    %c0_81 = arith.constant 0 : index
    %c1_82 = arith.constant 1 : index
    %c1_83 = arith.constant 1 : index
    %c0_84 = arith.constant 0 : index
    %69 = vector.load %arg1[%c0_80, %c0_81, %c1_82, %c1_83, %c0_84] : memref<2x4x9x9x4xbf16, #tpu.memory_space<vmem>>, vector<2x1x8x8x4xbf16>
    %70 = vector.shape_cast %69 : vector<2x1x8x8x4xbf16> to vector<2x8x8x4xbf16>
    %71 = vector.shape_cast %70 : vector<2x8x8x4xbf16> to vector<128x4xbf16>
    %c8 = arith.constant 8 : index
    %c0_85 = arith.constant 0 : index
    %c0_86 = arith.constant 0 : index
    %72 = vector.load %arg2[%c8, %c0_85, %c0_86] : memref<9x4x16xbf16, #tpu.memory_space<vmem>>, vector<1x4x16xbf16>
    %73 = vector.shape_cast %72 : vector<1x4x16xbf16> to vector<4x16xbf16>
    %cst_87 = arith.constant dense<0.000000e+00> : vector<128x16xf32>
    %74 = tpu.matmul %71, %73, %cst_87 {dimension_numbers = #tpu.dot_dimension_numbers<[1], [0], [0], [1], [0, 0, 1, 1], [], []>} : vector<128x4xbf16>, vector<4x16xbf16>, vector<128x16xf32> -> vector<128x16xf32>
    %75 = arith.addf %68, %74 : vector<128x16xf32>
    %c0_88 = arith.constant 0 : index
    %c0_89 = arith.constant 0 : index
    %76 = vector.load %arg3[%c0_88, %c0_89] : memref<1x16xf32, #tpu.memory_space<vmem>>, vector<1x16xf32>
    %77 = vector.broadcast %76 : vector<1x16xf32> to vector<128x16xf32>
    %78 = arith.addf %75, %77 : vector<128x16xf32>
    %79 = vector.extract_strided_slice %78 {offsets = [0, 0], sizes = [128, 8], strides = [1, 1]} : vector<128x16xf32> to vector<128x8xf32>
    %cst_90 = arith.constant 0.000000e+00 : f32
    %80 = vector.broadcast %cst_90 : f32 to vector<128x8xf32>
    %81 = arith.maximumf %79, %80 : vector<128x8xf32>
    %82 = vector.extract_strided_slice %78 {offsets = [0, 8], sizes = [128, 8], strides = [1, 1]} : vector<128x16xf32> to vector<128x8xf32>
    %83 = arith.truncf %81 : vector<128x8xf32> to vector<128x8xbf16>
    %84 = vector.shape_cast %83 : vector<128x8xbf16> to vector<2x8x8x8xbf16>
    %c0_91 = arith.constant 0 : index
    %c1_92 = arith.constant 1 : index
    %c1_93 = arith.constant 1 : index
    %c0_94 = arith.constant 0 : index
    %85 = vector.load %arg7[%c0_91, %c1_92, %c1_93, %c0_94] : memref<2x10x10x8xbf16, #tpu.memory_space<vmem>>, vector<2x8x8x8xbf16>
    tpu.vector_store %arg7[%c0_91, %c1_92, %c1_93, %c0_94], %84 {strides = array<i32>} : memref<2x10x10x8xbf16, #tpu.memory_space<vmem>>, vector<2x8x8x8xbf16>,
    %c0_95 = arith.constant 0 : index
    %c0_96 = arith.constant 0 : index
    %c0_97 = arith.constant 0 : index
    %c0_98 = arith.constant 0 : index
    %86 = vector.load %arg7[%c0_95, %c0_96, %c0_97, %c0_98] : memref<2x10x10x8xbf16, #tpu.memory_space<vmem>>, vector<2x8x8x8xbf16>
    %87 = vector.shape_cast %86 : vector<2x8x8x8xbf16> to vector<128x8xbf16>
    %c0_99 = arith.constant 0 : index
    %c0_100 = arith.constant 0 : index
    %c0_101 = arith.constant 0 : index
    %88 = vector.load %arg4[%c0_99, %c0_100, %c0_101] : memref<9x8x8xbf16, #tpu.memory_space<vmem>>, vector<1x8x8xbf16>
    %89 = vector.shape_cast %88 : vector<1x8x8xbf16> to vector<8x8xbf16>
    %cst_102 = arith.constant dense<0.000000e+00> : vector<128x8xf32>
    %90 = tpu.matmul %87, %89, %cst_102 {dimension_numbers = #tpu.dot_dimension_numbers<[1], [0], [0], [1], [0, 0, 1, 1], [], []>} : vector<128x8xbf16>, vector<8x8xbf16>, vector<128x8xf32> -> vector<128x8xf32>
    %c0_103 = arith.constant 0 : index
    %c0_104 = arith.constant 0 : index
    %c1_105 = arith.constant 1 : index
    %c0_106 = arith.constant 0 : index
    %91 = vector.load %arg7[%c0_103, %c0_104, %c1_105, %c0_106] : memref<2x10x10x8xbf16, #tpu.memory_space<vmem>>, vector<2x8x8x8xbf16>
    %92 = vector.shape_cast %91 : vector<2x8x8x8xbf16> to vector<128x8xbf16>
    %c1_107 = arith.constant 1 : index
    %c0_108 = arith.constant 0 : index
    %c0_109 = arith.constant 0 : index
    %93 = vector.load %arg4[%c1_107, %c0_108, %c0_109] : memref<9x8x8xbf16, #tpu.memory_space<vmem>>, vector<1x8x8xbf16>
    %94 = vector.shape_cast %93 : vector<1x8x8xbf16> to vector<8x8xbf16>
    %cst_110 = arith.constant dense<0.000000e+00> : vector<128x8xf32>
    %95 = tpu.matmul %92, %94, %cst_110 {dimension_numbers = #tpu.dot_dimension_numbers<[1], [0], [0], [1], [0, 0, 1, 1], [], []>} : vector<128x8xbf16>, vector<8x8xbf16>, vector<128x8xf32> -> vector<128x8xf32>
    %96 = arith.addf %90, %95 : vector<128x8xf32>
    %c0_111 = arith.constant 0 : index
    %c0_112 = arith.constant 0 : index
    %c2_113 = arith.constant 2 : index
    %c0_114 = arith.constant 0 : index
    %97 = vector.load %arg7[%c0_111, %c0_112, %c2_113, %c0_114] : memref<2x10x10x8xbf16, #tpu.memory_space<vmem>>, vector<2x8x8x8xbf16>
    %98 = vector.shape_cast %97 : vector<2x8x8x8xbf16> to vector<128x8xbf16>
    %c2_115 = arith.constant 2 : index
    %c0_116 = arith.constant 0 : index
    %c0_117 = arith.constant 0 : index
    %99 = vector.load %arg4[%c2_115, %c0_116, %c0_117] : memref<9x8x8xbf16, #tpu.memory_space<vmem>>, vector<1x8x8xbf16>
    %100 = vector.shape_cast %99 : vector<1x8x8xbf16> to vector<8x8xbf16>
    %cst_118 = arith.constant dense<0.000000e+00> : vector<128x8xf32>
    %101 = tpu.matmul %98, %100, %cst_118 {dimension_numbers = #tpu.dot_dimension_numbers<[1], [0], [0], [1], [0, 0, 1, 1], [], []>} : vector<128x8xbf16>, vector<8x8xbf16>, vector<128x8xf32> -> vector<128x8xf32>
    %102 = arith.addf %96, %101 : vector<128x8xf32>
    %c0_119 = arith.constant 0 : index
    %c1_120 = arith.constant 1 : index
    %c0_121 = arith.constant 0 : index
    %c0_122 = arith.constant 0 : index
    %103 = vector.load %arg7[%c0_119, %c1_120, %c0_121, %c0_122] : memref<2x10x10x8xbf16, #tpu.memory_space<vmem>>, vector<2x8x8x8xbf16>
    %104 = vector.shape_cast %103 : vector<2x8x8x8xbf16> to vector<128x8xbf16>
    %c3_123 = arith.constant 3 : index
    %c0_124 = arith.constant 0 : index
    %c0_125 = arith.constant 0 : index
    %105 = vector.load %arg4[%c3_123, %c0_124, %c0_125] : memref<9x8x8xbf16, #tpu.memory_space<vmem>>, vector<1x8x8xbf16>
    %106 = vector.shape_cast %105 : vector<1x8x8xbf16> to vector<8x8xbf16>
    %cst_126 = arith.constant dense<0.000000e+00> : vector<128x8xf32>
    %107 = tpu.matmul %104, %106, %cst_126 {dimension_numbers = #tpu.dot_dimension_numbers<[1], [0], [0], [1], [0, 0, 1, 1], [], []>} : vector<128x8xbf16>, vector<8x8xbf16>, vector<128x8xf32> -> vector<128x8xf32>
    %108 = arith.addf %102, %107 : vector<128x8xf32>
    %c0_127 = arith.constant 0 : index
    %c1_128 = arith.constant 1 : index
    %c1_129 = arith.constant 1 : index
    %c0_130 = arith.constant 0 : index
    %109 = vector.load %arg7[%c0_127, %c1_128, %c1_129, %c0_130] : memref<2x10x10x8xbf16, #tpu.memory_space<vmem>>, vector<2x8x8x8xbf16>
    %110 = vector.shape_cast %109 : vector<2x8x8x8xbf16> to vector<128x8xbf16>
    %c4_131 = arith.constant 4 : index
    %c0_132 = arith.constant 0 : index
    %c0_133 = arith.constant 0 : index
    %111 = vector.load %arg4[%c4_131, %c0_132, %c0_133] : memref<9x8x8xbf16, #tpu.memory_space<vmem>>, vector<1x8x8xbf16>
    %112 = vector.shape_cast %111 : vector<1x8x8xbf16> to vector<8x8xbf16>
    %cst_134 = arith.constant dense<0.000000e+00> : vector<128x8xf32>
    %113 = tpu.matmul %110, %112, %cst_134 {dimension_numbers = #tpu.dot_dimension_numbers<[1], [0], [0], [1], [0, 0, 1, 1], [], []>} : vector<128x8xbf16>, vector<8x8xbf16>, vector<128x8xf32> -> vector<128x8xf32>
    %114 = arith.addf %108, %113 : vector<128x8xf32>
    %c0_135 = arith.constant 0 : index
    %c1_136 = arith.constant 1 : index
    %c2_137 = arith.constant 2 : index
    %c0_138 = arith.constant 0 : index
    %115 = vector.load %arg7[%c0_135, %c1_136, %c2_137, %c0_138] : memref<2x10x10x8xbf16, #tpu.memory_space<vmem>>, vector<2x8x8x8xbf16>
    %116 = vector.shape_cast %115 : vector<2x8x8x8xbf16> to vector<128x8xbf16>
    %c5_139 = arith.constant 5 : index
    %c0_140 = arith.constant 0 : index
    %c0_141 = arith.constant 0 : index
    %117 = vector.load %arg4[%c5_139, %c0_140, %c0_141] : memref<9x8x8xbf16, #tpu.memory_space<vmem>>, vector<1x8x8xbf16>
    %118 = vector.shape_cast %117 : vector<1x8x8xbf16> to vector<8x8xbf16>
    %cst_142 = arith.constant dense<0.000000e+00> : vector<128x8xf32>
    %119 = tpu.matmul %116, %118, %cst_142 {dimension_numbers = #tpu.dot_dimension_numbers<[1], [0], [0], [1], [0, 0, 1, 1], [], []>} : vector<128x8xbf16>, vector<8x8xbf16>, vector<128x8xf32> -> vector<128x8xf32>
    %120 = arith.addf %114, %119 : vector<128x8xf32>
    %c0_143 = arith.constant 0 : index
    %c2_144 = arith.constant 2 : index
    %c0_145 = arith.constant 0 : index
    %c0_146 = arith.constant 0 : index
    %121 = vector.load %arg7[%c0_143, %c2_144, %c0_145, %c0_146] : memref<2x10x10x8xbf16, #tpu.memory_space<vmem>>, vector<2x8x8x8xbf16>
    %122 = vector.shape_cast %121 : vector<2x8x8x8xbf16> to vector<128x8xbf16>
    %c6_147 = arith.constant 6 : index
    %c0_148 = arith.constant 0 : index
    %c0_149 = arith.constant 0 : index
    %123 = vector.load %arg4[%c6_147, %c0_148, %c0_149] : memref<9x8x8xbf16, #tpu.memory_space<vmem>>, vector<1x8x8xbf16>
    %124 = vector.shape_cast %123 : vector<1x8x8xbf16> to vector<8x8xbf16>
    %cst_150 = arith.constant dense<0.000000e+00> : vector<128x8xf32>
    %125 = tpu.matmul %122, %124, %cst_150 {dimension_numbers = #tpu.dot_dimension_numbers<[1], [0], [0], [1], [0, 0, 1, 1], [], []>} : vector<128x8xbf16>, vector<8x8xbf16>, vector<128x8xf32> -> vector<128x8xf32>
    %126 = arith.addf %120, %125 : vector<128x8xf32>
    %c0_151 = arith.constant 0 : index
    %c2_152 = arith.constant 2 : index
    %c1_153 = arith.constant 1 : index
    %c0_154 = arith.constant 0 : index
    %127 = vector.load %arg7[%c0_151, %c2_152, %c1_153, %c0_154] : memref<2x10x10x8xbf16, #tpu.memory_space<vmem>>, vector<2x8x8x8xbf16>
    %128 = vector.shape_cast %127 : vector<2x8x8x8xbf16> to vector<128x8xbf16>
    %c7_155 = arith.constant 7 : index
    %c0_156 = arith.constant 0 : index
    %c0_157 = arith.constant 0 : index
    %129 = vector.load %arg4[%c7_155, %c0_156, %c0_157] : memref<9x8x8xbf16, #tpu.memory_space<vmem>>, vector<1x8x8xbf16>
    %130 = vector.shape_cast %129 : vector<1x8x8xbf16> to vector<8x8xbf16>
    %cst_158 = arith.constant dense<0.000000e+00> : vector<128x8xf32>
    %131 = tpu.matmul %128, %130, %cst_158 {dimension_numbers = #tpu.dot_dimension_numbers<[1], [0], [0], [1], [0, 0, 1, 1], [], []>} : vector<128x8xbf16>, vector<8x8xbf16>, vector<128x8xf32> -> vector<128x8xf32>
    %132 = arith.addf %126, %131 : vector<128x8xf32>
    %c0_159 = arith.constant 0 : index
    %c2_160 = arith.constant 2 : index
    %c2_161 = arith.constant 2 : index
    %c0_162 = arith.constant 0 : index
    %133 = vector.load %arg7[%c0_159, %c2_160, %c2_161, %c0_162] : memref<2x10x10x8xbf16, #tpu.memory_space<vmem>>, vector<2x8x8x8xbf16>
    %134 = vector.shape_cast %133 : vector<2x8x8x8xbf16> to vector<128x8xbf16>
    %c8_163 = arith.constant 8 : index
    %c0_164 = arith.constant 0 : index
    %c0_165 = arith.constant 0 : index
    %135 = vector.load %arg4[%c8_163, %c0_164, %c0_165] : memref<9x8x8xbf16, #tpu.memory_space<vmem>>, vector<1x8x8xbf16>
    %136 = vector.shape_cast %135 : vector<1x8x8xbf16> to vector<8x8xbf16>
    %cst_166 = arith.constant dense<0.000000e+00> : vector<128x8xf32>
    %137 = tpu.matmul %134, %136, %cst_166 {dimension_numbers = #tpu.dot_dimension_numbers<[1], [0], [0], [1], [0, 0, 1, 1], [], []>} : vector<128x8xbf16>, vector<8x8xbf16>, vector<128x8xf32> -> vector<128x8xf32>
    %138 = arith.addf %132, %137 : vector<128x8xf32>
    %c0_167 = arith.constant 0 : index
    %c0_168 = arith.constant 0 : index
    %139 = vector.load %arg5[%c0_167, %c0_168] : memref<1x8xf32, #tpu.memory_space<vmem>>, vector<1x8xf32>
    %140 = vector.broadcast %139 : vector<1x8xf32> to vector<128x8xf32>
    %141 = arith.addf %138, %140 : vector<128x8xf32>
    %142 = arith.addf %141, %82 : vector<128x8xf32>
    %cst_169 = arith.constant 0.000000e+00 : f32
    %143 = vector.broadcast %cst_169 : f32 to vector<128x8xf32>
    %144 = arith.maximumf %142, %143 : vector<128x8xf32>
    %145 = vector.shape_cast %144 : vector<128x8xf32> to vector<2x64x8xf32>
    %146 = vector.extract_strided_slice %145 {offsets = [0, 0, 0], sizes = [1, 64, 8], strides = [1, 1, 1]} : vector<2x64x8xf32> to vector<1x64x8xf32>
    %147 = vector.shape_cast %146 : vector<1x64x8xf32> to vector<64x8xf32>
    %148 = tpu.transpose %147, [1, 0] : vector<64x8xf32> -> vector<8x64xf32>
    %c0_170 = arith.constant 0 : index
    %c0_171 = arith.constant 0 : index
    %c0_172 = arith.constant 0 : index
    %149 = vector.load %arg6[%c0_170, %c0_171, %c0_172] : memref<2x8x64xf32, #tpu.memory_space<vmem>>, vector<1x8x64xf32>
    %150 = vector.shape_cast %149 : vector<1x8x64xf32> to vector<8x64xf32>
    %151 = vector.shape_cast %148 : vector<8x64xf32> to vector<1x8x64xf32>
    tpu.vector_store %arg6[%c0_170, %c0_171, %c0_172], %151 {strides = array<i32>} : memref<2x8x64xf32, #tpu.memory_space<vmem>>, vector<1x8x64xf32>,
    %152 = vector.extract_strided_slice %145 {offsets = [1, 0, 0], sizes = [1, 64, 8], strides = [1, 1, 1]} : vector<2x64x8xf32> to vector<1x64x8xf32>
    %153 = vector.shape_cast %152 : vector<1x64x8xf32> to vector<64x8xf32>
    %154 = tpu.transpose %153, [1, 0] : vector<64x8xf32> -> vector<8x64xf32>
    %c1_173 = arith.constant 1 : index
    %c0_174 = arith.constant 0 : index
    %c0_175 = arith.constant 0 : index
    %155 = vector.load %arg6[%c1_173, %c0_174, %c0_175] : memref<2x8x64xf32, #tpu.memory_space<vmem>>, vector<1x8x64xf32>
    %156 = vector.shape_cast %155 : vector<1x8x64xf32> to vector<8x64xf32>
    %157 = vector.shape_cast %154 : vector<8x64xf32> to vector<1x8x64xf32>
    tpu.vector_store %arg6[%c1_173, %c0_174, %c0_175], %157 {strides = array<i32>} : memref<2x8x64xf32, #tpu.memory_space<vmem>>, vector<1x8x64xf32>,
    return
  }
  func.func @transform_0(%arg0: i32) -> (i32, i32, i32, i32, i32) {
    %c0_i32 = arith.constant 0 : i32
    %c0_i32_0 = arith.constant 0 : i32
    %c0_i32_1 = arith.constant 0 : i32
    %c0_i32_2 = arith.constant 0 : i32
    %c0_i32_3 = arith.constant 0 : i32
    return %arg0, %c0_i32, %c0_i32_0, %c0_i32_1, %c0_i32_2 : i32, i32, i32, i32, i32
  }
  func.func @transform_1(%arg0: i32) -> (i32, i32, i32) {
    %c0_i32 = arith.constant 0 : i32
    %c0_i32_0 = arith.constant 0 : i32
    %c0_i32_1 = arith.constant 0 : i32
    %c0_i32_2 = arith.constant 0 : i32
    return %c0_i32, %c0_i32_0, %c0_i32_1 : i32, i32, i32
  }
  func.func @transform_2(%arg0: i32) -> (i32, i32) {
    %c0_i32 = arith.constant 0 : i32
    %c0_i32_0 = arith.constant 0 : i32
    %c0_i32_1 = arith.constant 0 : i32
    return %c0_i32, %c0_i32_0 : i32, i32
  }
  func.func @transform_3(%arg0: i32) -> (i32, i32, i32) {
    %c0_i32 = arith.constant 0 : i32
    %c0_i32_0 = arith.constant 0 : i32
    %c0_i32_1 = arith.constant 0 : i32
    %c0_i32_2 = arith.constant 0 : i32
    return %c0_i32, %c0_i32_0, %c0_i32_1 : i32, i32, i32
  }
  func.func @transform_4(%arg0: i32) -> (i32, i32) {
    %c0_i32 = arith.constant 0 : i32
    %c0_i32_0 = arith.constant 0 : i32
    %c0_i32_1 = arith.constant 0 : i32
    return %c0_i32, %c0_i32_0 : i32, i32
  }
  func.func @transform_5(%arg0: i32) -> (i32, i32, i32) {
    %c0_i32 = arith.constant 0 : i32
    %c0_i32_0 = arith.constant 0 : i32
    %c0_i32_1 = arith.constant 0 : i32
    return %arg0, %c0_i32, %c0_i32_0 : i32, i32, i32
  }
}

</mosaic_0001>

<bundles_post_ra>
// kernel: tpu_custom_call.1
= control target key start
LH: loop header
LB: loop body
LE: loop exit
PB: predicated region body
PF: predicated region fallthrough
CT: control target
= control target key end

     0   :  { %vm259_vm0 = vcmask 1041408   ;;  %vm234_vm1 = vcmask 31744   ;;  %vm556_vm2 = vsmask.f32 3328  ;;  %vm557_vm3 = vsmask.f32 7440  ;;  %s8848_s0 = inlined_call_operand.vmem [shape: bf16[2,4,9,9,4], index: 0, kind: input, shape index: {}]   ;;  %s8849_s1 = inlined_call_operand.vmem [shape: bf16[9,4,16], index: 1, kind: input, shape index: {}]   ;;  %s8850_s2 = inlined_call_operand.vmem [shape: f32[1,16], index: 2, kind: input, shape index: {}]   ;;  %s8851_s3 = inlined_call_operand.vmem [shape: bf16[9,8,8], index: 3, kind: input, shape index: {}]   ;;  %s8852_s4 = inlined_call_operand.vmem [shape: f32[1,8], index: 4, kind: input, shape index: {}]   ;;  %s8853_s5 = inlined_call_operand.hbm [shape: f32[2,8,64], index: 5, kind: output, shape index: {}]  }
   0x1   :  { %v5805_v0 = vld [vmem:[%s8849_s1 + $0x2] sm:$0x3]  ;;  %v7085_v2 = vld [vmem:[%s8848_s0 + $0x48] ss:$8 sps:$4 sm:$0xff]   ;;  %v174_v4 = vld [vmem:[%s8849_s1] sm:$0x3] }
   0x2   :  { %7061 = vmatprep.subr.msk.bf16.mxu0 %vm259_vm0, %v5805_v0  ;;  %v261_v1 = vsel %vm259_vm0, %v5805_v0, 0  ;;  %v7086_v3 = vld [vmem:[%s8848_s0 + $0x58] ss:$8 sps:$4 sm:$0xff]   ;;  %6483 = vmatprep.mubr.msk.bf16.mxu0 %vm234_vm1, %v7085_v2  ;;  %v425_v5 = vsel %vm259_vm0, %v174_v4, 0  ;;  %v7087_v6 = vld [vmem:[%s8848_s0 + $0x68] ss:$8 sps:$4 sm:$0xff]   ;;  %vm7371_vm4 = vmor %vm556_vm2, %vm557_vm3 }
   0x3   :  { %6482 = vmatpush3.bf16.msra.mxu0 %v261_v1  ;;  %v7088_v7 = vld [vmem:[%s8848_s0 + $0x78] ss:$8 sps:$4 sm:$0xff]   ;;  %v7089_v8 = vld [vmem:[%s8848_s0 + $0x168] ss:$8 sps:$4 sm:$0xff]   ;;  %v5838_v9 = vld [vmem:[%s8849_s1 + $0x4] sm:$0x3] }
   0x4   :  { %7062 = vmatprep.subr.msk.bf16.mxu0 %vm259_vm0, %v174_v4  ;;  %v7090_v10 = vld [vmem:[%s8848_s0 + $0x178] ss:$8 sps:$4 sm:$0xff]   ;;  %v7091_v11 = vld [vmem:[%s8848_s0 + $0x188] ss:$8 sps:$4 sm:$0xff]   ;;  %v525_v16 = vld [vmem:[%s8848_s0 + $0x4] sm:$0x1] }
   0x5   :  { %v7092_v12 = vld [vmem:[%s8848_s0 + $0x198] ss:$8 sps:$4 sm:$0xff]   ;;  %v526_v15 = vld [vmem:[%s8848_s0 + $0x8] sm:$0xf]  ;;  %v834_v23 = vsel %vm259_vm0, %v5838_v9, 0  ;;  %v569_v25 = vshll.u32 %v525_v16, 16 }
   0x6   :  { %6484 = vmatmul.mubr.msk.bf16.vlgmr.msra.gmra.mrb[0].mxu0 %vm234_vm1, %v7086_v3  ;;  %v7093_v13 = vld [vmem:[%s8848_s0] ss:$8 sps:$4 sm:$0xff]   ;;  %v574_v19 = vshrl.u32 %v526_v15, 16  ;;  %v577_v20 = vshll.u32 %v526_v15, 16  ;;  %v7094_v21 = vld [vmem:[%s8848_s0 + $0x10] ss:$8 sps:$4 sm:$0xff]  }
   0x7   :  { %6500 = vmatpush3.bf16.msra.mxu0 %v425_v5  ;;  %6487 = vmatprep.mubr.msk.bf16.mxu0 %vm234_vm1, %v7087_v6  ;;  %v524_v14 = vld [vmem:[%s8848_s0] sm:$0xf]  ;;  %v527_v24 = vld [vmem:[%s8848_s0 + $0xc] sm:$0x1]  ;;  %v528_v26 = vld [vmem:[%s8848_s0 + $0x10] sm:$0xf] }
   0x8   :  { %7063 = vmatprep.subr.msk.bf16.mxu0 %vm259_vm0, %v5838_v9  ;;  %v560_v17 = vshrl.u32 %v524_v14, 16  ;;  %v563_v18 = vshll.u32 %v524_v14, 16  ;;  %v7095_v22 = vld [vmem:[%s8848_s0 + $0x20] ss:$8 sps:$4 sm:$0xff]   ;;  %v530_v29 = vld [vmem:[%s8848_s0 + $0x18] sm:$0xf] }
   0x9   :  { %v532_v30 = vld [vmem:[%s8848_s0 + $0x20] sm:$0xf]  ;;  %v576_v31 = vrot.slane %v574_v19, 4  ;;  %v579_v32 = vrot.slane %v577_v20, 5  ;;  %v529_v33 = vld [vmem:[%s8848_s0 + $0x14] sm:$0x1] }
   0xa   :  { %v562_v27 = vrot.slane %v560_v17, 4  ;;  %v565_v28 = vrot.slane %v563_v18, 5  ;;  %v5871_v34 = vld [vmem:[%s8849_s1 + $0x6] sm:$0x3]  ;;  %v583_v35 = vshll.u32 %v527_v24, 16  ;;  %v588_v36 = vshrl.u32 %v528_v26, 16 }
   0xb   :  { %v591_v37 = vshll.u32 %v528_v26, 16  ;;  %v531_v38 = vld [vmem:[%s8848_s0 + $0x1c] sm:$0x1]  ;;  %v602_v39 = vshrl.u32 %v530_v29, 16  ;;  %v605_v40 = vshll.u32 %v530_v29, 16  ;;  %v616_v41 = vshrl.u32 %v532_v30, 16 }
   0xc   :  { %v619_v42 = vshll.u32 %v532_v30, 16  ;;  %v7096_v43 = vld [vmem:[%s8848_s0 + $0x30] ss:$8 sps:$4 sm:$0xff]   ;;  %v566_v44 = vor.u32 %v565_v28, %v562_v27  ;;  %v597_v45 = vshll.u32 %v529_v33, 16  ;;  %v7309_v46 = vrot.slane %v569_v25, 5 }
   0xd   :  { %v580_v47 = vor.u32 %v579_v32, %v576_v31  ;;  %v534_v48 = vld [vmem:[%s8848_s0 + $0x28] sm:$0xf]  ;;  %v7314_v49 = vrot.slane %v583_v35, 5  ;;  %v590_v50 = vrot.slane %v588_v36, 4  ;;  %v593_v51 = vrot.slane %v591_v37, 5 }
   0xe   :  { %6488 = vmatmul.mubr.msk.bf16.gmra.mrb[4].mxu0 %vm234_vm1, %v7088_v7  ;;  %v611_v52 = vshll.u32 %v531_v38, 16  ;;  %v536_v53 = vld [vmem:[%s8848_s0 + $0x30] sm:$0xf]  ;;  %v7097_v54 = vld [vmem:[%s8848_s0 + $0x120] ss:$8 sps:$4 sm:$0xff]   ;;  %v604_v55 = vrot.slane %v602_v39, 4 }
   0xf   :  { %6491 = vmatprep.mubr.msk.bf16.mxu0 %vm234_vm1, %v7089_v8  ;;  %v607_v56 = vrot.slane %v605_v40, 5  ;;  %v618_v57 = vrot.slane %v616_v41, 4  ;;  %v621_v58 = vrot.slane %v619_v42, 5  ;;  %v7322_v59 = vrot.slane %v566_v44, 4  ;;  %v533_v61 = vld [vmem:[%s8848_s0 + $0x24] sm:$0x1] }
  0x10   :  { %v7324_v60 = vrot.slane %v597_v45, 5  ;;  %v630_v62 = vshrl.u32 %v534_v48, 16  ;;  %v633_v63 = vshll.u32 %v534_v48, 16  ;;  %v7329_v0 = vrot.slane %v580_v47, 4  ;;  %v538_v2 = vld [vmem:[%s8848_s0 + $0x38] sm:$0xf] }
  0x11   :  { %v7332_v1 = vsel %vm259_vm0, %v5871_v34, 0  ;;  %v644_v3 = vshrl.u32 %v536_v53, 16  ;;  %v647_v4 = vshll.u32 %v536_v53, 16  ;;  %v535_v5 = vld [vmem:[%s8848_s0 + $0x2c] sm:$0x1]  ;;  %v594_v6 = vor.u32 %v593_v51, %v590_v50 }
  0x12   :  { %v608_v7 = vor.u32 %v607_v56, %v604_v55  ;;  %v622_v8 = vor.u32 %v621_v58, %v618_v57  ;;  %v625_v9 = vshll.u32 %v533_v61, 16  ;;  %v635_v14 = vrot.slane %v633_v63, 5  ;;  %v539_v15 = vld [vmem:[%s8848_s0 + $0x3c] sm:$0x1]  ;;  %v7099_v18 = vld [vmem:[%s8848_s0 + $0x140] ss:$8 sps:$4 sm:$0xff]  }
  0x13   :  { %v658_v16 = vshrl.u32 %v538_v2, 16  ;;  %v661_v17 = vshll.u32 %v538_v2, 16  ;;  %v7357_v19 = vrot.slane %v611_v52, 5  ;;  %v639_v20 = vshll.u32 %v535_v5, 16  ;;  %v542_v24 = vld [vmem:[%s8848_s0 + $0x128] sm:$0xf] }
  0x14   :  { %v7365_v27 = vrot.slane %v594_v6, 4  ;;  %v609_v28 = vrot.slane %v608_v7, 4  ;;  %v7367_v29 = vrot.slane %v625_v9, 5  ;;  %v7375_v32 = vrot.slane %v622_v8, 4  ;;  %v543_v45 = vld [vmem:[%s8848_s0 + $0x12c] sm:$0x1] }
  0x15   :  { %v663_v35 = vrot.slane %v661_v17, 5  ;;  %v667_v37 = vshll.u32 %v539_v15, 16  ;;  %v686_v39 = vshrl.u32 %v542_v24, 16  ;;  %v641_v40 = vrot.slane %v639_v20, 5  ;;  %v544_v47 = vld [vmem:[%s8848_s0 + $0x130] sm:$0xf] }
  0x16   :  { %6492 = vmatmul.mubr.msk.bf16.gmra.mrb[8].mxu0 %vm234_vm1, %v7090_v10  ;;  %v537_v10 = vld [vmem:[%s8848_s0 + $0x34] sm:$0x1]  ;;  %v572_v44 = vsel %vm7371_vm4, %v7322_v59, %v7309_v46  ;;  %v7100_v48 = vld [vmem:[%s8848_s0 + $0x150] ss:$8 sps:$4 sm:$0xff]   ;;  %v586_v50 = vsel %vm7371_vm4, %v7329_v0, %v7314_v49  ;;  %v695_v61 = vshll.u32 %v543_v45, 16 }
  0x17   :  { %6495 = vmatprep.mubr.msk.bf16.mxu0 %vm234_vm1, %v7091_v11  ;;  %v540_v11 = vld [vmem:[%s8848_s0 + $0x120] sm:$0xf]  ;;  %v653_v30 = vshll.u32 %v537_v10, 16  ;;  %v688_v56 = vrot.slane %v686_v39, 4  ;;  %v546_v57 = vld [vmem:[%s8848_s0 + $0x138] sm:$0xf]  ;;  %v600_v10 = vsel %vm7371_vm4, %v7365_v27, %v7324_v60 }
  0x18   :  { %v672_v25 = vshrl.u32 %v540_v11, 16  ;;  %v675_v26 = vshll.u32 %v540_v11, 16  ;;  %v548_v49 = vld [vmem:[%s8848_s0 + $0x140] sm:$0xf]  ;;  %v550_v63 = vld [vmem:[%s8848_s0 + $0x148] sm:$0xf]  ;;  %v614_v11 = vsel %vm7371_vm4, %v609_v28, %v7357_v19 }
  0x19   :  { %v7396_v52 = vrot.slane %v653_v30, 5  ;;  %v545_v2 = vld [vmem:[%s8848_s0 + $0x134] sm:$0x1]  ;;  %v714_v5 = vshrl.u32 %v546_v57, 16  ;;  %v697_v8 = vrot.slane %v695_v61, 5  ;;  %v717_v9 = vshll.u32 %v546_v57, 16 }
  0x1a   :  { %v674_v41 = vrot.slane %v672_v25, 4  ;;  %v677_v42 = vrot.slane %v675_v26, 5  ;;  %v745_v17 = vshll.u32 %v550_v63, 16  ;;  %v547_v60 = vld [vmem:[%s8848_s0 + $0x13c] sm:$0x1] }
  0x1b   :  { %v716_v19 = vrot.slane %v714_v5, 4  ;;  %v552_v25 = vld [vmem:[%s8848_s0 + $0x150] sm:$0xf]  ;;  %v554_v26 = vld [vmem:[%s8848_s0 + $0x158] sm:$0xf] }
  0x1c   :  { %v678_v58 = vor.u32 %v677_v42, %v674_v41  ;;  %v549_v28 = vld [vmem:[%s8848_s0 + $0x144] sm:$0x1]  ;;  %v723_v42 = vshll.u32 %v547_v60, 16  ;;  %v770_v45 = vshrl.u32 %v554_v26, 16 }
  0x1e   :  { %6496 = vmatmul.mubr.msk.bf16.gmra.mrb[12].mxu0 %vm234_vm1, %v7092_v12  ;;  %v7098_v12 = vld [vmem:[%s8848_s0 + $0x130] ss:$8 sps:$4 sm:$0xff]   ;;  %v679_v6 = vrot.slane %v678_v58, 4  ;;  %v725_v57 = vrot.slane %v723_v42, 5  ;;  %v772_v61 = vrot.slane %v770_v45, 4 }
  0x1f   :  { %6501 = vmatprep.mubr.msk.bf16.mxu0 %vm234_vm1, %v7093_v13  ;;  %v632_v13 = vrot.slane %v630_v62, 4  ;;  %v5839_v62 = vcombine.low %v572_v44, %v586_v50  ;;  %v759_v44 = vshll.u32 %v552_v25, 16  ;;  %v737_v50 = vshll.u32 %v549_v28, 16  ;;  %v7107_v28 = vld [vmem:[%s8848_s0 + $0x1d0] ss:$8 sps:$4 sm:$0xff]  }
  0x21   :  { %v636_v33 = vor.u32 %v635_v14, %v632_v13  ;;  %v731_v13 = vshll.u32 %v548_v49, 16  ;;  %v628_v14 = vsel %vm7371_vm4, %v7375_v32, %v7367_v29  ;;  %v551_v29 = vld [vmem:[%s8848_s0 + $0x14c] sm:$0x1] }
  0x23   :  { %v637_v51 = vrot.slane %v636_v33, 4  ;;  %v733_v32 = vrot.slane %v731_v13, 5 }
  0x25   :  { %v642_v15 = vsel %vm7371_vm4, %v637_v51, %v641_v40 }
  0x26   :  { %6502 = vmatmul.mubr.msk.bf16.vlgmr.msra.gmra.mrb[0].mxu0 %vm234_vm1, %v7094_v21  ;;  %v646_v21 = vrot.slane %v644_v3, 4  ;;  %v700_v3 = vshrl.u32 %v544_v47, 16  ;;  %v5841_v27 = vcombine.low %v628_v14, %v642_v15 }
  0x27   :  { %6518 = vmatpush3.bf16.msra.mxu0 %v834_v23  ;;  %6505 = vmatprep.mubr.msk.bf16.mxu0 %vm234_vm1, %v7095_v22  ;;  %v649_v22 = vrot.slane %v647_v4, 5  ;;  %v541_v23 = vld [vmem:[%s8848_s0 + $0x124] sm:$0x1]  ;;  %v703_v4 = vshll.u32 %v544_v47, 16  ;;  %v773_v47 = vshll.u32 %v554_v26, 16 }
  0x28   :  { %7064 = vmatprep.subr.msk.bf16.mxu0 %vm259_vm0, %v5871_v34  ;;  %v660_v34 = vrot.slane %v658_v16, 4  ;;  %v681_v38 = vshll.u32 %v541_v23, 16  ;;  %v742_v16 = vshrl.u32 %v550_v63, 16  ;;  %v739_v63 = vrot.slane %v737_v50, 5  ;;  %v7105_v26 = vld [vmem:[%s8848_s0 + $0x1b0] ss:$8 sps:$4 sm:$0xff]  }
  0x29   :  { %v650_v36 = vor.u32 %v649_v22, %v646_v21  ;;  %v705_v20 = vrot.slane %v703_v4, 5  ;;  %v709_v21 = vshll.u32 %v545_v2, 16  ;;  %v5840_v22 = vcombine.low %v600_v10, %v614_v11 }
  0x2a   :  { %v664_v46 = vor.u32 %v663_v35, %v660_v34  ;;  %v7402_v55 = vrot.slane %v681_v38, 5  ;;  %v744_v33 = vrot.slane %v742_v16, 4  ;;  %v747_v34 = vrot.slane %v745_v17, 5  ;;  %v5904_v38 = vld [vmem:[%s8849_s1 + $0x8] sm:$0x3] }
  0x2b   :  { %v7398_v53 = vrot.slane %v650_v36, 4 }
  0x2c   :  { %v665_v0 = vrot.slane %v664_v46, 4  ;;  %v748_v51 = vor.u32 %v747_v34, %v744_v33 }
  0x2d   :  { %v656_v35 = vsel %vm7371_vm4, %v7398_v53, %v7396_v52  ;;  %v751_v52 = vshll.u32 %v551_v29, 16  ;;  %v711_v53 = vrot.slane %v709_v21, 5  ;;  %v7101_v21 = vld [vmem:[%s8848_s0 + $0x90] ss:$8 sps:$4 sm:$0xff]  }
  0x2e   :  { %6506 = vmatmul.mubr.msk.bf16.gmra.mrb[4].mxu0 %vm234_vm1, %v7096_v43  ;;  %v689_v43 = vshll.u32 %v542_v24, 16  ;;  %v719_v24 = vrot.slane %v717_v9, 5 }
  0x2f   :  { %6509 = vmatprep.mubr.msk.bf16.mxu0 %vm234_vm1, %v7097_v54  ;;  %v7400_v54 = vrot.slane %v667_v37, 5  ;;  %v684_v37 = vsel %vm7371_vm4, %v679_v6, %v7402_v55  ;;  %v753_v2 = vrot.slane %v751_v52, 5 }
  0x30   :  { %v691_v59 = vrot.slane %v689_v43, 5  ;;  %v720_v41 = vor.u32 %v719_v24, %v716_v19  ;;  %v756_v43 = vshrl.u32 %v552_v25, 16  ;;  %v7102_v19 = vld [vmem:[%s8848_s0 + $0xa0] ss:$8 sps:$4 sm:$0xff]  }
  0x31   :  { %v670_v36 = vsel %vm7371_vm4, %v665_v0, %v7400_v54  ;;  %v749_v0 = vrot.slane %v748_v51, 4  ;;  %v5953_v24 = vld [vmem:[%s8849_s1 + $0xa] sm:$0x3] }
  0x32   :  { %v692_v7 = vor.u32 %v691_v59, %v688_v56  ;;  %v5842_v46 = vcombine.low %v656_v35, %v670_v36  ;;  %v721_v56 = vrot.slane %v720_v41, 4  ;;  %v758_v58 = vrot.slane %v756_v43, 4  ;;  %v7104_v25 = vld [vmem:[%s8848_s0 + $0xc0] ss:$8 sps:$4 sm:$0xff]  }
  0x33   :  { %v761_v59 = vrot.slane %v759_v44, 5  ;;  %v754_v11 = vsel %vm7371_vm4, %v749_v0, %v753_v2 }
  0x34   :  { %v693_v23 = vrot.slane %v692_v7, 4  ;;  %v726_v6 = vsel %vm7371_vm4, %v721_v56, %v725_v57 }
  0x35   :  { %v762_v7 = vor.u32 %v761_v59, %v758_v58 }
  0x36   :  { %6510 = vmatmul.mubr.msk.bf16.gmra.mrb[8].mxu0 %vm234_vm1, %v7098_v12  ;;  %v728_v12 = vshrl.u32 %v548_v49, 16  ;;  %v698_v39 = vsel %vm7371_vm4, %v693_v23, %v697_v8  ;;  %v1232_v23 = vsel %vm259_vm0, %v5904_v38, 0 }
  0x37   :  { %6513 = vmatprep.mubr.msk.bf16.mxu0 %vm234_vm1, %v7099_v18  ;;  %v702_v18 = vrot.slane %v700_v3, 4  ;;  %v5843_v54 = vcombine.low %v684_v37, %v698_v39  ;;  %v555_v3 = vld [vmem:[%s8848_s0 + $0x15c] sm:$0x1]  ;;  %v763_v15 = vrot.slane %v762_v7, 4 }
  0x38   :  { %v730_v30 = vrot.slane %v728_v12, 4  ;;  %v779_v9 = vshll.u32 %v555_v3, 16 }
  0x39   :  { %v706_v40 = vor.u32 %v705_v20, %v702_v18 }
  0x3a   :  { %v781_v17 = vrot.slane %v779_v9, 5 }
  0x3b   :  { %v707_v55 = vrot.slane %v706_v40, 4 }
  0x3d   :  { %v712_v4 = vsel %vm7371_vm4, %v707_v55, %v711_v53 }
  0x3e   :  { %6514 = vmatmul.mubr.msk.bf16.gmra.mrb[12].mxu0 %vm234_vm1, %v7100_v48  ;;  %v734_v48 = vor.u32 %v733_v32, %v730_v30  ;;  %v5844_v12 = vcombine.low %v712_v4, %v726_v6 }
  0x3f   :  { %6519 = vmatprep.mubr.msk.bf16.mxu0 %vm234_vm1, %v5839_v62  ;;  %v775_v62 = vrot.slane %v773_v47, 5 }
  0x40   :  { %v735_v49 = vrot.slane %v734_v48, 4 }
  0x41   :  { %v776_v8 = vor.u32 %v775_v62, %v772_v61 }
  0x42   :  { %v740_v10 = vsel %vm7371_vm4, %v735_v49, %v739_v63 }
  0x43   :  { %v5845_v14 = vcombine.low %v740_v10, %v754_v11  ;;  %v777_v16 = vrot.slane %v776_v8, 4 }
  0x45   :  { %v782_v18 = vsel %vm7371_vm4, %v777_v16, %v781_v17 }
  0x46   :  { %6520 = vmatmul.mubr.msk.bf16.vlgmr.msra.gmra.mrb[0].mxu0 %vm234_vm1, %v5840_v22  ;;  %v7103_v22 = vld [vmem:[%s8848_s0 + $0xb0] ss:$8 sps:$4 sm:$0xff]  }
  0x47   :  { %6536 = vmatpush3.bf16.msra.mxu0 %v7332_v1  ;;  %6523 = vmatprep.mubr.msk.bf16.mxu0 %vm234_vm1, %v5841_v27  ;;  %v553_v1 = vld [vmem:[%s8848_s0 + $0x154] sm:$0x1]  ;;  %v7106_v27 = vld [vmem:[%s8848_s0 + $0x1c0] ss:$8 sps:$4 sm:$0xff]  }
  0x48   :  { %7065 = vmatprep.subr.msk.bf16.mxu0 %vm259_vm0, %v5904_v38  ;;  %v765_v5 = vshll.u32 %v553_v1, 16 }
  0x4a   :  { %v767_v13 = vrot.slane %v765_v5, 5 }
  0x4c   :  { %v768_v60 = vsel %vm7371_vm4, %v763_v15, %v767_v13 }
  0x4d   :  { %v5846_v20 = vcombine.low %v768_v60, %v782_v18 }
  0x4e   :  { %6524 = vmatmul.mubr.msk.bf16.gmra.mrb[4].mxu0 %vm234_vm1, %v5842_v46 }
  0x4f   :  { %6527 = vmatprep.mubr.msk.bf16.mxu0 %vm234_vm1, %v5843_v54 }
  0x56   :  { %6528 = vmatmul.mubr.msk.bf16.gmra.mrb[8].mxu0 %vm234_vm1, %v5844_v12 }
  0x57   :  { %6531 = vmatprep.mubr.msk.bf16.mxu0 %vm234_vm1, %v5845_v14 }
  0x5e   :  { %6532 = vmatmul.mubr.msk.bf16.gmra.mrb[12].mxu0 %vm234_vm1, %v5846_v20 }
  0x5f   :  { %6537 = vmatprep.mubr.msk.bf16.mxu0 %vm234_vm1, %v7101_v21 }
  0x66   :  { %6538 = vmatmul.mubr.msk.bf16.vlgmr.msra.gmra.mrb[0].mxu0 %vm234_vm1, %v7102_v19 }
  0x67   :  { %6554 = vmatpush3.bf16.msra.mxu0 %v1232_v23  ;;  %6541 = vmatprep.mubr.msk.bf16.mxu0 %vm234_vm1, %v7103_v22 }
  0x68   :  { %7066 = vmatprep.subr.msk.bf16.mxu0 %vm259_vm0, %v5953_v24 }
  0x6e   :  { %6542 = vmatmul.mubr.msk.bf16.gmra.mrb[4].mxu0 %vm234_vm1, %v7104_v25 }
  0x6f   :  { %6545 = vmatprep.mubr.msk.bf16.mxu0 %vm234_vm1, %v7105_v26 }
  0x76   :  { %6546 = vmatmul.mubr.msk.bf16.gmra.mrb[8].mxu0 %vm234_vm1, %v7106_v27 }
  0x77   :  { %6549 = vmatprep.mubr.msk.bf16.mxu0 %vm234_vm1, %v7107_v28 }
  0x78   :  { %10 = vsyncpa [#allocation4], 0  ;;  %v7108_v29 = vld [vmem:[%s8848_s0 + $0x1e0] ss:$8 sps:$4 sm:$0xff]   ;;  %v5921_v33 = vld [vmem:[%s8848_s0 + $0x90] sm:$0xf] }
  0x79   :  { %v7109_v30 = vld [vmem:[%s8848_s0 + $0xd8] ss:$8 sps:$4 sm:$0xff]   ;;  %v7110_v32 = vld [vmem:[%s8848_s0 + $0xe8] ss:$8 sps:$4 sm:$0xff]   ;;  %v1654_v37 = vsel %vm259_vm0, %v5953_v24, 0  ;;  %v1380_v39 = vshrl.u32 %v5921_v33, 16 }
  0x7a   :  { %v5923_v34 = vld [vmem:[%s8848_s0 + $0x98] sm:$0xf]  ;;  %v5925_v36 = vld [vmem:[%s8848_s0 + $0xa0] sm:$0xf]  ;;  %v5927_v38 = vld [vmem:[%s8848_s0 + $0xa8] sm:$0xf] }
  0x7b   :  { %v7111_v35 = vld [vmem:[%s8848_s0 + $0xf8] ss:$8 sps:$4 sm:$0xff]   ;;  %v1383_v40 = vshll.u32 %v5921_v33, 16  ;;  %v1394_v41 = vshrl.u32 %v5923_v34, 16  ;;  %v1397_v42 = vshll.u32 %v5923_v34, 16  ;;  %v1408_v44 = vshrl.u32 %v5925_v36, 16 }
  0x7c   :  { %v7551_v43 = vld [vmem:[%s8849_s1 + $0xc] sm:$0x3]  ;;  %v1411_v45 = vshll.u32 %v5925_v36, 16  ;;  %v5922_v47 = vld [vmem:[%s8848_s0 + $0x94] sm:$0x1]  ;;  %v1422_v48 = vshrl.u32 %v5927_v38, 16 }
  0x7d   :  { %v1425_v50 = vshll.u32 %v5927_v38, 16  ;;  %v7112_v51 = vld [vmem:[%s8848_s0 + $0x108] ss:$8 sps:$4 sm:$0xff]   ;;  %v7113_v52 = vld [vmem:[%s8848_s0 + $0x1f8] ss:$8 sps:$4 sm:$0xff]   ;;  %v1382_v53 = vrot.slane %v1380_v39, 4 }
  0x7e   :  { %6550 = vmatmul.mubr.msk.bf16.gmra.mrb[12].mxu0 %vm234_vm1, %v7108_v29  ;;  %v5924_v46 = vld [vmem:[%s8848_s0 + $0x9c] sm:$0x1]  ;;  %v1385_v54 = vrot.slane %v1383_v40, 5  ;;  %v1396_v55 = vrot.slane %v1394_v41, 4  ;;  %v1399_v56 = vrot.slane %v1397_v42, 5  ;;  %v1389_v57 = vshll.u32 %v5922_v47, 16 }
  0x7f   :  { %6555 = vmatprep.mubr.msk.bf16.mxu0 %vm234_vm1, %v7109_v30  ;;  %v5926_v1 = vld [vmem:[%s8848_s0 + $0xa4] sm:$0x1]  ;;  %v1410_v58 = vrot.slane %v1408_v44, 4  ;;  %v1413_v59 = vrot.slane %v1411_v45, 5  ;;  %v5928_v61 = vld [vmem:[%s8848_s0 + $0xac] sm:$0x1] }
  0x80   :  { %v1424_v62 = vrot.slane %v1422_v48, 4  ;;  %v1427_v49 = vrot.slane %v1425_v50, 5  ;;  %v5929_v63 = vld [vmem:[%s8848_s0 + $0xb0] sm:$0xf]  ;;  %v5931_v0 = vld [vmem:[%s8848_s0 + $0xb8] sm:$0xf]  ;;  %v1386_v2 = vor.u32 %v1385_v54, %v1382_v53  ;;  %v1400_v3 = vor.u32 %v1399_v56, %v1396_v55 }
  0x81   :  { %v1403_v4 = vshll.u32 %v5924_v46, 16  ;;  %v1417_v5 = vshll.u32 %v5926_v1, 16  ;;  %v5933_v6 = vld [vmem:[%s8848_s0 + $0xc0] sm:$0xf]  ;;  %v5935_v7 = vld [vmem:[%s8848_s0 + $0xc8] sm:$0xf]  ;;  %v1414_v8 = vor.u32 %v1413_v59, %v1410_v58 }
  0x82   :  { %v1431_v9 = vshll.u32 %v5928_v61, 16  ;;  %v1436_v10 = vshrl.u32 %v5929_v63, 16  ;;  %v1439_v11 = vshll.u32 %v5929_v63, 16  ;;  %v1391_v12 = vrot.slane %v1389_v57, 5  ;;  %v7114_v16 = vld [vmem:[%s8848_s0 + $0x208] ss:$8 sps:$4 sm:$0xff]  }
  0x83   :  { %v1428_v13 = vor.u32 %v1427_v49, %v1424_v62  ;;  %v1450_v14 = vshrl.u32 %v5931_v0, 16  ;;  %v1453_v15 = vshll.u32 %v5931_v0, 16  ;;  %v5930_v17 = vld [vmem:[%s8848_s0 + $0xb4] sm:$0x1]  ;;  %v1464_v60 = vshrl.u32 %v5933_v6, 16 }
  0x84   :  { %v1467_v18 = vshll.u32 %v5933_v6, 16  ;;  %v1478_v20 = vshrl.u32 %v5935_v7, 16  ;;  %v1481_v21 = vshll.u32 %v5935_v7, 16  ;;  %v7115_v19 = vld [vmem:[%s8848_s0 + $0x218] ss:$8 sps:$4 sm:$0xff]   ;;  %v1387_v22 = vrot.slane %v1386_v2, 4 }
  0x85   :  { %v1401_v23 = vrot.slane %v1400_v3, 4  ;;  %v1405_v24 = vrot.slane %v1403_v4, 5  ;;  %v1419_v25 = vrot.slane %v1417_v5, 5  ;;  %v5932_v26 = vld [vmem:[%s8848_s0 + $0xbc] sm:$0x1]  ;;  %v1415_v27 = vrot.slane %v1414_v8, 4 }
  0x86   :  { %6556 = vmatmul.mubr.msk.bf16.vlgmr.msra.gmra.mrb[0].mxu0 %vm234_vm1, %v7110_v32  ;;  %v1433_v28 = vrot.slane %v1431_v9, 5  ;;  %v1438_v29 = vrot.slane %v1436_v10, 4  ;;  %v1441_v30 = vrot.slane %v1439_v11, 5  ;;  %v5937_v32 = vld [vmem:[%s8848_s0 + $0x1b0] sm:$0xf]  ;;  %v1429_v33 = vrot.slane %v1428_v13, 4 }
  0x87   :  { %6572 = vmatpush3.bf16.msra.mxu0 %v1654_v37  ;;  %6559 = vmatprep.mubr.msk.bf16.mxu0 %vm234_vm1, %v7111_v35  ;;  %v1445_v34 = vshll.u32 %v5930_v17, 16  ;;  %v1452_v35 = vrot.slane %v1450_v14, 4  ;;  %v1455_v36 = vrot.slane %v1453_v15, 5  ;;  %v5939_v37 = vld [vmem:[%s8848_s0 + $0x1b8] sm:$0xf]  ;;  %v1466_v39 = vrot.slane %v1464_v60, 4 }
  0x88   :  { %7067 = vmatprep.subr.msk.bf16.mxu0 %vm259_vm0, %v7551_v43  ;;  %v5934_v38 = vld [vmem:[%s8848_s0 + $0xc4] sm:$0x1]  ;;  %v1469_v40 = vrot.slane %v1467_v18, 5  ;;  %v1480_v41 = vrot.slane %v1478_v20, 4  ;;  %v1483_v42 = vrot.slane %v1481_v21, 5  ;;  %v1392_v44 = vsel %vm7371_vm4, %v1387_v22, %v1391_v12 }
  0x89   :  { %v1406_v45 = vsel %vm7371_vm4, %v1401_v23, %v1405_v24  ;;  %v5936_v47 = vld [vmem:[%s8848_s0 + $0xcc] sm:$0x1]  ;;  %v5938_v48 = vld [vmem:[%s8848_s0 + $0x1b4] sm:$0x1]  ;;  %v1492_v50 = vshrl.u32 %v5937_v32, 16  ;;  %v1459_v46 = vshll.u32 %v5932_v26, 16  ;;  %v1420_v55 = vsel %vm7371_vm4, %v1415_v27, %v1419_v25 }
  0x8a   :  { %v1506_v53 = vshrl.u32 %v5939_v37, 16  ;;  %v1509_v54 = vshll.u32 %v5939_v37, 16  ;;  %v1434_v56 = vsel %vm7371_vm4, %v1429_v33, %v1433_v28  ;;  %v1456_v57 = vor.u32 %v1455_v36, %v1452_v35  ;;  %v7116_v58 = vld [vmem:[%s8848_s0 + $0x228] ss:$8 sps:$4 sm:$0xff]   ;;  %v5940_v0 = vld [vmem:[%s8848_s0 + $0x1bc] sm:$0x1] }
  0x8b   :  { %v1473_v1 = vshll.u32 %v5934_v38, 16  ;;  %v1470_v59 = vor.u32 %v1469_v40, %v1466_v39  ;;  %v1484_v61 = vor.u32 %v1483_v42, %v1480_v41  ;;  %v1487_v62 = vshll.u32 %v5936_v47, 16  ;;  %v5941_v8 = vld [vmem:[%s8848_s0 + $0x1c0] sm:$0xf]  ;;  %v5943_v13 = vld [vmem:[%s8848_s0 + $0x1c8] sm:$0xf] }
  0x8c   :  { %v1501_v49 = vshll.u32 %v5938_v48, 16  ;;  %v1447_v63 = vrot.slane %v1445_v34, 5  ;;  %v1494_v2 = vrot.slane %v1492_v50, 4  ;;  %v1461_v5 = vrot.slane %v1459_v46, 5  ;;  %v5945_v14 = vld [vmem:[%s8848_s0 + $0x1d0] sm:$0xf] }
  0x8d   :  { %v1508_v6 = vrot.slane %v1506_v53, 4  ;;  %v1511_v7 = vrot.slane %v1509_v54, 5  ;;  %v5954_v9 = vcombine.low %v1392_v44, %v1406_v45  ;;  %v5955_v10 = vcombine.low %v1420_v55, %v1434_v56  ;;  %v5947_v18 = vld [vmem:[%s8848_s0 + $0x1d8] sm:$0xf]  ;;  %v107_v34 = vld [vmem:[#allocation2 + $0x1c] sm:$0x1] }
  0x8e   :  { %6560 = vmatmul.mubr.msk.bf16.gmra.mrb[4].mxu0 %vm234_vm1, %v7112_v51  ;;  %v1495_v51 = vshll.u32 %v5937_v32, 16  ;;  %v1457_v11 = vrot.slane %v1456_v57, 4  ;;  %v7635_v12 = vrot.slane %v1473_v1, 5  ;;  %v7643_v15 = vrot.slane %v1470_v59, 4  ;;  %v5942_v37 = vld [vmem:[%s8848_s0 + $0x1c4] sm:$0x1] }
  0x8f   :  { %6563 = vmatprep.mubr.msk.bf16.mxu0 %vm234_vm1, %v7113_v52  ;;  %v1442_v52 = vor.u32 %v1441_v30, %v1438_v29  ;;  %v7647_v17 = vrot.slane %v1487_v62, 5  ;;  %v7649_v60 = vrot.slane %v1501_v49, 5  ;;  %v1515_v21 = vshll.u32 %v5940_v0, 16  ;;  %v45_v30 = vld [vmem:[#allocation2 + $0x18] sm:$0x1] }
  0x90   :  { %v1497_v3 = vrot.slane %v1495_v51, 5  ;;  %v1523_v22 = vshll.u32 %v5941_v8, 16  ;;  %v1512_v23 = vor.u32 %v1511_v7, %v1508_v6  ;;  %v1534_v24 = vshrl.u32 %v5943_v13, 16  ;;  %v5944_v42 = vld [vmem:[%s8848_s0 + $0x1cc] sm:$0x1] }
  0x91   :  { %v1443_v4 = vrot.slane %v1442_v52, 4  ;;  %v1537_v25 = vshll.u32 %v5943_v13, 16  ;;  %v1548_v26 = vshrl.u32 %v5945_v14, 16  ;;  %v1551_v27 = vshll.u32 %v5945_v14, 16  ;;  %v5946_v52 = vld [vmem:[%s8848_s0 + $0x1d4] sm:$0x1] }
  0x92   :  { %v1498_v20 = vor.u32 %v1497_v3, %v1494_v2  ;;  %v1562_v28 = vshrl.u32 %v5947_v18, 16  ;;  %v1565_v29 = vshll.u32 %v5947_v18, 16  ;;  %vm24_vm5 = vcmask 57344   ;;  %v5949_v46 = vld [vmem:[%s8848_s0 + $0x1e0] sm:$0xf] }
  0x93   :  { %v1448_v32 = vsel %vm7371_vm4, %v1443_v4, %v1447_v63  ;;  %v1462_v33 = vsel %vm7371_vm4, %v1457_v11, %v1461_v5  ;;  %vm34_vm6 = vsmask.f32 256  ;;  %vm96_vm7 = vsmask.f32 7938  ;;  %v5948_v62 = vld [vmem:[%s8848_s0 + $0x1dc] sm:$0x1] }
  0x94   :  { %v1499_v35 = vrot.slane %v1498_v20, 4  ;;  %v1517_v36 = vrot.slane %v1515_v21, 5  ;;  %v1525_v39 = vrot.slane %v1523_v22, 5  ;;  %vm7664_vm8 = vmand %vm24_vm5, %vm34_vm6  ;;  %v1513_v41 = vrot.slane %v1512_v23, 4  ;;  %v6019_v49 = vld [vmem:[%s8849_s1 + $0xe] sm:$0x3] }
  0x95   :  { %v1536_v44 = vrot.slane %v1534_v24, 4  ;;  %v1539_v45 = vrot.slane %v1537_v25, 5  ;;  %v46_v47 = vsel %vm7664_vm8, 0, %v45_v30  ;;  %vm7675_vm9 = vmand %vm24_vm5, %vm96_vm7  ;;  %v1853_v50 = vsel %vm259_vm0, %v7551_v43, 0  ;;  %v5951_v43 = vld [vmem:[%s8848_s0 + $0x1e8] sm:$0xf] }
  0x96   :  { %6564 = vmatmul.mubr.msk.bf16.gmra.mrb[8].mxu0 %vm234_vm1, %v7114_v16  ;;  %v7645_v16 = vrot.slane %v1484_v61, 4  ;;  %v5956_v51 = vcombine.low %v1448_v32, %v1462_v33  ;;  %47 = vst [vmem:[#allocation2 + $0x18] sm:$0x1] %v46_v47  ;;  %v108_v53 = vsel %vm7675_vm9, 0, %v107_v34  ;;  %v1550_v54 = vrot.slane %v1548_v26, 4 }
  0x97   :  { %6567 = vmatprep.mubr.msk.bf16.mxu0 %vm234_vm1, %v7115_v19  ;;  %v1520_v19 = vshrl.u32 %v5941_v8, 16  ;;  %v1553_v55 = vrot.slane %v1551_v27, 5  ;;  %v1564_v56 = vrot.slane %v1562_v28, 4  ;;  %v1567_v57 = vrot.slane %v1565_v29, 5  ;;  %109 = vst [vmem:[#allocation2 + $0x1c] sm:$0x1] %v108_v53 }
  0x98   :  { %v1476_v1 = vsel %vm7371_vm4, %v7643_v15, %v7635_v12  ;;  %v1504_v59 = vsel %vm7371_vm4, %v1499_v35, %v7649_v60  ;;  %v1529_v61 = vshll.u32 %v5942_v37, 16  ;;  %v1518_v63 = vsel %vm7371_vm4, %v1513_v41, %v1517_v36  ;;  %v5950_v60 = vld [vmem:[%s8848_s0 + $0x1e4] sm:$0x1]  ;;  %v5952_v26 = vld [vmem:[%s8848_s0 + $0x1ec] sm:$0x1] }
  0x99   :  { %v1522_v38 = vrot.slane %v1520_v19, 4  ;;  %v1540_v2 = vor.u32 %v1539_v45, %v1536_v44  ;;  %v1543_v3 = vshll.u32 %v5944_v42, 16  ;;  %v1576_v4 = vshrl.u32 %v5949_v46, 16  ;;  %v6068_v53 = vld [vmem:[%s8849_s1 + $0x10] sm:$0x3] }
  0x9a   :  { %v1579_v5 = vshll.u32 %v5949_v46, 16  ;;  %v1590_v6 = vshrl.u32 %v5951_v43, 16  ;;  %v1593_v7 = vshll.u32 %v5951_v43, 16  ;;  %v1554_v8 = vor.u32 %v1553_v55, %v1550_v54  ;;  %v7120_v54 = vld [vmem:[%s8848_s0 + $0x38] ss:$8 sps:$4 sm:$0xff]  }
  0x9b   :  { %v1526_v0 = vor.u32 %v1525_v39, %v1522_v38  ;;  %v1568_v11 = vor.u32 %v1567_v57, %v1564_v56  ;;  %v1571_v12 = vshll.u32 %v5948_v62, 16  ;;  %v1531_v13 = vrot.slane %v1529_v61, 5  ;;  %v7121_v55 = vld [vmem:[%s8848_s0 + $0x128] ss:$8 sps:$4 sm:$0xff]   ;;  %v7122_v56 = vld [vmem:[%s8848_s0 + $0x138] ss:$8 sps:$4 sm:$0xff]  }
  0x9c   :  { %v5958_v14 = vcombine.low %v1504_v59, %v1518_v63  ;;  %v1578_v18 = vrot.slane %v1576_v4, 4  ;;  %v1581_v20 = vrot.slane %v1579_v5, 5  ;;  %v1592_v21 = vrot.slane %v1590_v6, 4  ;;  %v7123_v57 = vld [vmem:[%s8848_s0 + $0x148] ss:$8 sps:$4 sm:$0xff]  }
  0x9d   :  { %v1527_v15 = vrot.slane %v1526_v0, 4  ;;  %v1595_v19 = vrot.slane %v1593_v7, 5  ;;  %v1555_v22 = vrot.slane %v1554_v8, 4  ;;  %v1569_v24 = vrot.slane %v1568_v11, 4  ;;  %v7124_v43 = vld [vmem:[%s8848_s0 + $0x158] ss:$8 sps:$4 sm:$0xff]  }
  0x9e   :  { %6568 = vmatmul.mubr.msk.bf16.gmra.mrb[12].mxu0 %vm234_vm1, %v7116_v58  ;;  %v1490_v58 = vsel %vm7371_vm4, %v7645_v16, %v7647_v17  ;;  %v1541_v16 = vrot.slane %v1540_v2, 4  ;;  %v1545_v17 = vrot.slane %v1543_v3, 5  ;;  %v1573_v25 = vrot.slane %v1571_v12, 5  ;;  %v6038_v59 = vld [vmem:[%s8848_s0 + $0x10] sm:$0xf] }
  0x9f   :  { %6573 = vmatprep.mubr.msk.bf16.mxu0 %vm234_vm1, %v5954_v9  ;;  %v1557_v9 = vshll.u32 %v5946_v52, 16  ;;  %v1532_v27 = vsel %vm7371_vm4, %v1527_v15, %v1531_v13  ;;  %v1585_v28 = vshll.u32 %v5950_v60, 16  ;;  %v1582_v30 = vor.u32 %v1581_v20, %v1578_v18  ;;  %v7119_v52 = vld [vmem:[%s8848_s0 + $0x28] ss:$8 sps:$4 sm:$0xff]   ;;  %v6040_v0 = vld [vmem:[%s8848_s0 + $0x18] sm:$0xf] }
  0xa0   :  { %v1546_v29 = vsel %vm7371_vm4, %v1541_v16, %v1545_v17  ;;  %v1596_v32 = vor.u32 %v1595_v19, %v1592_v21  ;;  %v1599_v33 = vshll.u32 %v5952_v26, 16  ;;  %v1574_v35 = vsel %vm7371_vm4, %v1569_v24, %v1573_v25  ;;  %v7126_v61 = vld [vmem:[%s8848_s0 + $0x60] ss:$8 sps:$4 sm:$0xff]   ;;  %v7127_v62 = vld [vmem:[%s8848_s0 + $0x70] ss:$8 sps:$4 sm:$0xff]  }
  0xa1   :  { %v1559_v23 = vrot.slane %v1557_v9, 5  ;;  %v5959_v36 = vcombine.low %v1532_v27, %v1546_v29  ;;  %v1587_v37 = vrot.slane %v1585_v28, 5  ;;  %v1583_v39 = vrot.slane %v1582_v30, 4  ;;  %v6042_v5 = vld [vmem:[%s8848_s0 + $0x20] sm:$0xf] }
  0xa2   :  { %v1597_v41 = vrot.slane %v1596_v32, 4  ;;  %v1601_v42 = vrot.slane %v1599_v33, 5  ;;  %v2052_v46 = vsel %vm259_vm0, %v6019_v49, 0  ;;  %v2474_v2 = vsel %vm259_vm0, %v6068_v53, 0  ;;  %v6037_v11 = vld [vmem:[%s8848_s0 + $0xc] sm:$0x1] }
  0xa3   :  { %v1560_v34 = vsel %vm7371_vm4, %v1555_v22, %v1559_v23  ;;  %v1588_v44 = vsel %vm7371_vm4, %v1583_v39, %v1587_v37  ;;  %v2214_v3 = vshrl.u32 %v6038_v59, 16  ;;  %v2217_v4 = vshll.u32 %v6038_v59, 16  ;;  %v7128_v15 = vld [vmem:[%s8848_s0 + $0x80] ss:$8 sps:$4 sm:$0xff]   ;;  %v6039_v16 = vld [vmem:[%s8848_s0 + $0x14] sm:$0x1] }
  0xa4   :  { %v5960_v38 = vcombine.low %v1560_v34, %v1574_v35  ;;  %v1602_v45 = vsel %vm7371_vm4, %v1597_v41, %v1601_v42  ;;  %v2228_v6 = vshrl.u32 %v6040_v0, 16  ;;  %v2231_v7 = vshll.u32 %v6040_v0, 16  ;;  %v6044_v18 = vld [vmem:[%s8848_s0 + $0x28] sm:$0xf]  ;;  %v6046_v20 = vld [vmem:[%s8848_s0 + $0x30] sm:$0xf] }
  0xa5   :  { %v5961_v47 = vcombine.low %v1588_v44, %v1602_v45  ;;  %v2216_v12 = vrot.slane %v2214_v3, 4  ;;  %v2242_v13 = vshrl.u32 %v6042_v5, 16  ;;  %v7129_v21 = vld [vmem:[%s8848_s0 + $0x170] ss:$8 sps:$4 sm:$0xff]   ;;  %v2209_v22 = vshll.u32 %v6037_v11, 16 }
  0xa6   :  { %6574 = vmatmul.mubr.msk.bf16.vlgmr.msra.gmra.mrb[0].mxu0 %vm234_vm1, %v5955_v10  ;;  %v5957_v10 = vcombine.low %v1476_v1, %v1490_v58  ;;  %v7125_v1 = vld [vmem:[%s8848_s0 + $0x50] ss:$8 sps:$4 sm:$0xff]   ;;  %v6036_v58 = vld [vmem:[%s8848_s0 + $0x8] sm:$0xf]  ;;  %v2230_v17 = vrot.slane %v2228_v6, 4  ;;  %v2233_v60 = vrot.slane %v2231_v7, 5 }
  0xa7   :  { %6590 = vmatpush3.bf16.msra.mxu0 %v1853_v50  ;;  %6577 = vmatprep.mubr.msk.bf16.mxu0 %vm234_vm1, %v5956_v51  ;;  %v7117_v50 = vld [vmem:[%s8848_s0 + $0x8] ss:$8 sps:$4 sm:$0xff]   ;;  %v7118_v51 = vld [vmem:[%s8848_s0 + $0x18] ss:$8 sps:$4 sm:$0xff]   ;;  %v2203_v63 = vshll.u32 %v6036_v58, 16  ;;  %v2223_v25 = vshll.u32 %v6039_v16, 16 }
  0xa8   :  { %7068 = vmatprep.subr.msk.bf16.mxu0 %vm259_vm0, %v6019_v49  ;;  %v2200_v49 = vshrl.u32 %v6036_v58, 16  ;;  %v6041_v23 = vld [vmem:[%s8848_s0 + $0x1c] sm:$0x1]  ;;  %v2244_v26 = vrot.slane %v2242_v13, 4  ;;  %v6043_v28 = vld [vmem:[%s8848_s0 + $0x24] sm:$0x1]  ;;  %v2234_v34 = vor.u32 %v2233_v60, %v2230_v17 }
  0xa9   :  { %v2205_v9 = vrot.slane %v2203_v63, 5  ;;  %v2256_v29 = vshrl.u32 %v6044_v18, 16  ;;  %v2259_v30 = vshll.u32 %v6044_v18, 16  ;;  %v2270_v32 = vshrl.u32 %v6046_v20, 16  ;;  %v7130_v39 = vld [vmem:[%s8848_s0 + $0x180] ss:$8 sps:$4 sm:$0xff]  }
  0xaa   :  { %v2202_v8 = vrot.slane %v2200_v49, 4  ;;  %v2273_v33 = vshll.u32 %v6046_v20, 16  ;;  %v2237_v35 = vshll.u32 %v6041_v23, 16  ;;  %v2211_v37 = vrot.slane %v2209_v22, 5  ;;  %v6049_v7 = vld [vmem:[%s8848_s0 + $0x3c] sm:$0x1] }
  0xab   :  { %v2225_v42 = vrot.slane %v2223_v25, 5  ;;  %v2251_v45 = vshll.u32 %v6043_v28, 16  ;;  %v7132_v16 = vld [vmem:[%s8848_s0 + $0x1a0] ss:$8 sps:$4 sm:$0xff]   ;;  %v6051_v18 = vld [vmem:[%s8848_s0 + $0x44] sm:$0x1] }
  0xac   :  { %v2206_v19 = vor.u32 %v2205_v9, %v2202_v8  ;;  %v2293_v20 = vshll.u32 %v6049_v7, 16  ;;  %v6055_v25 = vld [vmem:[%s8848_s0 + $0x134] sm:$0x1]  ;;  %vm22_vm10 = vcmask 60416   ;;  %vm3243_vm11 = vcmask 1043456  }
  0xad   :  { %v2253_v0 = vrot.slane %v2251_v45, 5  ;;  %vm8073_vm12 = vmand %vm22_vm10, %vm96_vm7  ;;  %vm3218_vm13 = vcmask 64512   ;;  %vm3556_vm14 = vcmask 1042432   ;;  %vm3557_vm15 = vcmask 1046532  }
  0xae   :  { %6578 = vmatmul.mubr.msk.bf16.gmra.mrb[4].mxu0 %vm234_vm1, %v5957_v10  ;;  %v2219_v10 = vrot.slane %v2217_v4, 5 }
  0xaf   :  { %6581 = vmatprep.mubr.msk.bf16.mxu0 %vm234_vm1, %v5958_v14  ;;  %v2245_v14 = vshll.u32 %v6042_v5, 16 }
  0xb0   :  { %v2220_v24 = vor.u32 %v2219_v10, %v2216_v12 }
  0xb1   :  { %v2247_v27 = vrot.slane %v2245_v14, 5 }
  0xb2   :  { %v2221_v41 = vrot.slane %v2220_v24, 4  ;;  %v6053_v24 = vld [vmem:[%s8848_s0 + $0x12c] sm:$0x1] }
  0xb3   :  { %v2248_v44 = vor.u32 %v2247_v27, %v2244_v26 }
  0xb4   :  { %v2226_v63 = vsel %vm7371_vm4, %v2221_v41, %v2225_v42 }
  0xb5   :  { %v2249_v3 = vrot.slane %v2248_v44, 4 }
  0xb6   :  { %6582 = vmatmul.mubr.msk.bf16.gmra.mrb[8].mxu0 %vm234_vm1, %v5959_v36  ;;  %v2207_v36 = vrot.slane %v2206_v19, 4 }
  0xb7   :  { %6585 = vmatprep.mubr.msk.bf16.mxu0 %vm234_vm1, %v5960_v38  ;;  %v6048_v38 = vld [vmem:[%s8848_s0 + $0x38] sm:$0xf]  ;;  %v2254_v19 = vsel %vm7371_vm4, %v2249_v3, %v2253_v0 }
  0xb8   :  { %v2212_v49 = vsel %vm7371_vm4, %v2207_v36, %v2211_v37  ;;  %v6058_v36 = vld [vmem:[%s8848_s0 + $0x140] sm:$0xf]  ;;  %v2295_v37 = vrot.slane %v2293_v20, 5 }
  0xb9   :  { %v6069_v17 = vcombine.low %v2212_v49, %v2226_v63  ;;  %v6057_v49 = vld [vmem:[%s8848_s0 + $0x13c] sm:$0x1] }
  0xbe   :  { %6586 = vmatmul.mubr.msk.bf16.gmra.mrb[12].mxu0 %vm234_vm1, %v5961_v47  ;;  %v6050_v47 = vld [vmem:[%s8848_s0 + $0x40] sm:$0xf] }
  0xbf   :  { %6591 = vmatprep.mubr.msk.bf16.mxu0 %vm234_vm1, %v7117_v50  ;;  %v7131_v50 = vld [vmem:[%s8848_s0 + $0x190] ss:$8 sps:$4 sm:$0xff]   ;;  %v2298_v58 = vshrl.u32 %v6050_v47, 16  ;;  %v2301_v59 = vshll.u32 %v6050_v47, 16  ;;  %v6060_v47 = vld [vmem:[%s8848_s0 + $0x148] sm:$0xf] }
  0xc1   :  { %v2300_v14 = vrot.slane %v2298_v58, 4 }
  0xc6   :  { %6592 = vmatmul.mubr.msk.bf16.vlgmr.msra.gmra.mrb[0].mxu0 %vm234_vm1, %v7118_v51  ;;  %v6045_v51 = vld [vmem:[%s8848_s0 + $0x2c] sm:$0x1] }
  0xc7   :  { %6608 = vmatpush3.bf16.msra.mxu0 %v2052_v46  ;;  %6595 = vmatprep.mubr.msk.bf16.mxu0 %vm234_vm1, %v7119_v52  ;;  %v2258_v52 = vrot.slane %v2256_v29, 4  ;;  %v2261_v46 = vrot.slane %v2259_v30, 5  ;;  %v6056_v30 = vld [vmem:[%s8848_s0 + $0x138] sm:$0xf] }
  0xc8   :  { %7069 = vmatprep.subr.msk.bf16.mxu0 %vm259_vm0, %v6068_v53  ;;  %v2272_v53 = vrot.slane %v2270_v32, 4  ;;  %v2340_v44 = vshrl.u32 %v6056_v30, 16  ;;  %v2343_v45 = vshll.u32 %v6056_v30, 16  ;;  %vm8327_vm0 = vmor %vm3556_vm14, %vm3557_vm15 }
  0xc9   :  { %v2262_v4 = vor.u32 %v2261_v46, %v2258_v52  ;;  %v2354_v46 = vshrl.u32 %v6058_v36, 16 }
  0xca   :  { %v2342_v63 = vrot.slane %v2340_v44, 4  ;;  %v2345_v0 = vrot.slane %v2343_v45, 5 }
  0xcb   :  { %v2263_v22 = vrot.slane %v2262_v4, 4  ;;  %v6059_v4 = vld [vmem:[%s8848_s0 + $0x144] sm:$0x1] }
  0xce   :  { %6596 = vmatmul.mubr.msk.bf16.gmra.mrb[4].mxu0 %vm234_vm1, %v7120_v54  ;;  %v2275_v54 = vrot.slane %v2273_v33, 5 }
  0xcf   :  { %6599 = vmatprep.mubr.msk.bf16.mxu0 %vm234_vm1, %v7121_v55  ;;  %v2235_v55 = vrot.slane %v2234_v34, 4 }
  0xd0   :  { %v2276_v5 = vor.u32 %v2275_v54, %v2272_v53  ;;  %v2357_v53 = vshll.u32 %v6058_v36, 16 }
  0xd2   :  { %v2277_v32 = vrot.slane %v2276_v5, 4  ;;  %v2356_v5 = vrot.slane %v2354_v46, 4 }
  0xd6   :  { %6600 = vmatmul.mubr.msk.bf16.gmra.mrb[8].mxu0 %vm234_vm1, %v7122_v56  ;;  %v2239_v56 = vrot.slane %v2237_v35, 5  ;;  %v2307_v35 = vshll.u32 %v6051_v18, 16  ;;  %v6063_v18 = vld [vmem:[%s8848_s0 + $0x154] sm:$0x1] }
  0xd7   :  { %6603 = vmatprep.mubr.msk.bf16.mxu0 %vm234_vm1, %v7123_v57  ;;  %v6047_v57 = vld [vmem:[%s8848_s0 + $0x34] sm:$0x1]  ;;  %v2391_v30 = vshll.u32 %v6063_v18, 16 }
  0xd8   :  { %v2279_v6 = vshll.u32 %v6047_v57, 16  ;;  %v2309_v57 = vrot.slane %v2307_v35, 5 }
  0xda   :  { %v2281_v23 = vrot.slane %v2279_v6, 5  ;;  %v2359_v6 = vrot.slane %v2357_v53, 5 }
  0xdc   :  { %v2282_v54 = vsel %vm7371_vm4, %v2277_v32, %v2281_v23 }
  0xde   :  { %6604 = vmatmul.mubr.msk.bf16.gmra.mrb[12].mxu0 %vm234_vm1, %v7124_v43  ;;  %v2284_v43 = vshrl.u32 %v6048_v38, 16 }
  0xdf   :  { %6609 = vmatprep.mubr.msk.bf16.mxu0 %vm234_vm1, %v7125_v1  ;;  %v2287_v1 = vshll.u32 %v6048_v38, 16  ;;  %v2321_v38 = vshll.u32 %v6053_v24, 16 }
  0xe0   :  { %v2286_v10 = vrot.slane %v2284_v43, 4  ;;  %v2368_v43 = vshrl.u32 %v6060_v47, 16 }
  0xe1   :  { %v2289_v13 = vrot.slane %v2287_v1, 5  ;;  %v2371_v1 = vshll.u32 %v6060_v47, 16 }
  0xe3   :  { %v2290_v33 = vor.u32 %v2289_v13, %v2286_v10  ;;  %v6066_v13 = vld [vmem:[%s8848_s0 + $0x160] sm:$0xf] }
  0xe6   :  { %6610 = vmatmul.mubr.msk.bf16.vlgmr.msra.gmra.mrb[0].mxu0 %vm234_vm1, %v7126_v61  ;;  %v6052_v61 = vld [vmem:[%s8848_s0 + $0x128] sm:$0xf] }
  0xe7   :  { %6626 = vmatpush3.bf16.msra.mxu0 %v2474_v2  ;;  %6613 = vmatprep.mubr.msk.bf16.mxu0 %vm234_vm1, %v7127_v62  ;;  %v6054_v62 = vld [vmem:[%s8848_s0 + $0x130] sm:$0xf]  ;;  %v2265_v2 = vshll.u32 %v6045_v51, 16  ;;  %v2312_v8 = vshrl.u32 %v6052_v61, 16  ;;  %v2315_v9 = vshll.u32 %v6052_v61, 16  ;;  %v2323_v61 = vrot.slane %v2321_v38, 5 }
  0xe8   :  { %v2326_v11 = vshrl.u32 %v6054_v62, 16  ;;  %v2329_v12 = vshll.u32 %v6054_v62, 16  ;;  %v6065_v38 = vld [vmem:[%s8848_s0 + $0x15c] sm:$0x1] }
  0xe9   :  { %v2267_v60 = vrot.slane %v2265_v2, 5  ;;  %v2314_v26 = vrot.slane %v2312_v8, 4  ;;  %v2317_v27 = vrot.slane %v2315_v9, 5  ;;  %v6064_v8 = vld [vmem:[%s8848_s0 + $0x158] sm:$0xf]  ;;  %v2370_v9 = vrot.slane %v2368_v43, 4 }
  0xea   :  { %v2328_v28 = vrot.slane %v2326_v11, 4  ;;  %v2331_v29 = vrot.slane %v2329_v12, 5  ;;  %v2373_v11 = vrot.slane %v2371_v1, 5  ;;  %v2396_v23 = vshrl.u32 %v6064_v8, 16 }
  0xeb   :  { %v2268_v42 = vsel %vm7371_vm4, %v2263_v22, %v2267_v60  ;;  %v2318_v51 = vor.u32 %v2317_v27, %v2314_v26  ;;  %v6061_v60 = vld [vmem:[%s8848_s0 + $0x14c] sm:$0x1]  ;;  %v2360_v22 = vor.u32 %v2359_v6, %v2356_v5  ;;  %v2399_v24 = vshll.u32 %v6064_v8, 16  ;;  %v48_v8 = vld [vmem:[#allocation2 + $0x20] sm:$0x1] }
  0xec   :  { %v2332_v52 = vor.u32 %v2331_v29, %v2328_v28  ;;  %v6071_v7 = vcombine.low %v2268_v42, %v2282_v54  ;;  %v2413_v26 = vshll.u32 %v6066_v13, 16  ;;  %v2374_v27 = vor.u32 %v2373_v11, %v2370_v9  ;;  %v101_v5 = vld [vmem:[#allocation2 + $0xc] sm:$0x1]  ;;  %v110_v9 = vld [vmem:[#allocation2 + $0x24] sm:$0x1] }
  0xed   :  { %v2319_v2 = vrot.slane %v2318_v51, 4  ;;  %v2377_v28 = vshll.u32 %v6061_v60, 16  ;;  %v2361_v36 = vrot.slane %v2360_v22, 4  ;;  %v2393_v51 = vrot.slane %v2391_v30, 5  ;;  %v119_v60 = vld [vmem:[#allocation2 + $0x3c] sm:$0x1] }
  0xee   :  { %6614 = vmatmul.mubr.msk.bf16.gmra.mrb[4].mxu0 %vm234_vm1, %v7128_v15  ;;  %v2303_v15 = vrot.slane %v2301_v59, 5  ;;  %v2333_v3 = vrot.slane %v2332_v52, 4  ;;  %v2415_v44 = vrot.slane %v2413_v26, 5  ;;  %v2375_v45 = vrot.slane %v2374_v27, 4  ;;  %v6067_v52 = vld [vmem:[%s8848_s0 + $0x164] sm:$0x1] }
  0xef   :  { %6617 = vmatprep.mubr.msk.bf16.mxu0 %vm234_vm1, %v7129_v21  ;;  %v2240_v21 = vsel %vm7371_vm4, %v2235_v55, %v2239_v56  ;;  %v2291_v55 = vrot.slane %v2290_v33, 4  ;;  %v2324_v20 = vsel %vm7371_vm4, %v2319_v2, %v2323_v61  ;;  %v2379_v47 = vrot.slane %v2377_v28, 5  ;;  %v113_v22 = vld [vmem:[#allocation2 + $0x2c] sm:$0x1]  ;;  %v54_v28 = vld [vmem:[#allocation2 + $0x30] sm:$0x1] }
  0xf0   :  { %v2304_v34 = vor.u32 %v2303_v15, %v2300_v14  ;;  %v6070_v41 = vcombine.low %v2240_v21, %v2254_v19  ;;  %v2346_v19 = vor.u32 %v2345_v0, %v2342_v63  ;;  %v2405_v53 = vshll.u32 %v6065_v38, 16  ;;  %v137_v38 = vld [vmem:[#allocation2 + $0x6c] sm:$0x1] }
  0xf1   :  { %v2296_v14 = vsel %vm7371_vm4, %v2291_v55, %v2295_v37  ;;  %v2380_v43 = vsel %vm7371_vm4, %v2375_v45, %v2379_v47  ;;  %v49_v11 = vsel %vm7664_vm8, 0, %v48_v8  ;;  %v120_v18 = vsel %vm7675_vm9, 0, %v119_v60  ;;  %v131_v45 = vld [vmem:[#allocation2 + $0x5c] sm:$0x1] }
  0xf2   :  { %v2305_v56 = vrot.slane %v2304_v34, 4  ;;  %v2347_v35 = vrot.slane %v2346_v19, 4  ;;  %50 = vst [vmem:[#allocation2 + $0x20] sm:$0x1] %v49_v11  ;;  %121 = vst [vmem:[#allocation2 + $0x3c] sm:$0x1] %v120_v18 }
  0xf3   :  { %v55_v30 = vsel %vm7664_vm8, 0, %v54_v28  ;;  %v132_v47 = vsel %vm7675_vm9, 0, %v131_v45  ;;  %v2951_v11 = vld [vmem:[%s8851_s3] sm:$0xf] }
  0xf4   :  { %v2310_v15 = vsel %vm7371_vm4, %v2305_v56, %v2309_v57  ;;  %v2419_v57 = vshll.u32 %v6067_v52, 16  ;;  %56 = vst [vmem:[#allocation2 + $0x30] sm:$0x1] %v55_v30  ;;  %133 = vst [vmem:[#allocation2 + $0x5c] sm:$0x1] %v132_v47 }
  0xf5   :  { %v6072_v32 = vcombine.low %v2296_v14, %v2310_v15  ;;  %v140_v52 = vld [vmem:[#allocation2 + $0x74] sm:$0x1] }
  0xf6   :  { %6618 = vmatmul.mubr.msk.bf16.gmra.mrb[8].mxu0 %vm234_vm1, %v7130_v39  ;;  %v2335_v39 = vshll.u32 %v6055_v25, 16  ;;  %v2410_v25 = vshrl.u32 %v6066_v13, 16  ;;  %v2421_v63 = vrot.slane %v2419_v57, 5  ;;  %v104_v13 = vld [vmem:[#allocation2 + $0x14] sm:$0x1] }
  0xf7   :  { %6621 = vmatprep.mubr.msk.bf16.mxu0 %vm234_vm1, %v7131_v50  ;;  %v6062_v50 = vld [vmem:[%s8848_s0 + $0x150] sm:$0xf]  ;;  %v105_v15 = vsel %vm7675_vm9, 0, %v104_v13  ;;  %v87_v57 = vld [vmem:[#allocation2 + $0x88] sm:$0x1] }
  0xf8   :  { %v2382_v58 = vshrl.u32 %v6062_v50, 16  ;;  %v2385_v59 = vshll.u32 %v6062_v50, 16  ;;  %v2337_v62 = vrot.slane %v2335_v39, 5  ;;  %v2398_v39 = vrot.slane %v2396_v23, 4  ;;  %106 = vst [vmem:[#allocation2 + $0x14] sm:$0x1] %v105_v15 }
  0xf9   :  { %v2412_v42 = vrot.slane %v2410_v25, 4  ;;  %v60_v23 = vld [vmem:[#allocation2 + $0x40] sm:$0x1]  ;;  %v114_v25 = vsel %vm7675_vm9, 0, %v113_v22 }
  0xfa   :  { %v2384_v12 = vrot.slane %v2382_v58, 4  ;;  %v2387_v10 = vrot.slane %v2385_v59, 5  ;;  %v2338_v21 = vsel %vm7371_vm4, %v2333_v3, %v2337_v62  ;;  %v2407_v59 = vrot.slane %v2405_v53, 5  ;;  %115 = vst [vmem:[#allocation2 + $0x2c] sm:$0x1] %v114_v25 }
  0xfb   :  { %v6073_v34 = vcombine.low %v2324_v20, %v2338_v21  ;;  %v2416_v56 = vor.u32 %v2415_v44, %v2412_v42  ;;  %v51_v20 = vld [vmem:[#allocation2 + $0x28] sm:$0x1]  ;;  %v7181_v21 = vmov 0   ;;  %v61_v26 = vsel %vm7664_vm8, 0, %v60_v23  ;;  %v69_v42 = vld [vmem:[#allocation2 + $0x58] sm:$0x1] }
  0xfc   :  { %v2388_v29 = vor.u32 %v2387_v10, %v2384_v12  ;;  %v111_v12 = vsel %vm7675_vm9, 0, %v110_v9  ;;  %v42_v10 = vld [vmem:[#allocation2 + $0x10] sm:$0x1]  ;;  %23 = vst.msk [vmem:[#allocation2] sm:$0xf] %vm22_vm10, %v7181_v21  ;;  %v52_v19 = vsel %vm7664_vm8, 0, %v51_v20 }
  0xfd   :  { %112 = vst [vmem:[#allocation2 + $0x24] sm:$0x1] %v111_v12  ;;  %v43_v14 = vsel %vm7664_vm8, 0, %v42_v10  ;;  %25 = vst.msk [vmem:[#allocation2 + $0x4] sm:$0x1] %vm24_vm5, %v7181_v21  ;;  %v70_v44 = vsel %vm7664_vm8, 0, %v69_v42 }
  0xfe   :  { %6622 = vmatmul.mubr.msk.bf16.gmra.mrb[12].mxu0 %vm234_vm1, %v7132_v16  ;;  %v2349_v16 = vshll.u32 %v6057_v49, 16  ;;  %v2389_v50 = vrot.slane %v2388_v29, 4  ;;  %v2417_v49 = vrot.slane %v2416_v56, 4  ;;  %44 = vst [vmem:[#allocation2 + $0x10] sm:$0x1] %v43_v14 }
  0xff   :  { %6627 = vmatprep.mubr.msk.bf16.mxu0 %vm234_vm1, %v6069_v17  ;;  %v2363_v17 = vshll.u32 %v6059_v4, 16  ;;  %v39_v4 = vld [vmem:[#allocation2 + $0x8] sm:$0x1]  ;;  %26 = vst.msk [vmem:[#allocation2 + $0x50] sm:$0xf] %vm22_vm10, %v7181_v21 }
 0x100   :  { %v2351_v33 = vrot.slane %v2349_v16, 5  ;;  %v2394_v1 = vsel %vm7371_vm4, %v2389_v50, %v2393_v51  ;;  %v2422_v2 = vsel %vm7371_vm4, %v2417_v49, %v2421_v63  ;;  %v40_v6 = vsel %vm7664_vm8, 0, %v39_v4  ;;  %v57_v16 = vld [vmem:[#allocation2 + $0x38] sm:$0x1]  ;;  %27 = vst.msk [vmem:[#allocation2 + $0x54] sm:$0x1] %vm24_vm5, %v7181_v21 }
 0x101   :  { %v2365_v37 = vrot.slane %v2363_v17, 5  ;;  %v6075_v61 = vcombine.low %v2380_v43, %v2394_v1  ;;  %41 = vst [vmem:[#allocation2 + $0x8] sm:$0x1] %v40_v6  ;;  %v58_v17 = vsel %vm7664_vm8, 0, %v57_v16  ;;  %29 = vst.msk [vmem:[#allocation2 + $0x48] sm:$0xf] %vm22_vm10, %v7181_v21 }
 0x102   :  { %v2352_v46 = vsel %vm7371_vm4, %v2347_v35, %v2351_v33  ;;  %59 = vst [vmem:[#allocation2 + $0x38] sm:$0x1] %v58_v17  ;;  %30 = vst.msk [vmem:[#allocation2 + $0x4c] sm:$0x1] %vm24_vm5, %v7181_v21  ;;  %v116_v29 = vld [vmem:[#allocation2 + $0x34] sm:$0x1] }
 0x103   :  { %v2366_v54 = vsel %vm7371_vm4, %v2361_v36, %v2365_v37  ;;  %31 = vst.msk [vmem:[#allocation2 + $0x98] sm:$0xf] %vm22_vm10, %v7181_v21  ;;  %53 = vst [vmem:[#allocation2 + $0x28] sm:$0x1] %v52_v19  ;;  %v36_v33 = vld [vmem:[#allocation2] sm:$0x1] }
 0x104   :  { %v6074_v58 = vcombine.low %v2352_v46, %v2366_v54  ;;  %32 = vst.msk [vmem:[#allocation2 + $0x9c] sm:$0x1] %vm24_vm5, %v7181_v21  ;;  %62 = vst [vmem:[#allocation2 + $0x40] sm:$0x1] %v61_v26  ;;  %v37_v35 = vsel %vm7664_vm8, 0, %v36_v33  ;;  %v141_v54 = vsel %vm7675_vm9, 0, %v140_v52 }
 0x105   :  { %38 = vst [vmem:[#allocation2] sm:$0x1] %v37_v35  ;;  %v75_v37 = vld [vmem:[#allocation2 + $0x68] sm:$0x1]  ;;  %71 = vst [vmem:[#allocation2 + $0x58] sm:$0x1] %v70_v44 }
 0x106   :  { %6628 = vmatmul.mubr.msk.bf16.vlgmr.msra.gmra.mrb[0].mxu0 %vm234_vm1, %v6070_v41  ;;  %v2401_v41 = vrot.slane %v2399_v24, 5  ;;  %v122_v24 = vld [vmem:[#allocation2 + $0x44] sm:$0x1]  ;;  %v78_v50 = vld [vmem:[#allocation2 + $0x70] sm:$0x1]  ;;  %v88_v1 = vsel %vm7664_vm8, 0, %v87_v57 }
 0x107   :  { %6631 = vmatprep.mubr.msk.bf16.mxu0 %vm234_vm1, %v6071_v7  ;;  %v102_v7 = vsel %vm7675_vm9, 0, %v101_v5  ;;  %v123_v27 = vsel %vm7675_vm9, 0, %v122_v24  ;;  %v79_v51 = vsel %vm7664_vm8, 0, %v78_v50  ;;  %v72_v46 = vld [vmem:[#allocation2 + $0x60] sm:$0x1] }
 0x108   :  { %v2402_v55 = vor.u32 %v2401_v41, %v2398_v39  ;;  %103 = vst [vmem:[#allocation2 + $0xc] sm:$0x1] %v102_v7  ;;  %124 = vst [vmem:[#allocation2 + $0x44] sm:$0x1] %v123_v27  ;;  %v76_v39 = vsel %vm7664_vm8, 0, %v75_v37  ;;  %v138_v41 = vsel %vm7675_vm9, 0, %v137_v38 }
 0x109   :  { %77 = vst [vmem:[#allocation2 + $0x68] sm:$0x1] %v76_v39  ;;  %139 = vst [vmem:[#allocation2 + $0x6c] sm:$0x1] %v138_v41  ;;  %v134_v53 = vld [vmem:[#allocation2 + $0x64] sm:$0x1] }
 0x10a   :  { %v2403_v62 = vrot.slane %v2402_v55, 4  ;;  %80 = vst [vmem:[#allocation2 + $0x70] sm:$0x1] %v79_v51  ;;  %v73_v55 = vsel %vm7664_vm8, 0, %v72_v46  ;;  %v135_v56 = vsel %vm7675_vm9, 0, %v134_v53 }
 0x10b   :  { %142 = vst [vmem:[#allocation2 + $0x74] sm:$0x1] %v141_v54  ;;  %74 = vst [vmem:[#allocation2 + $0x60] sm:$0x1] %v73_v55  ;;  %v149_v43 = vld [vmem:[#allocation2 + $0x8c] sm:$0x1] }
 0x10c   :  { %v2408_v0 = vsel %vm7371_vm4, %v2403_v62, %v2407_v59  ;;  %136 = vst [vmem:[#allocation2 + $0x64] sm:$0x1] %v135_v56  ;;  %v81_v59 = vld [vmem:[#allocation2 + $0x78] sm:$0x1]  ;;  %89 = vst [vmem:[#allocation2 + $0x88] sm:$0x1] %v88_v1 }
 0x10d   :  { %v6076_v3 = vcombine.low %v2408_v0, %v2422_v2  ;;  %v143_v62 = vld [vmem:[#allocation2 + $0x7c] sm:$0x1]  ;;  %v90_v49 = vld [vmem:[#allocation2 + $0x90] sm:$0x1]  ;;  %v152_v2 = vld [vmem:[#allocation2 + $0x94] sm:$0x1] }
 0x10e   :  { %6632 = vmatmul.mubr.msk.bf16.gmra.mrb[4].mxu0 %vm234_vm1, %v6072_v32  ;;  %v117_v32 = vsel %vm7675_vm9, 0, %v116_v29  ;;  %v144_v63 = vsel %vm7675_vm9, 0, %v143_v62  ;;  %v91_v0 = vsel %vm7664_vm8, 0, %v90_v49  ;;  %v84_v4 = vld [vmem:[#allocation2 + $0x80] sm:$0x1]  ;;  %v8061_v56 = vsel %vm3243_vm11, %v2951_v11, 0 }
 0x10f   :  { %6635 = vmatprep.mubr.msk.bf16.mxu0 %vm234_vm1, %v6073_v34  ;;  %118 = vst [vmem:[#allocation2 + $0x34] sm:$0x1] %v117_v32  ;;  %v98_v34 = vld [vmem:[#allocation2 + $0x4] sm:$0x1]  ;;  %145 = vst [vmem:[#allocation2 + $0x7c] sm:$0x1] %v144_v63 }
 0x110   :  { %v99_v36 = vsel %vm7675_vm9, 0, %v98_v34  ;;  %92 = vst [vmem:[#allocation2 + $0x90] sm:$0x1] %v91_v0  ;;  %v146_v5 = vld [vmem:[#allocation2 + $0x84] sm:$0x1]  ;;  %v85_v7 = vsel %vm7664_vm8, 0, %v84_v4 }
 0x111   :  { %100 = vst [vmem:[#allocation2 + $0x4] sm:$0x1] %v99_v36  ;;  %v6102_v6 = vld [vmem:[%s8851_s3 + $0x4] sm:$0xf]  ;;  %v147_v8 = vsel %vm7675_vm9, 0, %v146_v5 }
 0x112   :  { %7070 = vmatprep.subr.msk.bf16.mxu1 %vm3243_vm11, %v6102_v6  ;;  %v3245_v9 = vsel %vm3243_vm11, %v6102_v6, 0  ;;  %86 = vst [vmem:[#allocation2 + $0x80] sm:$0x1] %v85_v7  ;;  %148 = vst [vmem:[#allocation2 + $0x84] sm:$0x1] %v147_v8 }
 0x113   :  { %6644 = vmatpush3.bf16.msra.mxu1 %v3245_v9  ;;  %v66_v12 = vld [vmem:[#allocation2 + $0x50] sm:$0x1]  ;;  %v128_v10 = vld [vmem:[#allocation2 + $0x54] sm:$0x1]  ;;  %v8028_v15 = vld [vmem:[#allocation2] sm:$0xf] }
 0x114   :  { %7071 = vmatprep.subr.msk.bf16.mxu1 %vm3243_vm11, %v2951_v11  ;;  %v67_v13 = vsel %vm7664_vm8, 0, %v66_v12  ;;  %v129_v14 = vsel %vm7675_vm9, 0, %v128_v10  ;;  %v2969_v16 = vshrl.u32 %v8028_v15, 16  ;;  %v2972_v17 = vshll.u32 %v8028_v15, 16  ;;  %v8037_v23 = vld [vmem:[%s8850_s2] ss:$0 sm:$0xff] }
 0x115   :  { %68 = vst [vmem:[#allocation2 + $0x50] sm:$0x1] %v67_v13  ;;  %130 = vst [vmem:[#allocation2 + $0x54] sm:$0x1] %v129_v14  ;;  %s7182_s2 = smov 120  }
 0x116   :  { %6636 = vmatmul.mubr.msk.bf16.gmra.mrb[8].mxu0 %vm234_vm1, %v6074_v58  ;;  %v150_v58 = vsel %vm7675_vm9, 0, %v149_v43  ;;  %v2971_v18 = vrot.slane %v2969_v16, 4  ;;  %v2974_v20 = vrot.slane %v2972_v17, 5  ;;  %v63_v44 = vld [vmem:[#allocation2 + $0x48] sm:$0x1] }
 0x117   :  { %6639 = vmatprep.mubr.msk.bf16.mxu0 %vm234_vm1, %v6075_v61  ;;  %151 = vst [vmem:[#allocation2 + $0x8c] sm:$0x1] %v150_v58  ;;  %v82_v61 = vsel %vm7664_vm8, 0, %v81_v59  ;;  %v64_v50 = vsel %vm7664_vm8, 0, %v63_v44  ;;  %v2854_v62 = vld [vmem:[#allocation2 + $0x1c] sm:$0x1] }
 0x118   :  { %83 = vst [vmem:[#allocation2 + $0x78] sm:$0x1] %v82_v61  ;;  %v8032_v22 = vld [vmem:[#allocation2 + $0x4] sm:$0x1]  ;;  %v2975_v24 = vor.u32 %v2974_v20, %v2971_v18  ;;  %65 = vst [vmem:[#allocation2 + $0x48] sm:$0x1] %v64_v50 }
 0x119   :  { %v2978_v25 = vshll.u32 %v8032_v22, 16  ;;  %v3561_v46 = vrot.slane %v8032_v22, 5  ;;  %v2851_v61 = vld [vmem:[#allocation2 + $0x18] sm:$0xf]  ;;  %v2839_v4 = vld [vmem:[#allocation2 + $0x8] sm:$0xf] }
 0x11a   :  { %v8042_v34 = vrot.slane %v2975_v24, 4  ;;  %v2842_v5 = vld [vmem:[#allocation2 + $0xc] sm:$0x1]  ;;  %v2857_v10 = vld [vmem:[#allocation2 + $0x20] sm:$0xf] }
 0x11b   :  { %v8044_v35 = vrot.slane %v2978_v25, 5 }
 0x11c   :  { %v2943_v60 = vld [vmem:[#allocation2 + $0x50] sm:$0xf]  ;;  %v8046_v36 = vld [vmem:[#allocation2 + $0x54] sm:$0x1] }
 0x11d   :  { %v3081_v21 = vshrl.u32 %v2943_v60, 16  ;;  %v3084_v19 = vshll.u32 %v2943_v60, 16  ;;  %v3090_v42 = vshll.u32 %v8046_v36, 16  ;;  %v2981_v55 = vsel %vm7371_vm4, %v8042_v34, %v8044_v35 }
 0x11e   :  { %6640 = vmatmul.mubr.msk.bf16.gmra.mrb[12].mxu0 %vm234_vm1, %v6076_v3  ;;  %v153_v3 = vsel %vm7675_vm9, 0, %v152_v2  ;;  %vm5737_vm1 = vcmask 523264  }
 0x11f   :  { %154 = vst [vmem:[#allocation2 + $0x94] sm:$0x1] %v153_v3  ;;  %v3083_v26 = vrot.slane %v3081_v21, 4  ;;  %v3086_v27 = vrot.slane %v3084_v19, 5  ;;  %v8066_v58 = vrot.slane %v3090_v42, 5 }
 0x120   :  { %v2860_v21 = vld [vmem:[#allocation2 + $0x24] sm:$0x1] }
 0x121   :  { %v3087_v41 = vor.u32 %v3086_v27, %v3083_v26 }
 0x123   :  { %v8064_v1 = vrot.slane %v3087_v41, 4 }
 0x1d9   :  { %v6629_v28 = vpop.f32.mrb[0].mxu0 }
 0x1da   :  { %v2598_v29 = vadd.f32 %v6629_v28, %v8037_v23  ;;  %v2510_v30 = vpop.f32.mrb[1].mxu0 }
 0x1db   :  { %v2596_v32 = vadd.f32 %v8037_v23, %v2510_v30  ;;  %v6630_v33 = vpop.f32.mrb[2].mxu0 }
 0x1dc   :  { %v2614_v37 = vmax.f32 %v2598_v29, 0.0  ;;  %v2599_v38 = vadd.f32 %v6630_v33, %v8037_v23  ;;  %5629 = vrot.lane.b32.xlu0 %v2598_v29, %s7182_s2  ;;  %v2513_v39 = vpop.f32.mrb[3].mxu0 }
 0x1dd   :  { %v2612_v45 = vmax.f32 %v2596_v32, 0.0  ;;  %v2597_v47 = vadd.f32 %v8037_v23, %v2513_v39  ;;  %v2848_v39 = vld [vmem:[#allocation2 + $0x14] sm:$0x1] }
 0x1de   :  { %v6305_v51 = vpack.c.bf16 %v2614_v37, %v2614_v37  ;;  %v2615_v52 = vmax.f32 %v2599_v38, 0.0  ;;  %v2845_v37 = vld [vmem:[#allocation2 + $0x10] sm:$0xf] }
 0x1df   :  { %v6303_v53 = vpack.c.bf16 %v2612_v45, %v2612_v45  ;;  %v2613_v54 = vmax.f32 %v2597_v47, 0.0  ;;  %5627 = vrot.lane.b32.xlu1 %v2597_v47, %s7182_s2  ;;  %v8091_v45 = vld [vmem:[#allocation2] sm:$0xe] }
 0x1e0   :  { %v2693_v57 = vshrl.u32 %v6305_v51, 16  ;;  %v6306_v43 = vpack.c.bf16 %v2615_v52, %v2615_v52  ;;  %5625 = vrot.lane.b32.xlu0 %v2596_v32, %s7182_s2  ;;  %v2696_v59 = vshll.u32 %v6305_v51, 16 }
 0x1e1   :  { %v2677_v49 = vshrl.u32 %v6303_v53, 16  ;;  %v2680_v63 = vshll.u32 %v6303_v53, 16  ;;  %v6304_v0 = vpack.c.bf16 %v2613_v54, %v2613_v54  ;;  %v6633_v2 = vpop.f32.mrb[4].mxu0 }
 0x1e2   :  { %v2695_v3 = vrot.slane %v2693_v57, 7  ;;  %v2701_v6 = vshrl.u32 %v6306_v43, 16  ;;  %v2704_v7 = vshll.u32 %v6306_v43, 16  ;;  %v8069_v8 = vadd.f32 %v6633_v2, %v8037_v23  ;;  %v2526_v9 = vpop.f32.mrb[5].mxu0  ;;  %v2875_v2 = vld [vmem:[#allocation2 + $0x38] sm:$0xf] }
 0x1e3   :  { %v2679_v12 = vrot.slane %v2677_v49, 7  ;;  %v2685_v13 = vshrl.u32 %v6304_v0, 16  ;;  %v2688_v14 = vshll.u32 %v6304_v0, 16  ;;  %v8078_v16 = vadd.f32 %v8037_v23, %v2526_v9  ;;  %v6634_v17 = vpop.f32.mrb[6].mxu0 }
 0x1e4   :  { %v2698_v60 = vor.u32 %v2696_v59, %v2695_v3  ;;  %v2699_v18 = vrot.slane %v2695_v3, 4  ;;  %v2703_v20 = vrot.slane %v2701_v6, 7  ;;  %v2618_v19 = vmax.f32 %v8069_v8, 0.0  ;;  %5631 = vrot.lane.b32.xlu0 %v2599_v38, %s7182_s2  ;;  %v2529_v24 = vpop.f32.mrb[7].mxu0 }
 0x1e5   :  { %v2682_v25 = vor.u32 %v2680_v63, %v2679_v12  ;;  %v2683_v26 = vrot.slane %v2679_v12, 4  ;;  %v2687_v27 = vrot.slane %v2685_v13, 7  ;;  %v2616_v28 = vmax.f32 %v8078_v16, 0.0  ;;  %v2878_v12 = vld [vmem:[#allocation2 + $0x3c] sm:$0x1] }
 0x1e6   :  { %v2852_v29 = vsel %vm8073_vm12, %v2698_v60, %v2851_v61  ;;  %v2855_v30 = vsel %vm7664_vm8, %v2699_v18, %v2854_v62  ;;  %v2706_v32 = vor.u32 %v2704_v7, %v2703_v20  ;;  %v2707_v33 = vrot.slane %v2703_v20, 4  ;;  %v2863_v60 = vld [vmem:[#allocation2 + $0x28] sm:$0xf]  ;;  %v2866_v18 = vld [vmem:[#allocation2 + $0x2c] sm:$0x1] }
 0x1e7   :  { %2853 = vst [vmem:[#allocation2 + $0x18] sm:$0xf] %v2852_v29  ;;  %2856 = vst [vmem:[#allocation2 + $0x1c] sm:$0x1] %v2855_v30  ;;  %v2840_v38 = vsel %vm8073_vm12, %v2682_v25, %v2839_v4  ;;  %v2843_v41 = vsel %vm7664_vm8, %v2683_v26, %v2842_v5  ;;  %v2690_v42 = vor.u32 %v2688_v14, %v2687_v27  ;;  %v2691_v44 = vrot.slane %v2687_v27, 4 }
 0x1e8   :  { %2841 = vst [vmem:[#allocation2 + $0x8] sm:$0xf] %v2840_v38  ;;  %2844 = vst [vmem:[#allocation2 + $0xc] sm:$0x1] %v2843_v41  ;;  %v2858_v47 = vsel %vm8073_vm12, %v2706_v32, %v2857_v10  ;;  %v2861_v50 = vsel %vm7664_vm8, %v2707_v33, %v2860_v21  ;;  %v6309_v51 = vpack.c.bf16 %v2618_v19, %v2618_v19  ;;  %v6135_v0 = vrot.slane %v8091_v45, 9 }
 0x1e9   :  { %v6307_v52 = vpack.c.bf16 %v2616_v28, %v2616_v28  ;;  %2859 = vst [vmem:[#allocation2 + $0x20] sm:$0xf] %v2858_v47  ;;  %2862 = vst [vmem:[#allocation2 + $0x24] sm:$0x1] %v2861_v50  ;;  %v2846_v53 = vsel %vm8073_vm12, %v2690_v42, %v2845_v37  ;;  %v2849_v54 = vsel %vm7664_vm8, %v2691_v44, %v2848_v39  ;;  %v6637_v59 = vpop.f32.mrb[8].mxu0 }
 0x1ea   :  { %v8102_v57 = vadd.f32 %v6634_v17, %v8037_v23  ;;  %v8105_v43 = vadd.f32 %v8037_v23, %v2529_v24  ;;  %2847 = vst [vmem:[#allocation2 + $0x10] sm:$0xf] %v2846_v53  ;;  %2850 = vst [vmem:[#allocation2 + $0x14] sm:$0x1] %v2849_v54  ;;  %v2725_v61 = vshrl.u32 %v6309_v51, 16  ;;  %v2728_v62 = vshll.u32 %v6309_v51, 16 }
 0x1eb   :  { %v2709_v49 = vshrl.u32 %v6307_v52, 16  ;;  %v2542_v63 = vpop.f32.mrb[9].mxu0  ;;  %v2606_v5 = vadd.f32 %v6637_v59, %v8037_v23  ;;  %v2712_v13 = vshll.u32 %v6307_v52, 16  ;;  %v8117_v37 = vld [vmem:[#allocation2 + $0x50] sm:$0xe] }
 0x1ec   :  { %v2619_v3 = vmax.f32 %v8102_v57, 0.0  ;;  %v2617_v4 = vmax.f32 %v8105_v43, 0.0  ;;  %v2604_v6 = vadd.f32 %v8037_v23, %v2542_v63  ;;  %v6638_v7 = vpop.f32.mrb[10].mxu0  ;;  %v2727_v9 = vrot.slane %v2725_v61, 7  ;;  %v2881_v44 = vld [vmem:[#allocation2 + $0x40] sm:$0xf] }
 0x1ed   :  { %v2711_v10 = vrot.slane %v2709_v49, 7  ;;  %v8113_v14 = vadd.f32 %v6638_v7, %v8037_v23  ;;  %v2545_v17 = vpop.f32.mrb[11].mxu0  ;;  %v2622_v19 = vmax.f32 %v2606_v5, 0.0  ;;  %5645 = vrot.lane.b32.xlu1 %v2606_v5, %s7182_s2  ;;  %v2884_v47 = vld [vmem:[#allocation2 + $0x44] sm:$0x1] }
 0x1ee   :  { %v6310_v20 = vpack.c.bf16 %v2619_v3, %v2619_v3  ;;  %v6308_v21 = vpack.c.bf16 %v2617_v4, %v2617_v4  ;;  %v2620_v24 = vmax.f32 %v2604_v6, 0.0  ;;  %5641 = vrot.lane.b32.xlu0 %v2604_v6, %s7182_s2  ;;  %v2730_v25 = vor.u32 %v2728_v62, %v2727_v9  ;;  %v2869_v52 = vld [vmem:[#allocation2 + $0x30] sm:$0xf]  ;;  %v2872_v61 = vld [vmem:[#allocation2 + $0x34] sm:$0x1] }
 0x1ef   :  { %v2731_v26 = vrot.slane %v2727_v9, 4  ;;  %v2714_v27 = vor.u32 %v2712_v13, %v2711_v10  ;;  %v2715_v28 = vrot.slane %v2711_v10, 4  ;;  %v6313_v53 = vpack.c.bf16 %v2622_v19, %v2622_v19  ;;  %v2902_v19 = vld [vmem:[#allocation2 + $0x6c] sm:$0x1] }
 0x1f0   :  { %v2733_v29 = vshrl.u32 %v6310_v20, 16  ;;  %v2736_v30 = vshll.u32 %v6310_v20, 16  ;;  %v2717_v32 = vshrl.u32 %v6308_v21, 16  ;;  %v2720_v33 = vshll.u32 %v6308_v21, 16  ;;  %v2899_v21 = vld [vmem:[#allocation2 + $0x68] sm:$0xf] }
 0x1f1   :  { %v2876_v39 = vsel %vm8073_vm12, %v2730_v25, %v2875_v2  ;;  %v2879_v38 = vsel %vm7664_vm8, %v2731_v26, %v2878_v12  ;;  %v2864_v41 = vsel %vm8073_vm12, %v2714_v27, %v2863_v60  ;;  %v2867_v42 = vsel %vm7664_vm8, %v2715_v28, %v2866_v18  ;;  %5647 = vrot.lane.b32.xlu1 %v8113_v14, %s7182_s2  ;;  %v6641_v59 = vpop.f32.mrb[12].mxu0  ;;  %v8144_v25 = vld [vmem:[#allocation2 + $0x8] sm:$0xf] }
 0x1f2   :  { %2877 = vst [vmem:[#allocation2 + $0x38] sm:$0xf] %v2876_v39  ;;  %2880 = vst [vmem:[#allocation2 + $0x3c] sm:$0x1] %v2879_v38  ;;  %v2735_v50 = vrot.slane %v2733_v29, 7  ;;  %v2719_v51 = vrot.slane %v2717_v32, 7  ;;  %v6311_v54 = vpack.c.bf16 %v2620_v24, %v2620_v24  ;;  %5633 = vrot.lane.b32.xlu0 %v8078_v16, %s7182_s2  ;;  %v2605_v49 = vadd.f32 %v8037_v23, %v2545_v17 }
 0x1f3   :  { %2865 = vst [vmem:[#allocation2 + $0x28] sm:$0xf] %v2864_v41  ;;  %2868 = vst [vmem:[#allocation2 + $0x2c] sm:$0x1] %v2867_v42  ;;  %v2623_v62 = vmax.f32 %v8113_v14, 0.0  ;;  %v2610_v63 = vadd.f32 %v6641_v59, %v8037_v23  ;;  %v2558_v2 = vpop.f32.mrb[13].mxu0 }
 0x1f4   :  { %v6143_v3 = vrot.slane %v8117_v37, 9  ;;  %v2738_v4 = vor.u32 %v2736_v30, %v2735_v50  ;;  %v2739_v5 = vrot.slane %v2735_v50, 4  ;;  %v2722_v6 = vor.u32 %v2720_v33, %v2719_v51  ;;  %v6642_v9 = vpop.f32.mrb[14].mxu0  ;;  %v2887_v24 = vld [vmem:[#allocation2 + $0x58] sm:$0xf] }
 0x1f5   :  { %v2723_v7 = vrot.slane %v2719_v51, 4  ;;  %v2757_v12 = vshrl.u32 %v6313_v53, 16  ;;  %v2760_v10 = vshll.u32 %v6313_v53, 16  ;;  %v2741_v13 = vshrl.u32 %v6311_v54, 16  ;;  %v2561_v60 = vpop.f32.mrb[15].mxu0  ;;  %5643 = vrot.lane.b32.xlu1 %v2605_v49, %s7182_s2 }
 0x1f6   :  { %v2744_v16 = vshll.u32 %v6311_v54, 16  ;;  %v2882_v14 = vsel %vm8073_vm12, %v2738_v4, %v2881_v44  ;;  %v2885_v17 = vsel %vm7664_vm8, %v2739_v5, %v2884_v47  ;;  %v2870_v18 = vsel %vm8073_vm12, %v2722_v6, %v2869_v52  ;;  %5635 = vrot.lane.b32.xlu0 %v8105_v43, %s7182_s2  ;;  %v2890_v30 = vld [vmem:[#allocation2 + $0x5c] sm:$0x1]  ;;  %v2893_v6 = vld [vmem:[#allocation2 + $0x60] sm:$0xf] }
 0x1f7   :  { %v2873_v20 = vsel %vm7664_vm8, %v2723_v7, %v2872_v61  ;;  %2883 = vst [vmem:[#allocation2 + $0x40] sm:$0xf] %v2882_v14  ;;  %2886 = vst [vmem:[#allocation2 + $0x44] sm:$0x1] %v2885_v17  ;;  %v2759_v26 = vrot.slane %v2757_v12, 7  ;;  %v2743_v27 = vrot.slane %v2741_v13, 7  ;;  %v6314_v28 = vpack.c.bf16 %v2623_v62, %v2623_v62 }
 0x1f8   :  { %2871 = vst [vmem:[#allocation2 + $0x30] sm:$0xf] %v2870_v18  ;;  %2874 = vst [vmem:[#allocation2 + $0x34] sm:$0x1] %v2873_v20  ;;  %v2621_v29 = vmax.f32 %v2605_v49, 0.0  ;;  %v2626_v32 = vmax.f32 %v2610_v63, 0.0  ;;  %v2608_v33 = vadd.f32 %v8037_v23, %v2558_v2  ;;  %v2611_v39 = vadd.f32 %v6642_v9, %v8037_v23 }
 0x1f9   :  { %v8151_v38 = vadd.f32 %v8037_v23, %v2561_v60  ;;  %v2762_v41 = vor.u32 %v2760_v10, %v2759_v26  ;;  %v2763_v42 = vrot.slane %v2759_v26, 4  ;;  %v2746_v44 = vor.u32 %v2744_v16, %v2743_v27  ;;  %5653 = vrot.lane.b32.xlu1 %v2610_v63, %s7182_s2  ;;  %v2905_v61 = vld [vmem:[#allocation2 + $0x70] sm:$0xf]  ;;  %v2908_v62 = vld [vmem:[#allocation2 + $0x74] sm:$0x1] }
 0x1fa   :  { %v2747_v47 = vrot.slane %v2743_v27, 4  ;;  %v2765_v50 = vshrl.u32 %v6314_v28, 16  ;;  %v6312_v51 = vpack.c.bf16 %v2621_v29, %v2621_v29  ;;  %v6317_v52 = vpack.c.bf16 %v2626_v32, %v2626_v32  ;;  %5637 = vrot.lane.b32.xlu0 %v8069_v8, %s7182_s2  ;;  %v2896_v60 = vld [vmem:[#allocation2 + $0x64] sm:$0x1]  ;;  %v2923_v17 = vld [vmem:[#allocation2 + $0x88] sm:$0xf] }
 0x1fb   :  { %v2983_v43 = vshrl.u32 %v8144_v25, 16  ;;  %v2900_v53 = vsel %vm8073_vm12, %v2762_v41, %v2899_v21  ;;  %v2903_v54 = vsel %vm7664_vm8, %v2763_v42, %v2902_v19  ;;  %v2888_v23 = vsel %vm8073_vm12, %v2746_v44, %v2887_v24  ;;  %v2926_v18 = vld [vmem:[#allocation2 + $0x8c] sm:$0x1] }
 0x1fc   :  { %v2891_v59 = vsel %vm7664_vm8, %v2747_v47, %v2890_v30  ;;  %2901 = vst [vmem:[#allocation2 + $0x68] sm:$0xf] %v2900_v53  ;;  %2904 = vst [vmem:[#allocation2 + $0x6c] sm:$0x1] %v2903_v54  ;;  %v2767_v49 = vrot.slane %v2765_v50, 7  ;;  %v2768_v63 = vshll.u32 %v6314_v28, 16 }
 0x1fd   :  { %2889 = vst [vmem:[#allocation2 + $0x58] sm:$0xf] %v2888_v23  ;;  %2892 = vst [vmem:[#allocation2 + $0x5c] sm:$0x1] %v2891_v59  ;;  %v2749_v2 = vshrl.u32 %v6312_v51, 16  ;;  %v2789_v4 = vshrl.u32 %v6317_v52, 16  ;;  %5649 = vrot.lane.b32.xlu1 %v2608_v33, %s7182_s2 }
 0x1fe   :  { %v2752_v5 = vshll.u32 %v6312_v51, 16  ;;  %v2624_v7 = vmax.f32 %v2608_v33, 0.0  ;;  %v2627_v9 = vmax.f32 %v2611_v39, 0.0  ;;  %v2625_v12 = vmax.f32 %v8151_v38, 0.0  ;;  %5639 = vrot.lane.b32.xlu0 %v8102_v57, %s7182_s2  ;;  %v8173_v29 = vld [vmem:[#allocation2 + $0xc] sm:$0x1] }
 0x1ff   :  { %v2770_v10 = vor.u32 %v2768_v63, %v2767_v49  ;;  %v2771_v13 = vrot.slane %v2767_v49, 4  ;;  %v2751_v16 = vrot.slane %v2749_v2, 7  ;;  %v2791_v14 = vrot.slane %v2789_v4, 7  ;;  %v2911_v47 = vld [vmem:[#allocation2 + $0x78] sm:$0xf] }
 0x200   :  { %v2792_v8 = vshll.u32 %v6317_v52, 16  ;;  %v6315_v20 = vpack.c.bf16 %v2624_v7, %v2624_v7  ;;  %v6318_v21 = vpack.c.bf16 %v2627_v9, %v2627_v9  ;;  %v6316_v19 = vpack.c.bf16 %v2625_v12, %v2625_v12  ;;  %v2914_v50 = vld [vmem:[#allocation2 + $0x7c] sm:$0x1]  ;;  %v2929_v54 = vld [vmem:[#allocation2 + $0x90] sm:$0xf] }
 0x201   :  { %v2906_v24 = vsel %vm8073_vm12, %v2770_v10, %v2905_v61  ;;  %v2909_v26 = vsel %vm7664_vm8, %v2771_v13, %v2908_v62  ;;  %v2754_v27 = vor.u32 %v2752_v5, %v2751_v16  ;;  %v2755_v28 = vrot.slane %v2751_v16, 4  ;;  %5655 = vrot.lane.b32.xlu1 %v2611_v39, %s7182_s2  ;;  %v2932_v23 = vld [vmem:[#allocation2 + $0x94] sm:$0x1]  ;;  %v2917_v49 = vld [vmem:[#allocation2 + $0x80] sm:$0xf] }
 0x202   :  { %2907 = vst [vmem:[#allocation2 + $0x70] sm:$0xf] %v2906_v24  ;;  %2910 = vst [vmem:[#allocation2 + $0x74] sm:$0x1] %v2909_v26  ;;  %v2794_v30 = vor.u32 %v2792_v8, %v2791_v14  ;;  %v2795_v32 = vrot.slane %v2791_v14, 4  ;;  %v2773_v33 = vshrl.u32 %v6315_v20, 16 }
 0x203   :  { %v2985_v41 = vrot.slane %v2983_v43, 4  ;;  %v2894_v42 = vsel %vm8073_vm12, %v2754_v27, %v2893_v6  ;;  %v2897_v57 = vsel %vm7664_vm8, %v2755_v28, %v2896_v60  ;;  %v2776_v44 = vshll.u32 %v6315_v20, 16  ;;  %v2920_v63 = vld [vmem:[#allocation2 + $0x84] sm:$0x1]  ;;  %v8186_v9 = vld [vmem:[#allocation2 + $0x10] sm:$0xf] }
 0x204   :  { %v2797_v51 = vshrl.u32 %v6318_v21, 16  ;;  %2895 = vst [vmem:[#allocation2 + $0x60] sm:$0xf] %v2894_v42  ;;  %2898 = vst [vmem:[#allocation2 + $0x64] sm:$0x1] %v2897_v57  ;;  %v2924_v52 = vsel %vm8073_vm12, %v2794_v30, %v2923_v17  ;;  %v2927_v43 = vsel %vm7664_vm8, %v2795_v32, %v2926_v18  ;;  %v2775_v53 = vrot.slane %v2773_v33, 7 }
 0x205   :  { %v2781_v59 = vshrl.u32 %v6316_v19, 16  ;;  %2925 = vst [vmem:[#allocation2 + $0x88] sm:$0xf] %v2924_v52  ;;  %2928 = vst [vmem:[#allocation2 + $0x8c] sm:$0x1] %v2927_v43  ;;  %v2800_v62 = vshll.u32 %v6318_v21, 16  ;;  %5651 = vrot.lane.b32.xlu1 %v8151_v38, %s7182_s2 }
 0x206   :  { %v2799_v61 = vrot.slane %v2797_v51, 7  ;;  %v2986_v39 = vshll.u32 %v8144_v25, 16  ;;  %v2992_v2 = vshll.u32 %v8173_v29, 16  ;;  %v2778_v4 = vor.u32 %v2776_v44, %v2775_v53  ;;  %v8188_v60 = vld [vmem:[#allocation2 + $0x14] sm:$0x1] }
 0x207   :  { %v2779_v5 = vrot.slane %v2775_v53, 4  ;;  %v2783_v6 = vrot.slane %v2781_v59, 7  ;;  %v2784_v7 = vshll.u32 %v6316_v19, 16  ;;  %v8196_v20 = vld [vmem:[#allocation2 + $0x18] sm:$0xf]  ;;  %v2997_v26 = vshrl.u32 %v8186_v9, 16 }
 0x208   :  { %v2802_v12 = vor.u32 %v2800_v62, %v2799_v61  ;;  %v2803_v10 = vrot.slane %v2799_v61, 4  ;;  %v2988_v13 = vrot.slane %v2986_v39, 5  ;;  %v2994_v16 = vrot.slane %v2992_v2, 5  ;;  %v8202_v38 = vld [vmem:[#allocation2 + $0x1c] sm:$0x1] }
 0x209   :  { %v2912_v14 = vsel %vm8073_vm12, %v2778_v4, %v2911_v47  ;;  %v2915_v8 = vsel %vm7664_vm8, %v2779_v5, %v2914_v50  ;;  %v2786_v17 = vor.u32 %v2784_v7, %v2783_v6  ;;  %v2787_v18 = vrot.slane %v2783_v6, 4  ;;  %v8213_v44 = vld [vmem:[#allocation2 + $0x20] sm:$0xf]  ;;  %v8216_v50 = vld [vmem:[#allocation2 + $0x28] sm:$0xf] }
 0x20a   :  { %2913 = vst [vmem:[#allocation2 + $0x78] sm:$0xf] %v2912_v14  ;;  %2916 = vst [vmem:[#allocation2 + $0x7c] sm:$0x1] %v2915_v8  ;;  %v2930_v21 = vsel %vm8073_vm12, %v2802_v12, %v2929_v54  ;;  %v2933_v19 = vsel %vm7664_vm8, %v2803_v10, %v2932_v23  ;;  %v2989_v24 = vor.u32 %v2988_v13, %v2985_v41  ;;  %v3000_v30 = vshll.u32 %v8186_v9, 16 }
 0x20b   :  { %2931 = vst [vmem:[#allocation2 + $0x90] sm:$0xf] %v2930_v21  ;;  %2934 = vst [vmem:[#allocation2 + $0x94] sm:$0x1] %v2933_v19  ;;  %v2918_v27 = vsel %vm8073_vm12, %v2786_v17, %v2917_v49  ;;  %v2921_v28 = vsel %vm7664_vm8, %v2787_v18, %v2920_v63  ;;  %v3006_v32 = vshll.u32 %v8188_v60, 16  ;;  %v2999_v41 = vrot.slane %v2997_v26, 4 }
 0x20c   :  { %2919 = vst [vmem:[#allocation2 + $0x80] sm:$0xf] %v2918_v27  ;;  %2922 = vst [vmem:[#allocation2 + $0x84] sm:$0x1] %v2921_v28  ;;  %v2990_v33 = vrot.slane %v2989_v24, 4  ;;  %v3011_v42 = vshrl.u32 %v8196_v20, 16 }
 0x20d   :  { %v3014_v57 = vshll.u32 %v8196_v20, 16  ;;  %v3002_v47 = vrot.slane %v3000_v30, 5  ;;  %v3020_v11 = vshll.u32 %v8202_v38, 16  ;;  %v8218_v51 = vld [vmem:[#allocation2 + $0x24] sm:$0x1]  ;;  %v3008_v43 = vrot.slane %v3006_v32, 5 }
 0x20e   :  { %v2995_v52 = vsel %vm7371_vm4, %v2990_v33, %v2994_v16  ;;  %v3013_v53 = vrot.slane %v3011_v42, 4  ;;  %v8222_v23 = vld [vmem:[#allocation2 + $0x2c] sm:$0x1]  ;;  %v3025_v49 = vshrl.u32 %v8213_v44, 16  ;;  %v3028_v39 = vshll.u32 %v8213_v44, 16 }
 0x20f   :  { %v3016_v54 = vrot.slane %v3014_v57, 5  ;;  %v6103_v59 = vcombine.low %v2981_v55, %v2995_v52  ;;  %v3003_v61 = vor.u32 %v3002_v47, %v2999_v41  ;;  %v3022_v62 = vrot.slane %v3020_v11, 5  ;;  %v8233_v5 = vld [vmem:[#allocation2 + $0x30] sm:$0xf]  ;;  %v8238_v55 = vld [vmem:[#allocation2 + $0x34] sm:$0x1] }
 0x210   :  { %v3034_v2 = vshll.u32 %v8218_v51, 16  ;;  %v3039_v4 = vshrl.u32 %v8216_v50, 16  ;;  %v3027_v7 = vrot.slane %v3025_v49, 4  ;;  %v3042_v34 = vshll.u32 %v8216_v50, 16  ;;  %v8240_v14 = vld [vmem:[#allocation2 + $0x38] sm:$0xf] }
 0x211   :  { %v3017_v63 = vor.u32 %v3016_v54, %v3013_v53  ;;  %6645 = vmatprep.mubr.msk.bf16.mxu1 %vm3218_vm13, %v6103_v59  ;;  %v3004_v6 = vrot.slane %v3003_v61, 4  ;;  %v3048_v35 = vshll.u32 %v8222_v23, 16  ;;  %v3030_v10 = vrot.slane %v3028_v39, 5  ;;  %v8247_v26 = vld [vmem:[#allocation2 + $0x3c] sm:$0x1] }
 0x212   :  { %v3036_v13 = vrot.slane %v3034_v2, 5  ;;  %v3041_v16 = vrot.slane %v3039_v4, 4  ;;  %v3044_v17 = vrot.slane %v3042_v34, 5  ;;  %v3053_v21 = vshrl.u32 %v8233_v5, 16  ;;  %v8251_v30 = vld [vmem:[#allocation2 + $0x58] sm:$0xf] }
 0x213   :  { %v3018_v12 = vrot.slane %v3017_v63, 4  ;;  %v3009_v8 = vsel %vm7371_vm4, %v3004_v6, %v3008_v43  ;;  %v3050_v18 = vrot.slane %v3048_v35, 5  ;;  %v3031_v24 = vor.u32 %v3030_v10, %v3027_v7  ;;  %v8256_v32 = vld [vmem:[%s8851_s3 + $0x8] sm:$0xf]  ;;  %v8259_v47 = vld [vmem:[#allocation2 + $0x5c] sm:$0x1] }
 0x214   :  { %v3056_v27 = vshll.u32 %v8233_v5, 16  ;;  %v3062_v28 = vshll.u32 %v8238_v55, 16  ;;  %v3045_v41 = vor.u32 %v3044_v17, %v3041_v16  ;;  %v3055_v42 = vrot.slane %v3053_v21, 4  ;;  %v8262_v54 = vld [vmem:[#allocation2 + $0x60] sm:$0xf] }
 0x215   :  { %v3023_v19 = vsel %vm7371_vm4, %v3018_v12, %v3022_v62  ;;  %v3067_v57 = vshrl.u32 %v8240_v14, 16  ;;  %v3032_v11 = vrot.slane %v3031_v24, 4  ;;  %v3070_v53 = vshll.u32 %v8240_v14, 16  ;;  %v8267_v63 = vld [vmem:[#allocation2 + $0x64] sm:$0x1] }
 0x216   :  { %v6104_v33 = vcombine.low %v3009_v8, %v3023_v19  ;;  %v3058_v52 = vrot.slane %v3056_v27, 5  ;;  %v3064_v43 = vrot.slane %v3062_v28, 5  ;;  %v3046_v59 = vrot.slane %v3045_v41, 4  ;;  %v8280_v10 = vld [vmem:[#allocation2 + $0x68] sm:$0xf] }
 0x217   :  { %v3069_v61 = vrot.slane %v3067_v57, 4  ;;  %v3076_v62 = vshll.u32 %v8247_v26, 16  ;;  %v3095_v49 = vshrl.u32 %v8251_v30, 16  ;;  %v3072_v2 = vrot.slane %v3070_v53, 5  ;;  %v8289_v19 = vld [vmem:[#allocation2 + $0x70] sm:$0xf] }
 0x218   :  { %6646 = vmatmul.mubr.msk.bf16.vlgmr.msra.gmra.mrb[0].mxu1 %vm3218_vm13, %v6104_v33  ;;  %v3059_v39 = vor.u32 %v3058_v52, %v3055_v42  ;;  %v3093_v4 = vsel %vm7371_vm4, %v8064_v1, %v8066_v58  ;;  %v3098_v6 = vshll.u32 %v8251_v30, 16  ;;  %v3037_v7 = vsel %vm7371_vm4, %v3032_v11, %v3036_v13 }
 0x219   :  { %6662 = vmatpush3.bf16.msra.mxu1 %v8061_v56  ;;  %v3051_v34 = vsel %vm7371_vm4, %v3046_v59, %v3050_v18  ;;  %v3097_v35 = vrot.slane %v3095_v49, 4  ;;  %v3104_v12 = vshll.u32 %v8259_v47, 16  ;;  %v8282_v56 = vld [vmem:[#allocation2 + $0x6c] sm:$0x1]  ;;  %v3073_v16 = vor.u32 %v3072_v2, %v3069_v61  ;;  %v8301_v2 = vld [vmem:[#allocation2 + $0x78] sm:$0xf] }
 0x21a   :  { %7072 = vmatprep.subr.msk.bf16.mxu1 %vm3243_vm11, %v8256_v32  ;;  %v6105_v1 = vcombine.low %v3037_v7, %v3051_v34  ;;  %v3060_v58 = vrot.slane %v3059_v39, 4  ;;  %v3100_v8 = vrot.slane %v3098_v6, 5  ;;  %v3078_v13 = vrot.slane %v3076_v62, 5  ;;  %v8299_v62 = vld [vmem:[#allocation2 + $0x74] sm:$0x1] }
 0x21b   :  { %v3109_v17 = vshrl.u32 %v8262_v54, 16  ;;  %v3112_v18 = vshll.u32 %v8262_v54, 16  ;;  %v3118_v21 = vshll.u32 %v8267_v63, 16  ;;  %v3074_v27 = vrot.slane %v3073_v16, 4  ;;  %v8303_v6 = vld [vmem:[#allocation2 + $0x7c] sm:$0x1] }
 0x21c   :  { %6649 = vmatprep.mubr.msk.bf16.mxu1 %vm3218_vm13, %v6105_v1  ;;  %v3065_v24 = vsel %vm7371_vm4, %v3060_v58, %v3064_v43  ;;  %v3101_v28 = vor.u32 %v3100_v8, %v3097_v35  ;;  %v3123_v33 = vshrl.u32 %v8280_v10, 16  ;;  %v3106_v41 = vrot.slane %v3104_v12, 5  ;;  %v8309_v58 = vld [vmem:[#allocation2 + $0x80] sm:$0xf] }
 0x21d   :  { %v3111_v42 = vrot.slane %v3109_v17, 4  ;;  %v3114_v57 = vrot.slane %v3112_v18, 5  ;;  %v3126_v11 = vshll.u32 %v8280_v10, 16  ;;  %v3079_v52 = vsel %vm7371_vm4, %v3074_v27, %v3078_v13 }
 0x21e   :  { %v3102_v53 = vrot.slane %v3101_v28, 4  ;;  %v3125_v59 = vrot.slane %v3123_v33, 4  ;;  %v3132_v61 = vshll.u32 %v8282_v56, 16  ;;  %v6106_v49 = vcombine.low %v3065_v24, %v3079_v52  ;;  %v8315_v33 = vld [vmem:[#allocation2 + $0x84] sm:$0x1] }
 0x21f   :  { %v3115_v43 = vor.u32 %v3114_v57, %v3111_v42  ;;  %v3128_v39 = vrot.slane %v3126_v11, 5  ;;  %v3137_v7 = vshrl.u32 %v8289_v19, 16  ;;  %v3120_v35 = vrot.slane %v3118_v21, 5 }
 0x220   :  { %v3107_v34 = vsel %vm7371_vm4, %v3102_v53, %v3106_v41  ;;  %v3134_v12 = vrot.slane %v3132_v61, 5  ;;  %v3140_v1 = vshll.u32 %v8289_v19, 16  ;;  %6650 = vmatmul.mubr.msk.bf16.gmra.mrb[4].mxu1 %vm3218_vm13, %v6106_v49  ;;  %v3146_v24 = vshll.u32 %v8299_v62, 16  ;;  %v8322_v53 = vld [vmem:[#allocation2 + $0x88] sm:$0xf] }
 0x221   :  { %v6107_v16 = vcombine.low %v3093_v4, %v3107_v34  ;;  %v3116_v8 = vrot.slane %v3115_v43, 4  ;;  %v3129_v13 = vor.u32 %v3128_v39, %v3125_v59  ;;  %v3139_v17 = vrot.slane %v3137_v7, 4  ;;  %v8333_v43 = vld [vmem:[#allocation2 + $0x8c] sm:$0x1] }
 0x222   :  { %v3142_v18 = vrot.slane %v3140_v1, 5  ;;  %v3151_v27 = vshrl.u32 %v8301_v2, 16  ;;  %v3154_v28 = vshll.u32 %v8301_v2, 16  ;;  %v3160_v4 = vshll.u32 %v8303_v6, 16 }
 0x223   :  { %6653 = vmatprep.mubr.msk.bf16.mxu1 %vm3218_vm13, %v6107_v16  ;;  %v3121_v21 = vsel %vm7371_vm4, %v3116_v8, %v3120_v35  ;;  %v3130_v41 = vrot.slane %v3129_v13, 4  ;;  %v3165_v42 = vshrl.u32 %v8309_v58, 16  ;;  %v3168_v59 = vshll.u32 %v8309_v58, 16 }
 0x224   :  { %v3143_v57 = vor.u32 %v3142_v18, %v3139_v17  ;;  %v3153_v11 = vrot.slane %v3151_v27, 4  ;;  %v3156_v52 = vrot.slane %v3154_v28, 5  ;;  %v3174_v7 = vshll.u32 %v8315_v33, 16 }
 0x225   :  { %v3135_v49 = vsel %vm7371_vm4, %v3130_v41, %v3134_v12  ;;  %v3167_v39 = vrot.slane %v3165_v42, 4  ;;  %v3593_v34 = vrot.slane %v8046_v36, 5  ;;  %v3170_v8 = vrot.slane %v3168_v59, 5  ;;  %v3509_v41 = vld [vmem:[#allocation2 + $0x8] sm:$0xe] }
 0x226   :  { %v6108_v35 = vcombine.low %v3121_v21, %v3135_v49  ;;  %v3144_v1 = vrot.slane %v3143_v57, 4  ;;  %v3157_v16 = vor.u32 %v3156_v52, %v3153_v11  ;;  %v3148_v13 = vrot.slane %v3146_v24, 5  ;;  %v3510_v11 = vld [vmem:[#allocation2 + $0x10] sm:$0xe]  ;;  %v3512_v52 = vld [vmem:[#allocation2 + $0x20] sm:$0xe] }
 0x227   :  { %v3179_v17 = vshrl.u32 %v8322_v53, 16  ;;  %v3182_v18 = vshll.u32 %v8322_v53, 16  ;;  %v8345_v12 = vsel %vm8327_vm0, %v6135_v0, %v3561_v46  ;;  %v3162_v28 = vrot.slane %v3160_v4, 5 }
 0x228   :  { %v3158_v27 = vrot.slane %v3157_v16, 4  ;;  %v3171_v36 = vor.u32 %v3170_v8, %v3167_v39  ;;  %v3188_v21 = vshll.u32 %v8333_v43, 16  ;;  %v3565_v24 = vrot.slane %v8173_v29, 5  ;;  %6654 = vmatmul.mubr.msk.bf16.gmra.mrb[8].mxu1 %vm3218_vm13, %v6108_v35  ;;  %v3511_v29 = vld [vmem:[#allocation2 + $0x18] sm:$0xe] }
 0x229   :  { %v3181_v42 = vrot.slane %v3179_v17, 4  ;;  %v3184_v57 = vrot.slane %v3182_v18, 5  ;;  %v8354_v22 = vsel %vm8327_vm0, %v6143_v3, %v3593_v34  ;;  %v3149_v46 = vsel %vm7371_vm4, %v3144_v1, %v3148_v13  ;;  %v3513_v35 = vld [vmem:[#allocation2 + $0x28] sm:$0xe] }
 0x22a   :  { %v3163_v45 = vsel %vm7371_vm4, %v3158_v27, %v3162_v28  ;;  %v3172_v0 = vrot.slane %v3171_v36, 4  ;;  %v3176_v4 = vrot.slane %v3174_v7, 5  ;;  %v3569_v59 = vrot.slane %v8188_v60, 5  ;;  %v3515_v60 = vld [vmem:[#allocation2 + $0x38] sm:$0xe] }
 0x22b   :  { %v3573_v49 = vrot.slane %v8202_v38, 5  ;;  %v6109_v39 = vcombine.low %v3149_v46, %v3163_v45  ;;  %v3185_v37 = vor.u32 %v3184_v57, %v3181_v42  ;;  %v3190_v34 = vrot.slane %v3188_v21, 5  ;;  %v3514_v36 = vld [vmem:[#allocation2 + $0x30] sm:$0xe]  ;;  %v3519_v46 = vld [vmem:[#allocation2 + $0x68] sm:$0xe] }
 0x22c   :  { %v3177_v3 = vsel %vm7371_vm4, %v3172_v0, %v3176_v4  ;;  %v6119_v1 = vcombine.low %v8028_v15, %v8144_v25  ;;  %v6136_v16 = vrot.slane %v3509_v41, 9  ;;  %v6137_v8 = vrot.slane %v3510_v11, 9 }
 0x22d   :  { %6657 = vmatprep.mubr.msk.bf16.mxu1 %vm3218_vm13, %v6109_v39  ;;  %v3186_v7 = vrot.slane %v3185_v37, 4  ;;  %v6138_v13 = vrot.slane %v3511_v29, 9  ;;  %v6139_v17 = vrot.slane %v3512_v52, 9  ;;  %v3577_v18 = vrot.slane %v8218_v51, 5  ;;  %v3518_v51 = vld [vmem:[#allocation2 + $0x60] sm:$0xe] }
 0x22e   :  { %v8369_v38 = vsel %vm8327_vm0, %v6136_v16, %v3565_v24  ;;  %v6140_v27 = vrot.slane %v3513_v35, 9  ;;  %v3581_v28 = vrot.slane %v8222_v23, 5  ;;  %v8379_v21 = vsel %vm8327_vm0, %v6137_v8, %v3569_v59  ;;  %v3517_v24 = vld [vmem:[#allocation2 + $0x58] sm:$0xe]  ;;  %v3520_v52 = vld [vmem:[#allocation2 + $0x70] sm:$0xe] }
 0x22f   :  { %v3191_v15 = vsel %vm7371_vm4, %v3186_v7, %v3190_v34  ;;  %v6152_v25 = vcombine.low %v8345_v12, %v8369_v38  ;;  %v8383_v41 = vsel %vm8327_vm0, %v6138_v13, %v3573_v49  ;;  %v8389_v57 = vsel %vm8327_vm0, %v6139_v17, %v3577_v18  ;;  %v3521_v16 = vld [vmem:[#allocation2 + $0x78] sm:$0xe]  ;;  %v3522_v13 = vld [vmem:[#allocation2 + $0x80] sm:$0xe]  ;;  %v3987_v12 = vld [vmem:[#allocation2 + $0x8] sm:$0xf] }
 0x230   :  { %v6110_v42 = vcombine.low %v3177_v3, %v3191_v15  ;;  %v6153_v23 = vcombine.low %v8379_v21, %v8383_v41  ;;  %v8393_v11 = vsel %vm8327_vm0, %v6140_v27, %v3581_v28  ;;  %v6141_v0 = vrot.slane %v3514_v36, 9  ;;  %v7142_v38 = vld [vmem:[#allocation2 + $0x28] ss:$8 sps:$4 sm:$0xff]   ;;  %v8479_v21 = vld [vmem:[%s8851_s3 + $0x14] sm:$0xf] }
 0x231   :  { %v6154_v45 = vcombine.low %v8389_v57, %v8393_v11  ;;  %v3585_v4 = vrot.slane %v8238_v55, 5  ;;  %v6142_v29 = vrot.slane %v3515_v60, 9  ;;  %v3589_v59 = vrot.slane %v8247_v26, 5 }
 0x232   :  { %6658 = vmatmul.mubr.msk.bf16.gmra.mrb[12].mxu1 %vm3218_vm13, %v6110_v42  ;;  %v6144_v49 = vrot.slane %v3517_v24, 9  ;;  %v3597_v39 = vrot.slane %v8259_v47, 5  ;;  %v6145_v37 = vrot.slane %v3518_v51, 9  ;;  %v3601_v3 = vrot.slane %v8267_v63, 5 }
 0x233   :  { %6663 = vmatprep.mubr.msk.bf16.mxu1 %vm3218_vm13, %v6119_v1  ;;  %v3586_v35 = vsel %vm8327_vm0, %v6141_v0, %v3585_v4  ;;  %v6146_v34 = vrot.slane %v3519_v46, 9  ;;  %v3605_v55 = vrot.slane %v8282_v56, 5  ;;  %v3590_v7 = vsel %vm8327_vm0, %v6142_v29, %v3589_v59  ;;  %v3523_v1 = vld [vmem:[#allocation2 + $0x88] sm:$0xe]  ;;  %v3993_v29 = vld [vmem:[#allocation2 + $0x20] sm:$0xf] }
 0x234   :  { %v3598_v26 = vsel %vm8327_vm0, %v6144_v49, %v3597_v39  ;;  %v6147_v8 = vrot.slane %v3520_v52, 9  ;;  %v3609_v47 = vrot.slane %v8299_v62, 5  ;;  %v6155_v17 = vcombine.low %v3586_v35, %v3590_v7  ;;  %v3991_v49 = vld [vmem:[#allocation2 + $0x18] sm:$0xf]  ;;  %v8488_v7 = vld [vmem:[#allocation2 + $0xc] sm:$0x1] }
 0x235   :  { %v6156_v60 = vcombine.low %v8354_v22, %v3598_v26  ;;  %v3602_v63 = vsel %vm8327_vm0, %v6145_v37, %v3601_v3  ;;  %v3606_v56 = vsel %vm8327_vm0, %v6146_v34, %v3605_v55  ;;  %v6148_v27 = vrot.slane %v3521_v16, 9  ;;  %v7143_v35 = vld [vmem:[#allocation2 + $0x38] ss:$8 sps:$4 sm:$0xff]   ;;  %v3995_v16 = vld [vmem:[#allocation2 + $0x28] sm:$0xf] }
 0x236   :  { %v6157_v18 = vcombine.low %v3602_v63, %v3606_v56  ;;  %v3613_v28 = vrot.slane %v8303_v6, 5  ;;  %v6149_v36 = vrot.slane %v3522_v13, 9  ;;  %v3617_v15 = vrot.slane %v8315_v33, 5  ;;  %v6168_v33 = vld [vmem:[%s8851_s3 + $0xc] sm:$0xf] }
 0x237   :  { %v6150_v24 = vrot.slane %v3523_v1, 9  ;;  %v3621_v62 = vrot.slane %v8333_v43, 5  ;;  %v6120_v51 = vcombine.low %v8186_v9, %v8196_v20  ;;  %v3674_v22 = vsel %vm3243_vm11, %v8256_v32, 0  ;;  %v7144_v55 = vld [vmem:[#allocation2 + $0x58] ss:$8 sps:$4 sm:$0xff]  }
 0x238   :  { %v3610_v42 = vsel %vm8327_vm0, %v6147_v8, %v3609_v47  ;;  %v3614_v57 = vsel %vm8327_vm0, %v6148_v27, %v3613_v28  ;;  %v6121_v6 = vcombine.low %v8213_v44, %v8216_v50  ;;  %v3618_v9 = vsel %vm8327_vm0, %v6149_v36, %v3617_v15  ;;  %v7156_v50 = vld [vmem:[#allocation2 + $0x50] sm:$0xf]  ;;  %v8490_v26 = vld [vmem:[#allocation2 + $0x14] sm:$0x1]  ;;  %v8493_v56 = vld [vmem:[#allocation2 + $0x1c] sm:$0x1] }
 0x239   :  { %v6158_v43 = vcombine.low %v3610_v42, %v3614_v57  ;;  %v3622_v20 = vsel %vm8327_vm0, %v6150_v24, %v3621_v62  ;;  %v6122_v44 = vcombine.low %v8233_v5, %v8240_v14  ;;  %v6123_v11 = vcombine.low %v7156_v50, %v8251_v30  ;;  %v6185_v30 = vld [vmem:[%s8851_s3 + $0x10] sm:$0xf]  ;;  %v8497_v15 = vld [vmem:[#allocation2 + $0x24] sm:$0x1]  ;;  %v7146_v57 = vld [vmem:[#allocation2 + $0x78] ss:$8 sps:$4 sm:$0xff]  }
 0x23a   :  { %6664 = vmatmul.mubr.msk.bf16.vlgmr.msra.gmra.mrb[0].mxu1 %vm3218_vm13, %v6120_v51  ;;  %v6159_v32 = vcombine.low %v3618_v9, %v3622_v20  ;;  %v6124_v46 = vcombine.low %v8262_v54, %v8280_v10  ;;  %v6125_v0 = vcombine.low %v8289_v19, %v8301_v2  ;;  %v6126_v5 = vcombine.low %v8309_v58, %v8322_v53  ;;  %v93_v54 = vld [vmem:[#allocation2 + $0x98] sm:$0x1]  ;;  %v7140_v19 = vld [vmem:[#allocation2 + $0x8] ss:$8 sps:$4 sm:$0xff]   ;;  %v125_v2 = vld [vmem:[#allocation2 + $0x4c] sm:$0x1] }
 0x23b   :  { %6667 = vmatprep.mubr.msk.bf16.mxu1 %vm3218_vm13, %v6121_v6  ;;  %6680 = vmatpush3.bf16.msra.mxu1 %v3674_v22  ;;  %v3872_v14 = vsel %vm3243_vm11, %v6168_v33, 0  ;;  %v94_v10 = vsel %vm7664_vm8, 0, %v93_v54  ;;  %v7141_v58 = vld [vmem:[#allocation2 + $0x18] ss:$8 sps:$4 sm:$0xff]   ;;  %v4294_v53 = vsel %vm3243_vm11, %v6185_v30, 0  ;;  %v126_v40 = vsel %vm7675_vm9, 0, %v125_v2 }
 0x23c   :  { %7073 = vmatprep.subr.msk.bf16.mxu1 %vm3243_vm11, %v6168_v33  ;;  %95 = vst [vmem:[#allocation2 + $0x98] sm:$0x1] %v94_v10  ;;  %v4020_v41 = vshrl.u32 %v3987_v12, 16  ;;  %127 = vst [vmem:[#allocation2 + $0x4c] sm:$0x1] %v126_v40  ;;  %v4062_v39 = vshrl.u32 %v3993_v29, 16 }
 0x23d   :  { %v4065_v37 = vshll.u32 %v3993_v29, 16  ;;  %v4048_v8 = vshrl.u32 %v3991_v49, 16  ;;  %v4051_v47 = vshll.u32 %v3991_v49, 16  ;;  %v4079_v27 = vshll.u32 %v3995_v16, 16  ;;  %v7145_v42 = vld [vmem:[#allocation2 + $0x68] ss:$8 sps:$4 sm:$0xff]  }
 0x23e   :  { %v4022_v52 = vrot.slane %v4020_v41, 4  ;;  %v4064_v1 = vrot.slane %v4062_v39, 4  ;;  %v4029_v28 = vshll.u32 %v8488_v7, 16  ;;  %v4043_v36 = vshll.u32 %v8490_v26, 16  ;;  %v155_v10 = vld [vmem:[#allocation2 + $0x9c] sm:$0x1] }
 0x23f   :  { %v4050_v24 = vrot.slane %v4048_v8, 4  ;;  %v4053_v62 = vrot.slane %v4051_v47, 5  ;;  %v4057_v33 = vshll.u32 %v8493_v56, 16  ;;  %v4071_v20 = vshll.u32 %v8497_v15, 16  ;;  %v8510_v40 = vld [vmem:[#allocation2 + $0x34] sm:$0x1] }
 0x240   :  { %v4081_v50 = vrot.slane %v4079_v27, 5  ;;  %v156_v49 = vsel %vm7675_vm9, 0, %v155_v10  ;;  %v4099_v8 = vshll.u32 %v8510_v40, 16  ;;  %v7147_v47 = vld [vmem:[#allocation2 + $0x88] ss:$8 sps:$4 sm:$0xff]  }
 0x241   :  { %v4059_v2 = vrot.slane %v4057_v33, 5  ;;  %157 = vst [vmem:[#allocation2 + $0x9c] sm:$0x1] %v156_v49  ;;  %v8528_v33 = vld [vmem:[#allocation2 + $0x5c] sm:$0x1] }
 0x242   :  { %6668 = vmatmul.mubr.msk.bf16.gmra.mrb[4].mxu1 %vm3218_vm13, %v6122_v44 }
 0x243   :  { %6671 = vmatprep.mubr.msk.bf16.mxu1 %vm3218_vm13, %v6123_v11  ;;  %v4031_v11 = vrot.slane %v4029_v28, 5 }
 0x24a   :  { %6672 = vmatmul.mubr.msk.bf16.gmra.mrb[8].mxu1 %vm3218_vm13, %v6124_v46  ;;  %v3999_v46 = vld [vmem:[#allocation2 + $0x38] sm:$0xf] }
 0x24b   :  { %6675 = vmatprep.mubr.msk.bf16.mxu1 %vm3218_vm13, %v6125_v0  ;;  %v4001_v0 = vld [vmem:[#allocation2 + $0x40] sm:$0xf] }
 0x24c   :  { %v4118_v29 = vshrl.u32 %v4001_v0, 16 }
 0x252   :  { %6676 = vmatmul.mubr.msk.bf16.gmra.mrb[12].mxu1 %vm3218_vm13, %v6126_v5  ;;  %v4045_v5 = vrot.slane %v4043_v36, 5 }
 0x253   :  { %6681 = vmatprep.mubr.msk.bf16.mxu1 %vm3218_vm13, %v6152_v25  ;;  %v3989_v25 = vld [vmem:[#allocation2 + $0x10] sm:$0xf] }
 0x254   :  { %v4037_v4 = vshll.u32 %v3989_v25, 16 }
 0x256   :  { %v4039_v34 = vrot.slane %v4037_v4, 5  ;;  %v4107_v4 = vshll.u32 %v3999_v46, 16 }
 0x25a   :  { %6682 = vmatmul.mubr.msk.bf16.vlgmr.msra.gmra.mrb[0].mxu1 %vm3218_vm13, %v6153_v23  ;;  %v4023_v23 = vshll.u32 %v3987_v12, 16  ;;  %v4005_v12 = vld [vmem:[#allocation2 + $0x60] sm:$0xf] }
 0x25b   :  { %6685 = vmatprep.mubr.msk.bf16.mxu1 %vm3218_vm13, %v6154_v45  ;;  %6698 = vmatpush3.bf16.msra.mxu1 %v3872_v14  ;;  %v4034_v45 = vshrl.u32 %v3989_v25, 16  ;;  %v4054_v14 = vor.u32 %v4053_v62, %v4050_v24  ;;  %v4073_v25 = vrot.slane %v4071_v20, 5  ;;  %v8523_v24 = vld [vmem:[#allocation2 + $0x44] sm:$0x1] }
 0x25c   :  { %7074 = vmatprep.subr.msk.bf16.mxu1 %vm3243_vm11, %v6185_v30  ;;  %v4025_v59 = vrot.slane %v4023_v23, 5  ;;  %v8512_v23 = vld [vmem:[#allocation2 + $0x3c] sm:$0x1] }
 0x25d   :  { %v4036_v3 = vrot.slane %v4034_v45, 4  ;;  %v4104_v45 = vshrl.u32 %v3999_v46, 16  ;;  %v4055_v39 = vrot.slane %v4054_v14, 4 }
 0x25e   :  { %v4026_v13 = vor.u32 %v4025_v59, %v4022_v52  ;;  %v4121_v52 = vshll.u32 %v4001_v0, 16  ;;  %v4003_v59 = vld [vmem:[#allocation2 + $0x58] sm:$0xf] }
 0x25f   :  { %v4040_v63 = vor.u32 %v4039_v34, %v4036_v3  ;;  %v4149_v3 = vshll.u32 %v4005_v12, 16  ;;  %v4106_v48 = vrot.slane %v4104_v45, 4  ;;  %v4060_v28 = vsel %vm7371_vm4, %v4055_v39, %v4059_v2 }
 0x260   :  { %v4027_v6 = vrot.slane %v4026_v13, 4  ;;  %v4123_v27 = vrot.slane %v4121_v52, 5 }
 0x261   :  { %v4041_v9 = vrot.slane %v4040_v63, 4  ;;  %v4109_v63 = vrot.slane %v4107_v4, 5 }
 0x262   :  { %6686 = vmatmul.mubr.msk.bf16.gmra.mrb[4].mxu1 %vm3218_vm13, %v6155_v17  ;;  %v4067_v17 = vrot.slane %v4065_v37, 5 }
 0x263   :  { %6689 = vmatprep.mubr.msk.bf16.mxu1 %vm3218_vm13, %v6156_v60  ;;  %v3997_v60 = vld [vmem:[#allocation2 + $0x30] sm:$0xf]  ;;  %v4110_v46 = vor.u32 %v4109_v63, %v4106_v48 }
 0x264   :  { %v4090_v51 = vshrl.u32 %v3997_v60, 16  ;;  %v4093_v22 = vshll.u32 %v3997_v60, 16  ;;  %v4135_v60 = vshll.u32 %v4003_v59, 16 }
 0x266   :  { %v4092_v30 = vrot.slane %v4090_v51, 4  ;;  %v4095_v54 = vrot.slane %v4093_v22, 5  ;;  %v4151_v51 = vrot.slane %v4149_v3, 5  ;;  %v4009_v22 = vld [vmem:[#allocation2 + $0x70] sm:$0xf] }
 0x267   :  { %v4174_v14 = vshrl.u32 %v4009_v22, 16 }
 0x268   :  { %v4096_v37 = vor.u32 %v4095_v54, %v4092_v30  ;;  %v4177_v30 = vshll.u32 %v4009_v22, 16  ;;  %v4011_v54 = vld [vmem:[#allocation2 + $0x78] sm:$0xf] }
 0x269   :  { %v4188_v45 = vshrl.u32 %v4011_v54, 16  ;;  %v4191_v4 = vshll.u32 %v4011_v54, 16  ;;  %v4176_v49 = vrot.slane %v4174_v14, 4 }
 0x26a   :  { %6690 = vmatmul.mubr.msk.bf16.gmra.mrb[8].mxu1 %vm3218_vm13, %v6157_v18  ;;  %v4076_v18 = vshrl.u32 %v3995_v16, 16  ;;  %v4097_v36 = vrot.slane %v4096_v37, 4  ;;  %v4179_v39 = vrot.slane %v4177_v30, 5  ;;  %v8544_v37 = vld [vmem:[%s8851_s3 + $0x18] sm:$0xf] }
 0x26b   :  { %6693 = vmatprep.mubr.msk.bf16.mxu1 %vm3218_vm13, %v6158_v43  ;;  %v4068_v43 = vor.u32 %v4067_v17, %v4064_v1  ;;  %v4113_v1 = vshll.u32 %v8512_v23, 16  ;;  %v4132_v17 = vshrl.u32 %v4003_v59, 16  ;;  %v8539_v59 = vld [vmem:[#allocation2 + $0x6c] sm:$0x1]  ;;  %v4190_v63 = vrot.slane %v4188_v45, 4 }
 0x26c   :  { %v4078_v44 = vrot.slane %v4076_v18, 4  ;;  %v4120_v18 = vrot.slane %v4118_v29, 4 }
 0x26d   :  { %v4115_v20 = vrot.slane %v4113_v1, 5 }
 0x26e   :  { %v4082_v41 = vor.u32 %v4081_v50, %v4078_v44  ;;  %v4134_v44 = vrot.slane %v4132_v17, 4  ;;  %v4137_v50 = vrot.slane %v4135_v60, 5  ;;  %v4124_v0 = vor.u32 %v4123_v27, %v4120_v18  ;;  %v4015_v27 = vld [vmem:[#allocation2 + $0x88] sm:$0xf] }
 0x26f   :  { %v4193_v18 = vrot.slane %v4191_v4, 5  ;;  %v8570_v4 = vld [vmem:[#allocation2 + $0x94] sm:$0x1] }
 0x270   :  { %v4083_v13 = vrot.slane %v4082_v41, 4  ;;  %v4125_v52 = vrot.slane %v4124_v0, 4 }
 0x271   :  { %v4194_v30 = vor.u32 %v4193_v18, %v4190_v63  ;;  %v4409_v63 = vld [vmem:[#allocation2 + $0x8] sm:$0xe] }
 0x272   :  { %6694 = vmatmul.mubr.msk.bf16.gmra.mrb[12].mxu1 %vm3218_vm13, %v6159_v32  ;;  %v8501_v32 = vld [vmem:[#allocation2 + $0x2c] sm:$0x1] }
 0x273   :  { %6699 = vmatprep.mubr.msk.bf16.mxu1 %vm3218_vm13, %v7140_v19  ;;  %v4032_v19 = vsel %vm7371_vm4, %v4027_v6, %v4031_v11  ;;  %v4572_v6 = vsel %vm3243_vm11, %v8479_v21, 0  ;;  %v4007_v11 = vld [vmem:[#allocation2 + $0x68] sm:$0xf] }
 0x27a   :  { %6700 = vmatmul.mubr.msk.bf16.vlgmr.msra.gmra.mrb[0].mxu1 %vm3218_vm13, %v7141_v58  ;;  %v4069_v58 = vrot.slane %v4068_v43, 4  ;;  %v4013_v43 = vld [vmem:[#allocation2 + $0x80] sm:$0xf] }
 0x27b   :  { %6703 = vmatprep.mubr.msk.bf16.mxu1 %vm3218_vm13, %v7142_v38  ;;  %6716 = vmatpush3.bf16.msra.mxu1 %v4294_v53  ;;  %v4085_v53 = vshll.u32 %v8501_v32, 16  ;;  %v4046_v38 = vsel %vm7371_vm4, %v4041_v9, %v4045_v5  ;;  %v8532_v5 = vld [vmem:[#allocation2 + $0x64] sm:$0x1]  ;;  %v4205_v2 = vshll.u32 %v4013_v43, 16 }
 0x27c   :  { %7075 = vmatprep.subr.msk.bf16.mxu1 %vm3243_vm11, %v8479_v21  ;;  %v6186_v34 = vcombine.low %v4032_v19, %v4046_v38  ;;  %v4202_v19 = vshrl.u32 %v4013_v43, 16  ;;  %v4163_v38 = vshll.u32 %v4007_v11, 16  ;;  %v4155_v41 = vshll.u32 %v8532_v5, 16 }
 0x27d   :  { %v4087_v16 = vrot.slane %v4085_v53, 5  ;;  %v4141_v53 = vshll.u32 %v8528_v33, 16 }
 0x27e   :  { %v4165_v17 = vrot.slane %v4163_v38, 5  ;;  %v4157_v48 = vrot.slane %v4155_v41, 5  ;;  %v4195_v41 = vrot.slane %v4194_v30, 4  ;;  %v4413_v30 = vld [vmem:[#allocation2 + $0x28] sm:$0xe] }
 0x27f   :  { %v4088_v9 = vsel %vm7371_vm4, %v4083_v13, %v4087_v16  ;;  %v4017_v16 = vld [vmem:[#allocation2 + $0x90] sm:$0xf]  ;;  %v8548_v13 = vld [vmem:[#allocation2 + $0x74] sm:$0x1] }
 0x280   :  { %v4233_v22 = vshll.u32 %v4017_v16, 16 }
 0x282   :  { %6704 = vmatmul.mubr.msk.bf16.gmra.mrb[4].mxu1 %vm3218_vm13, %v7143_v35  ;;  %v4146_v35 = vshrl.u32 %v4005_v12, 16  ;;  %v4160_v12 = vshrl.u32 %v4007_v11, 16  ;;  %v4216_v11 = vshrl.u32 %v4015_v27, 16 }
 0x283   :  { %6707 = vmatprep.mubr.msk.bf16.mxu1 %vm3218_vm13, %v7144_v55  ;;  %v4074_v55 = vsel %vm7371_vm4, %v4069_v58, %v4073_v25  ;;  %v4127_v58 = vshll.u32 %v8523_v24, 16  ;;  %v4138_v25 = vor.u32 %v4137_v50, %v4134_v44  ;;  %v4183_v44 = vshll.u32 %v8548_v13, 16  ;;  %v8562_v50 = vld [vmem:[#allocation2 + $0x7c] sm:$0x1] }
 0x284   :  { %v4148_v62 = vrot.slane %v4146_v35, 4  ;;  %v4111_v35 = vrot.slane %v4110_v46, 4  ;;  %v4162_v1 = vrot.slane %v4160_v12, 4  ;;  %v4219_v46 = vshll.u32 %v4015_v27, 16 }
 0x285   :  { %v4139_v60 = vrot.slane %v4138_v25, 4  ;;  %v4185_v12 = vrot.slane %v4183_v44, 5  ;;  %v4218_v38 = vrot.slane %v4216_v11, 4  ;;  %v4463_v27 = vrot.slane %v8490_v26, 5  ;;  %v4414_v44 = vld [vmem:[#allocation2 + $0x30] sm:$0xe] }
 0x286   :  { %v4152_v10 = vor.u32 %v4151_v51, %v4148_v62  ;;  %v8554_v62 = vld [vmem:[#allocation2 + $0x84] sm:$0x1]  ;;  %v4230_v51 = vshrl.u32 %v4017_v16, 16  ;;  %v4221_v25 = vrot.slane %v4219_v46, 5  ;;  %v4239_v16 = vshll.u32 %v8570_v4, 16 }
 0x287   :  { %v4411_v46 = vld [vmem:[#allocation2 + $0x18] sm:$0xe] }
 0x288   :  { %v4153_v3 = vrot.slane %v4152_v10, 4  ;;  %v4232_v10 = vrot.slane %v4230_v51, 4  ;;  %v6202_v51 = vrot.slane %v4409_v63, 9  ;;  %v4503_v63 = vrot.slane %v8548_v13, 5 }
 0x28a   :  { %6708 = vmatmul.mubr.msk.bf16.gmra.mrb[8].mxu1 %vm3218_vm13, %v7145_v42  ;;  %v6187_v42 = vcombine.low %v4060_v28, %v4074_v55  ;;  %v4207_v55 = vrot.slane %v4205_v2, 5  ;;  %v4197_v2 = vshll.u32 %v8562_v50, 16 }
 0x28b   :  { %6711 = vmatprep.mubr.msk.bf16.mxu1 %vm3218_vm13, %v7146_v57  ;;  %v4101_v57 = vrot.slane %v4099_v8, 5  ;;  %v4129_v8 = vrot.slane %v4127_v58, 5 }
 0x28d   :  { %v4102_v21 = vsel %vm7371_vm4, %v4097_v36, %v4101_v57  ;;  %v4130_v28 = vsel %vm7371_vm4, %v4125_v52, %v4129_v8  ;;  %v4180_v36 = vor.u32 %v4179_v39, %v4176_v49  ;;  %v4158_v57 = vsel %vm7371_vm4, %v4153_v3, %v4157_v48  ;;  %v8576_v3 = vld [vmem:[#allocation2 + $0x8c] sm:$0x1]  ;;  %v4410_v8 = vld [vmem:[#allocation2 + $0x10] sm:$0xe] }
 0x28e   :  { %v6188_v29 = vcombine.low %v4088_v9, %v4102_v21  ;;  %v4166_v9 = vor.u32 %v4165_v17, %v4162_v1  ;;  %v4199_v39 = vrot.slane %v4197_v2, 5  ;;  %v6203_v18 = vrot.slane %v4410_v8, 9 }
 0x28f   :  { %v4181_v21 = vrot.slane %v4180_v36, 4  ;;  %v4241_v36 = vrot.slane %v4239_v16, 5  ;;  %v4475_v2 = vrot.slane %v8501_v32, 5  ;;  %v4491_v16 = vrot.slane %v8528_v33, 5 }
 0x290   :  { %v4200_v1 = vsel %vm7371_vm4, %v4195_v41, %v4199_v39  ;;  %v4415_v41 = vld [vmem:[#allocation2 + $0x38] sm:$0xe] }
 0x291   :  { %v4186_v52 = vsel %vm7371_vm4, %v4181_v21, %v4185_v12  ;;  %v6204_v21 = vrot.slane %v4411_v46, 9  ;;  %v4515_v46 = vrot.slane %v8576_v3, 5 }
 0x292   :  { %6712 = vmatmul.mubr.msk.bf16.gmra.mrb[12].mxu1 %vm3218_vm13, %v7147_v47  ;;  %v4143_v47 = vrot.slane %v4141_v53, 5  ;;  %v4167_v53 = vrot.slane %v4166_v9, 4 }
 0x293   :  { %6717 = vmatprep.mubr.msk.bf16.mxu1 %vm3218_vm13, %v6186_v34  ;;  %v4204_v34 = vrot.slane %v4202_v19, 4  ;;  %v4235_v19 = vrot.slane %v4233_v22, 5  ;;  %v4459_v22 = vrot.slane %v8488_v7, 5  ;;  %v4471_v7 = vrot.slane %v8497_v15, 5 }
 0x294   :  { %v4144_v14 = vsel %vm7371_vm4, %v4139_v60, %v4143_v47  ;;  %v4225_v60 = vshll.u32 %v8576_v3, 16  ;;  %v8658_v3 = vld [vmem:[%s8851_s3 + $0x20] sm:$0xf] }
 0x295   :  { %v4208_v43 = vor.u32 %v4207_v55, %v4204_v34  ;;  %v6190_v54 = vcombine.low %v4144_v14, %v4158_v57  ;;  %v4236_v49 = vor.u32 %v4235_v19, %v4232_v10  ;;  %v4222_v55 = vor.u32 %v4221_v25, %v4218_v38  ;;  %v4418_v38 = vld [vmem:[#allocation2 + $0x60] sm:$0xe] }
 0x296   :  { %v4460_v11 = vsel %vm8327_vm0, %v6202_v51, %v4459_v22  ;;  %v4467_v10 = vrot.slane %v8493_v56, 5  ;;  %v6206_v19 = vrot.slane %v4413_v30, 9  ;;  %v4771_v56 = vsel %vm3243_vm11, %v8544_v37, 0  ;;  %v7148_v30 = vld [vmem:[#allocation2 + $0x10] ss:$8 sps:$4 sm:$0xff]  }
 0x297   :  { %v4209_v58 = vrot.slane %v4208_v43, 4  ;;  %v4237_v48 = vrot.slane %v4236_v49, 4  ;;  %v4412_v43 = vld [vmem:[#allocation2 + $0x20] sm:$0xe]  ;;  %v6252_v49 = vld [vmem:[%s8851_s3 + $0x1c] sm:$0xf] }
 0x298   :  { %v6205_v14 = vrot.slane %v4412_v43, 9  ;;  %v4468_v12 = vsel %vm8327_vm0, %v6204_v21, %v4467_v10  ;;  %v4476_v25 = vsel %vm8327_vm0, %v6206_v19, %v4475_v2  ;;  %v6211_v39 = vrot.slane %v4418_v38, 9  ;;  %v7150_v21 = vld [vmem:[#allocation2 + $0x30] ss:$8 sps:$4 sm:$0xff]  }
 0x299   :  { %v4242_v57 = vsel %vm7371_vm4, %v4237_v48, %v4241_v36  ;;  %v4499_v51 = vrot.slane %v8539_v59, 5  ;;  %v4888_v10 = vld [vmem:[#allocation2 + $0x18] sm:$0xf] }
 0x29a   :  { %6718 = vmatmul.mubr.msk.bf16.vlgmr.msra.gmra.mrb[0].mxu1 %vm3218_vm13, %v6187_v42  ;;  %v4116_v42 = vsel %vm7371_vm4, %v4111_v35, %v4115_v20  ;;  %v4211_v20 = vshll.u32 %v8554_v62, 16 }
 0x29b   :  { %6721 = vmatprep.mubr.msk.bf16.mxu1 %vm3218_vm13, %v6188_v29  ;;  %6734 = vmatpush3.bf16.msra.mxu1 %v4572_v6  ;;  %v4169_v6 = vshll.u32 %v8539_v59, 16  ;;  %v6189_v0 = vcombine.low %v4116_v42, %v4130_v28  ;;  %v4223_v28 = vrot.slane %v4222_v55, 4  ;;  %v4227_v42 = vrot.slane %v4225_v60, 5  ;;  %v4419_v60 = vld [vmem:[#allocation2 + $0x68] sm:$0xe] }
 0x29c   :  { %7076 = vmatprep.subr.msk.bf16.mxu1 %vm3243_vm11, %v8544_v37  ;;  %v4213_v45 = vrot.slane %v4211_v20, 5  ;;  %v6207_v20 = vrot.slane %v4414_v44, 9  ;;  %v4483_v37 = vrot.slane %v8512_v23, 5  ;;  %v6212_v36 = vrot.slane %v4419_v60, 9  ;;  %v4423_v44 = vld [vmem:[#allocation2 + $0x88] sm:$0xe] }
 0x29d   :  { %v4171_v29 = vrot.slane %v4169_v6, 5  ;;  %v4464_v6 = vsel %vm8327_vm0, %v6203_v18, %v4463_v27  ;;  %v4228_v9 = vsel %vm7371_vm4, %v4223_v28, %v4227_v42  ;;  %v4421_v18 = vld [vmem:[#allocation2 + $0x78] sm:$0xe]  ;;  %v4511_v28 = vrot.slane %v8554_v62, 5 }
 0x29e   :  { %v4214_v35 = vsel %vm7371_vm4, %v4209_v58, %v4213_v45  ;;  %v6193_v26 = vcombine.low %v4228_v9, %v4242_v57  ;;  %v4472_v58 = vsel %vm8327_vm0, %v6205_v14, %v4471_v7  ;;  %v6214_v22 = vrot.slane %v4421_v18, 9  ;;  %v7153_v18 = vld [vmem:[#allocation2 + $0x70] ss:$8 sps:$4 sm:$0xff]  }
 0x29f   :  { %v4172_v34 = vsel %vm7371_vm4, %v4167_v53, %v4171_v29  ;;  %v6192_v17 = vcombine.low %v4200_v1, %v4214_v35  ;;  %v4416_v53 = vld [vmem:[#allocation2 + $0x40] sm:$0xe]  ;;  %v4487_v29 = vrot.slane %v8523_v24, 5  ;;  %v4495_v35 = vrot.slane %v8532_v5, 5 }
 0x2a0   :  { %v6191_v47 = vcombine.low %v4172_v34, %v4186_v52  ;;  %v6209_v45 = vrot.slane %v4416_v53, 9  ;;  %v4417_v52 = vld [vmem:[#allocation2 + $0x58] sm:$0xe]  ;;  %v6208_v34 = vrot.slane %v4415_v41, 9  ;;  %v4422_v1 = vld [vmem:[#allocation2 + $0x80] sm:$0xe]  ;;  %v4500_v43 = vsel %vm8327_vm0, %v6212_v36, %v4499_v51 }
 0x2a1   :  { %v6210_v55 = vrot.slane %v4417_v52, 9  ;;  %v4496_v8 = vsel %vm8327_vm0, %v6211_v39, %v4495_v35  ;;  %v6215_v27 = vrot.slane %v4422_v1, 9  ;;  %v4507_v42 = vrot.slane %v8562_v50, 5  ;;  %v7152_v39 = vld [vmem:[#allocation2 + $0x60] ss:$8 sps:$4 sm:$0xff]  }
 0x2a2   :  { %6722 = vmatmul.mubr.msk.bf16.gmra.mrb[4].mxu1 %vm3218_vm13, %v6189_v0  ;;  %v6219_v0 = vcombine.low %v4460_v11, %v4464_v6  ;;  %v4488_v24 = vsel %vm8327_vm0, %v6209_v45, %v4487_v29  ;;  %v4484_v5 = vsel %vm8327_vm0, %v6208_v34, %v4483_v37  ;;  %v4424_v6 = vld [vmem:[#allocation2 + $0x90] sm:$0xe]  ;;  %v4519_v11 = vrot.slane %v8570_v4, 5  ;;  %v7149_v4 = vld [vmem:[#allocation2 + $0x20] ss:$8 sps:$4 sm:$0xff]  }
 0x2a3   :  { %6725 = vmatprep.mubr.msk.bf16.mxu1 %vm3218_vm13, %v6190_v54  ;;  %v4479_v54 = vrot.slane %v8510_v40, 5  ;;  %v6220_v40 = vcombine.low %v4468_v12, %v4472_v58  ;;  %v4492_v23 = vsel %vm8327_vm0, %v6210_v55, %v4491_v16  ;;  %v4512_v13 = vsel %vm8327_vm0, %v6215_v27, %v4511_v28  ;;  %v4892_v58 = vld [vmem:[#allocation2 + $0x28] sm:$0xf]  ;;  %v4890_v12 = vld [vmem:[#allocation2 + $0x20] sm:$0xf] }
 0x2a4   :  { %v6223_v48 = vcombine.low %v4492_v23, %v4496_v8  ;;  %v4508_v62 = vsel %vm8327_vm0, %v6214_v22, %v4507_v42  ;;  %v6217_v59 = vrot.slane %v4424_v6, 9  ;;  %v6216_v50 = vrot.slane %v4423_v44, 9  ;;  %v8664_v45 = vld [vmem:[#allocation2 + $0x14] sm:$0x1]  ;;  %v4894_v35 = vld [vmem:[#allocation2 + $0x30] sm:$0xf] }
 0x2a5   :  { %v4480_v15 = vsel %vm8327_vm0, %v6207_v20, %v4479_v54  ;;  %v5193_v20 = vsel %vm3243_vm11, %v6252_v49, 0  ;;  %v4886_v54 = vld [vmem:[#allocation2 + $0x10] sm:$0xf]  ;;  %v4936_v53 = vshll.u32 %v4888_v10, 16  ;;  %v4961_v38 = vshrl.u32 %v4892_v58, 16 }
 0x2a6   :  { %v6221_v32 = vcombine.low %v4476_v25, %v4480_v15  ;;  %v4516_v14 = vsel %vm8327_vm0, %v6216_v50, %v4515_v46  ;;  %v4919_v19 = vshrl.u32 %v4886_v54, 16  ;;  %v4922_v2 = vshll.u32 %v4886_v54, 16  ;;  %v7151_v25 = vld [vmem:[#allocation2 + $0x40] ss:$8 sps:$4 sm:$0xff]   ;;  %v4896_v55 = vld [vmem:[#allocation2 + $0x38] sm:$0xf] }
 0x2a7   :  { %v4933_v15 = vshrl.u32 %v4888_v10, 16  ;;  %v4938_v52 = vrot.slane %v4936_v53, 5  ;;  %v4963_v34 = vrot.slane %v4961_v38, 4  ;;  %v8668_v16 = vld [vmem:[#allocation2 + $0x1c] sm:$0x1]  ;;  %v4928_v8 = vshll.u32 %v8664_v45, 16 }
 0x2a8   :  { %v4924_v41 = vrot.slane %v4922_v2, 5  ;;  %v4975_v60 = vshrl.u32 %v4894_v35, 16  ;;  %v4942_v27 = vshll.u32 %v8668_v16, 16  ;;  %v4898_v36 = vld [vmem:[#allocation2 + $0x40] sm:$0xf] }
 0x2a9   :  { %v4935_v29 = vrot.slane %v4933_v15, 4  ;;  %v4930_v22 = vrot.slane %v4928_v8, 5  ;;  %v4902_v44 = vld [vmem:[#allocation2 + $0x60] sm:$0xf]  ;;  %v5003_v50 = vshrl.u32 %v4898_v36, 16  ;;  %v5006_v46 = vshll.u32 %v4898_v36, 16 }
 0x2aa   :  { %6726 = vmatmul.mubr.msk.bf16.gmra.mrb[8].mxu1 %vm3218_vm13, %v6191_v47  ;;  %v4420_v47 = vld [vmem:[#allocation2 + $0x70] sm:$0xe]  ;;  %v5031_v10 = vshrl.u32 %v4902_v44, 16  ;;  %v5471_v36 = vsel %vm3243_vm11, %v8658_v3, 0 }
 0x2ab   :  { %6729 = vmatprep.mubr.msk.bf16.mxu1 %vm3218_vm13, %v6192_v17  ;;  %v6222_v17 = vcombine.low %v4484_v5, %v4488_v24  ;;  %v6213_v33 = vrot.slane %v4420_v47, 9  ;;  %v8671_v47 = vld [vmem:[#allocation2 + $0x24] sm:$0x1]  ;;  %v4939_v1 = vor.u32 %v4938_v52, %v4935_v29 }
 0x2ac   :  { %v4956_v42 = vshll.u32 %v8671_v47, 16 }
 0x2ad   :  { %v4504_v57 = vsel %vm8327_vm0, %v6213_v33, %v4503_v63  ;;  %v4989_v33 = vshrl.u32 %v4896_v55, 16  ;;  %v4992_v63 = vshll.u32 %v4896_v55, 16  ;;  %v4940_v6 = vrot.slane %v4939_v1, 4  ;;  %v7155_v55 = vld [vmem:[#allocation2 + $0x90] ss:$8 sps:$4 sm:$0xff]  }
 0x2ae   :  { %v6224_v9 = vcombine.low %v4500_v43, %v4504_v57  ;;  %v4958_v54 = vrot.slane %v4956_v42, 5  ;;  %v8695_v1 = vld [vmem:[#allocation2 + $0x64] sm:$0x1]  ;;  %v4906_v42 = vld [vmem:[#allocation2 + $0x70] sm:$0xf] }
 0x2b2   :  { %6730 = vmatmul.mubr.msk.bf16.gmra.mrb[12].mxu1 %vm3218_vm13, %v6193_v26  ;;  %v6225_v26 = vcombine.low %v4508_v62, %v4512_v13  ;;  %v4900_v13 = vld [vmem:[#allocation2 + $0x48] sm:$0xf] }
 0x2b3   :  { %6735 = vmatprep.mubr.msk.bf16.mxu1 %vm3218_vm13, %v6219_v0  ;;  %v4520_v0 = vsel %vm8327_vm0, %v6217_v59, %v4519_v11  ;;  %v4991_v59 = vrot.slane %v4989_v33, 4  ;;  %v4994_v11 = vrot.slane %v4992_v63, 5  ;;  %v8699_v63 = vld [vmem:[#allocation2 + $0x6c] sm:$0x1] }
 0x2b4   :  { %v6226_v7 = vcombine.low %v4516_v14, %v4520_v0  ;;  %v4944_v0 = vrot.slane %v4942_v27, 5 }
 0x2b6   :  { %v4945_v2 = vsel %vm7371_vm4, %v4940_v6, %v4944_v0  ;;  %v4912_v0 = vld [vmem:[#allocation2 + $0x88] sm:$0xf] }
 0x2ba   :  { %6736 = vmatmul.mubr.msk.bf16.vlgmr.msra.gmra.mrb[0].mxu1 %vm3218_vm13, %v6220_v40  ;;  %v4964_v40 = vshll.u32 %v4892_v58, 16 }
 0x2bb   :  { %6739 = vmatprep.mubr.msk.bf16.mxu1 %vm3218_vm13, %v6221_v32  ;;  %6752 = vmatpush3.bf16.msra.mxu1 %v4771_v56  ;;  %v4921_v56 = vrot.slane %v4919_v19, 4  ;;  %v4947_v32 = vshrl.u32 %v4890_v12, 16  ;;  %v5034_v19 = vshll.u32 %v4902_v44, 16 }
 0x2bc   :  { %7077 = vmatprep.subr.msk.bf16.mxu1 %vm3243_vm11, %v6252_v49  ;;  %v4950_v49 = vshll.u32 %v4890_v12, 16  ;;  %v4966_v37 = vrot.slane %v4964_v40, 5  ;;  %v4904_v12 = vld [vmem:[#allocation2 + $0x68] sm:$0xf]  ;;  %v4995_v40 = vor.u32 %v4994_v11, %v4991_v59 }
 0x2bd   :  { %v4925_v24 = vor.u32 %v4924_v41, %v4921_v56  ;;  %v4949_v5 = vrot.slane %v4947_v32, 4  ;;  %v5005_v56 = vrot.slane %v5003_v50, 4  ;;  %v5008_v41 = vrot.slane %v5006_v46, 5 }
 0x2be   :  { %v4952_v23 = vrot.slane %v4950_v49, 5  ;;  %v4967_v28 = vor.u32 %v4966_v37, %v4963_v34  ;;  %v5045_v34 = vshrl.u32 %v4904_v12, 16  ;;  %v5048_v37 = vshll.u32 %v4904_v12, 16 }
 0x2bf   :  { %v4926_v51 = vrot.slane %v4925_v24, 4  ;;  %v5009_v33 = vor.u32 %v5008_v41, %v5005_v56  ;;  %v5040_v50 = vshll.u32 %v8695_v1, 16  ;;  %v5054_v46 = vshll.u32 %v8699_v63, 16  ;;  %v4914_v56 = vld [vmem:[#allocation2 + $0x90] sm:$0xf] }
 0x2c0   :  { %v4953_v43 = vor.u32 %v4952_v23, %v4949_v5  ;;  %v4968_v14 = vrot.slane %v4967_v28, 4  ;;  %v5047_v6 = vrot.slane %v5045_v34, 4  ;;  %v5104_v12 = vshll.u32 %v4912_v0, 16  ;;  %v8720_v34 = vld [vmem:[#allocation2 + $0x74] sm:$0x1] }
 0x2c1   :  { %v5010_v11 = vrot.slane %v5009_v33, 4  ;;  %v5115_v33 = vshrl.u32 %v4914_v56, 16 }
 0x2c2   :  { %6740 = vmatmul.mubr.msk.bf16.gmra.mrb[4].mxu1 %vm3218_vm13, %v6222_v17  ;;  %v8673_v17 = vld [vmem:[#allocation2 + $0x2c] sm:$0x1]  ;;  %v4954_v58 = vrot.slane %v4953_v43, 4  ;;  %v5050_v43 = vrot.slane %v5048_v37, 5 }
 0x2c3   :  { %6743 = vmatprep.mubr.msk.bf16.mxu1 %vm3218_vm13, %v6223_v48  ;;  %v4978_v48 = vshll.u32 %v4894_v35, 16  ;;  %v4970_v57 = vshll.u32 %v8673_v17, 16  ;;  %v5036_v35 = vrot.slane %v5034_v19, 5 }
 0x2c4   :  { %v4959_v23 = vsel %vm7371_vm4, %v4954_v58, %v4958_v54  ;;  %v5051_v19 = vor.u32 %v5050_v43, %v5047_v6  ;;  %v8732_v43 = vld [vmem:[#allocation2 + $0x8c] sm:$0x1] }
 0x2c5   :  { %v4980_v62 = vrot.slane %v4978_v48, 5  ;;  %v4972_v15 = vrot.slane %v4970_v57, 5  ;;  %v4996_v48 = vrot.slane %v4995_v40, 4  ;;  %v5042_v40 = vrot.slane %v5040_v50, 5 }
 0x2c7   :  { %v4973_v32 = vsel %vm7371_vm4, %v4968_v14, %v4972_v15 }
 0x2c8   :  { %v6254_v27 = vcombine.low %v4959_v23, %v4973_v32  ;;  %v5056_v32 = vrot.slane %v5054_v46, 5 }
 0x2ca   :  { %6744 = vmatmul.mubr.msk.bf16.gmra.mrb[8].mxu1 %vm3218_vm13, %v6224_v9  ;;  %v4977_v9 = vrot.slane %v4975_v60, 4 }
 0x2cb   :  { %6747 = vmatprep.mubr.msk.bf16.mxu1 %vm3218_vm13, %v6225_v26  ;;  %v7154_v26 = vld [vmem:[#allocation2 + $0x80] ss:$8 sps:$4 sm:$0xff]  }
 0x2cc   :  { %v4981_v53 = vor.u32 %v4980_v62, %v4977_v9  ;;  %v4910_v9 = vld [vmem:[#allocation2 + $0x80] sm:$0xf] }
 0x2ce   :  { %v4982_v8 = vrot.slane %v4981_v53, 4  ;;  %v5101_v53 = vshrl.u32 %v4912_v0, 16  ;;  %v5110_v0 = vshll.u32 %v8732_v43, 16 }
 0x2d0   :  { %v5103_v23 = vrot.slane %v5101_v53, 4 }
 0x2d2   :  { %6748 = vmatmul.mubr.msk.bf16.gmra.mrb[12].mxu1 %vm3218_vm13, %v6226_v7  ;;  %v8679_v7 = vld [vmem:[#allocation2 + $0x34] sm:$0x1] }
 0x2d3   :  { %6753 = vmatprep.mubr.msk.bf16.mxu1 %vm3218_vm13, %v7148_v30  ;;  %v5017_v30 = vshrl.u32 %v4900_v13, 16  ;;  %v4984_v38 = vshll.u32 %v8679_v7, 16  ;;  %v5374_v31 = vrot.slane %v8679_v7, 5  ;;  %v5316_v7 = vld [vmem:[#allocation2 + $0x60] sm:$0xe] }
 0x2d5   :  { %v5019_v52 = vrot.slane %v5017_v30, 4  ;;  %v4986_v60 = vrot.slane %v4984_v38, 5  ;;  %v5059_v30 = vshrl.u32 %v4906_v42, 16 }
 0x2d7   :  { %v4987_v62 = vsel %vm7371_vm4, %v4982_v8, %v4986_v60  ;;  %v5061_v37 = vrot.slane %v5059_v30, 4  ;;  %v8724_v8 = vld [vmem:[#allocation2 + $0x7c] sm:$0x1]  ;;  %v5106_v60 = vrot.slane %v5104_v12, 5 }
 0x2d8   :  { %v5082_v6 = vshll.u32 %v8724_v8, 16 }
 0x2da   :  { %6754 = vmatmul.mubr.msk.bf16.vlgmr.msra.gmra.mrb[0].mxu1 %vm3218_vm13, %v7149_v4  ;;  %v5020_v4 = vshll.u32 %v4900_v13, 16  ;;  %v5084_v30 = vrot.slane %v5082_v6, 5  ;;  %v5313_v6 = vld [vmem:[#allocation2 + $0x38] sm:$0xe] }
 0x2db   :  { %6757 = vmatprep.mubr.msk.bf16.mxu1 %vm3218_vm13, %v7150_v21  ;;  %6770 = vmatpush3.bf16.msra.mxu1 %v5193_v20  ;;  %v4931_v20 = vsel %vm7371_vm4, %v4926_v51, %v4930_v22  ;;  %v8684_v21 = vld [vmem:[#allocation2 + $0x3c] sm:$0x1]  ;;  %v8704_v51 = vld [vmem:[#allocation2 + $0x4c] sm:$0x1] }
 0x2dc   :  { %7078 = vmatprep.subr.msk.bf16.mxu1 %vm3243_vm11, %v8658_v3  ;;  %v4998_v29 = vshll.u32 %v8684_v21, 16  ;;  %v5022_v49 = vrot.slane %v5020_v4, 5  ;;  %v6253_v24 = vcombine.low %v4931_v20, %v4945_v2  ;;  %v5026_v57 = vshll.u32 %v8704_v51, 16 }
 0x2dd   :  { %v5087_v4 = vshrl.u32 %v4910_v9, 16  ;;  %v5090_v20 = vshll.u32 %v4910_v9, 16  ;;  %v5062_v2 = vshll.u32 %v4906_v42, 16 }
 0x2de   :  { %v5000_v28 = vrot.slane %v4998_v29, 5  ;;  %v5023_v22 = vor.u32 %v5022_v49, %v5019_v52  ;;  %v5028_v54 = vrot.slane %v5026_v57, 5  ;;  %v4916_v49 = vld [vmem:[#allocation2 + $0x98] sm:$0xf] }
 0x2df   :  { %v5089_v29 = vrot.slane %v5087_v4, 4  ;;  %v5092_v52 = vrot.slane %v5090_v20, 5  ;;  %v8738_v4 = vld [vmem:[#allocation2 + $0x94] sm:$0x1] }
 0x2e0   :  { %v5001_v3 = vsel %vm7371_vm4, %v4996_v48, %v5000_v28  ;;  %v5024_v14 = vrot.slane %v5023_v22, 4  ;;  %v8726_v48 = vld [vmem:[#allocation2 + $0x84] sm:$0x1]  ;;  %v5132_v28 = vshll.u32 %v4916_v49, 16 }
 0x2e1   :  { %v6255_v38 = vcombine.low %v4987_v62, %v5001_v3  ;;  %v5093_v22 = vor.u32 %v5092_v52, %v5089_v29 }
 0x2e2   :  { %6758 = vmatmul.mubr.msk.bf16.gmra.mrb[4].mxu1 %vm3218_vm13, %v7151_v25  ;;  %v8689_v25 = vld [vmem:[#allocation2 + $0x44] sm:$0x1]  ;;  %v5134_v50 = vrot.slane %v5132_v28, 5  ;;  %v5311_v28 = vld [vmem:[#allocation2 + $0x28] sm:$0xe] }
 0x2e3   :  { %6761 = vmatprep.mubr.msk.bf16.mxu1 %vm3218_vm13, %v7152_v39  ;;  %v5033_v39 = vrot.slane %v5031_v10, 4  ;;  %v5012_v5 = vshll.u32 %v8689_v25, 16  ;;  %v5094_v46 = vrot.slane %v5093_v22, 4 }
 0x2e5   :  { %v5037_v13 = vor.u32 %v5036_v35, %v5033_v39  ;;  %v5014_v44 = vrot.slane %v5012_v5, 5  ;;  %v5029_v39 = vsel %vm7371_vm4, %v5024_v14, %v5028_v54  ;;  %v5052_v35 = vrot.slane %v5051_v19, 4  ;;  %v8740_v19 = vld [vmem:[#allocation2 + $0x9c] sm:$0x1] }
 0x2e6   :  { %v5138_v53 = vshll.u32 %v8740_v19, 16 }
 0x2e7   :  { %v5038_v10 = vrot.slane %v5037_v13, 4  ;;  %v5015_v41 = vsel %vm7371_vm4, %v5010_v11, %v5014_v44  ;;  %v5057_v57 = vsel %vm7371_vm4, %v5052_v35, %v5056_v32  ;;  %v5096_v44 = vshll.u32 %v8726_v48, 16 }
 0x2e8   :  { %v6256_v42 = vcombine.low %v5015_v41, %v5029_v39  ;;  %v5308_v41 = vld [vmem:[#allocation2 + $0x10] sm:$0xe]  ;;  %v5140_v35 = vrot.slane %v5138_v53, 5  ;;  %v5394_v53 = vrot.slane %v8699_v63, 5  ;;  %v5402_v63 = vrot.slane %v8724_v8, 5 }
 0x2e9   :  { %v5098_v54 = vrot.slane %v5096_v44, 5  ;;  %v5366_v44 = vrot.slane %v8671_v47, 5 }
 0x2ea   :  { %6762 = vmatmul.mubr.msk.bf16.gmra.mrb[8].mxu1 %vm3218_vm13, %v7153_v18  ;;  %v4908_v18 = vld [vmem:[#allocation2 + $0x78] sm:$0xf] }
 0x2eb   :  { %6765 = vmatprep.mubr.msk.bf16.mxu1 %vm3218_vm13, %v7154_v26  ;;  %v5073_v26 = vshrl.u32 %v4908_v18, 16  ;;  %v5076_v59 = vshll.u32 %v4908_v18, 16  ;;  %v5118_v18 = vshll.u32 %v4914_v56, 16  ;;  %v5099_v12 = vsel %vm7371_vm4, %v5094_v46, %v5098_v54 }
 0x2ec   :  { %v5124_v56 = vshll.u32 %v8738_v4, 16  ;;  %v5386_v54 = vrot.slane %v8704_v51, 5 }
 0x2ed   :  { %v5075_v58 = vrot.slane %v5073_v26, 4  ;;  %v5078_v15 = vrot.slane %v5076_v59, 5  ;;  %v5107_v26 = vor.u32 %v5106_v60, %v5103_v23  ;;  %v5117_v59 = vrot.slane %v5115_v33, 4 }
 0x2ee   :  { %v5120_v3 = vrot.slane %v5118_v18, 5  ;;  %v5362_v60 = vrot.slane %v8668_v16, 5  ;;  %v5370_v16 = vrot.slane %v8673_v17, 5 }
 0x2ef   :  { %v5079_v5 = vor.u32 %v5078_v15, %v5075_v58 }
 0x2f0   :  { %v5121_v58 = vor.u32 %v5120_v3, %v5117_v59  ;;  %v5378_v59 = vrot.slane %v8684_v21, 5  ;;  %v5382_v21 = vrot.slane %v8689_v25, 5 }
 0x2f1   :  { %v5080_v62 = vrot.slane %v5079_v5, 4  ;;  %v5126_v5 = vrot.slane %v5124_v56, 5 }
 0x2f2   :  { %6766 = vmatmul.mubr.msk.bf16.gmra.mrb[12].mxu1 %vm3218_vm13, %v7155_v55  ;;  %v5064_v55 = vrot.slane %v5062_v2, 5 }
 0x2f3   :  { %6771 = vmatprep.mubr.msk.bf16.mxu1 %vm3218_vm13, %v6253_v24  ;;  %v5043_v24 = vsel %vm7371_vm4, %v5038_v10, %v5042_v40  ;;  %v5108_v10 = vrot.slane %v5107_v26, 4  ;;  %v5085_v2 = vsel %vm7371_vm4, %v5080_v62, %v5084_v30  ;;  %v6274_v26 = vrot.slane %v5313_v6, 9 }
 0x2f4   :  { %v5065_v13 = vor.u32 %v5064_v55, %v5061_v37  ;;  %v6257_v9 = vcombine.low %v5043_v24, %v5057_v57  ;;  %v5309_v37 = vld [vmem:[#allocation2 + $0x18] sm:$0xe]  ;;  %v6269_v55 = vrot.slane %v5308_v41, 9  ;;  %v5358_v24 = vrot.slane %v8664_v45, 5  ;;  %v5318_v41 = vld [vmem:[#allocation2 + $0x70] sm:$0xe] }
 0x2f5   :  { %v6270_v23 = vrot.slane %v5309_v37, 9  ;;  %v5398_v37 = vrot.slane %v8720_v34, 5 }
 0x2f6   :  { %v5066_v14 = vrot.slane %v5065_v13, 4  ;;  %v6272_v13 = vrot.slane %v5311_v28, 9  ;;  %v5414_v28 = vrot.slane %v8738_v4, 5  ;;  %v8818_v4 = vld [vmem:[%s8852_s4] ss:$0 sm:$0xff]  ;;  %s7183_s4 = smov [#allocation3]  }
 0x2f7   :  { %v5363_v45 = vsel %vm8327_vm0, %v6270_v23, %v5362_v60  ;;  %v5322_v23 = vld [vmem:[#allocation2 + $0x90] sm:$0xe]  ;;  %v5323_v60 = vld [vmem:[#allocation2 + $0x98] sm:$0xe]  ;;  %s5778_s14 = sshll.u32 %s7183_s4, 4  ;;  %s5779_s14 = int_to_ptr.vmem [resolvable:$true] %s5778_s14 }
 0x2f8   :  { %v5371_v3 = vsel %vm8327_vm0, %v6272_v13, %v5370_v16  ;;  %v5628_v16 = vpop.permute.xlu1 %5627  ;;  %s7157_s15 = scalar_lea.vmem %s5779_s14, 256  ;;  %p7162_p1 = scmp.lt.s32.totalorder %s5779_s14, %s5779_s14 }
 0x2f9   :  { %p7158_p0 = scmp.ne.s32.totalorder %s5779_s14, %s7157_s15  ;;  %p7163_p2 = scmp.lt.s32.totalorder %s7157_s15, %s7157_s15 }
 0x2fa   :  { %6772 = vmatmul.mubr.msk.bf16.vlgmr.msra.gmra.mrb[0].mxu1 %vm3218_vm13, %v6254_v27  ;;  %v5129_v27 = vshrl.u32 %v4916_v49, 16  ;;  %v5122_v49 = vrot.slane %v5121_v58, 4  ;;  %v5390_v58 = vrot.slane %v8695_v1, 5 }
 0x2fb   :  { %6775 = vmatprep.mubr.msk.bf16.mxu1 %vm3218_vm13, %v6255_v38  ;;  %6788 = vmatpush3.bf16.msra.mxu1 %v5471_v36  ;;  %v5068_v36 = vshll.u32 %v8720_v34, 16  ;;  %v5112_v38 = vrot.slane %v5110_v0, 5  ;;  %p7164_p3 = por %p7163_p2, %p7162_p1 }
 0x2fc   :  { %v5131_v11 = vrot.slane %v5129_v27, 4  ;;  %v5127_v33 = vsel %vm7371_vm4, %v5122_v49, %v5126_v5  ;;  %v5359_v27 = vsel %vm8327_vm0, %v6269_v55, %v5358_v24  ;;  %v5410_v24 = vrot.slane %v8732_v43, 5 }
 0x2fd   :  { %v5070_v20 = vrot.slane %v5068_v36, 5  ;;  %v5113_v29 = vsel %vm7371_vm4, %v5108_v10, %v5112_v38  ;;  %v5312_v36 = vld [vmem:[#allocation2 + $0x30] sm:$0xe]  ;;  %v6286_v57 = vcombine.low %v5359_v27, %v5363_v45  ;;  %v5317_v10 = vld [vmem:[#allocation2 + $0x68] sm:$0xe]  ;;  %v6283_v27 = vrot.slane %v5322_v23, 9  ;;  %p7165_p4 = pnand %p7164_p3, %p7158_p0 }
 0x2fe   :  { %v5135_v15 = vor.u32 %v5134_v50, %v5131_v11  ;;  %v6259_v52 = vcombine.low %v5099_v12, %v5113_v29  ;;  %v5314_v11 = vld [vmem:[#allocation2 + $0x40] sm:$0xe]  ;;  %v5315_v50 = vld [vmem:[#allocation2 + $0x48] sm:$0xe]  ;;  %v5319_v38 = vld [vmem:[#allocation2 + $0x78] sm:$0xe] }
 0x2ff   :  { %v5071_v40 = vsel %vm7371_vm4, %v5066_v14, %v5070_v20  ;;  %v5379_v14 = vsel %vm8327_vm0, %v6274_v26, %v5378_v59  ;;  %v6275_v47 = vrot.slane %v5314_v11, 9  ;;  %v6276_v20 = vrot.slane %v5315_v50, 9 }
 0x300   :  { %v6258_v32 = vcombine.low %v5071_v40, %v5085_v2  ;;  %v5136_v39 = vrot.slane %v5135_v15, 4  ;;  %v6277_v2 = vrot.slane %v5316_v7, 9  ;;  %v6278_v15 = vrot.slane %v5317_v10, 9  ;;  %v5320_v40 = vld [vmem:[#allocation2 + $0x80] sm:$0xe] }
 0x301   :  { %v5383_v12 = vsel %vm8327_vm0, %v6275_v47, %v5382_v21  ;;  %v5387_v25 = vsel %vm8327_vm0, %v6276_v20, %v5386_v54  ;;  %v6280_v29 = vrot.slane %v5319_v38, 9  ;;  %v6281_v49 = vrot.slane %v5320_v40, 9 }
 0x302   :  { %6776 = vmatmul.mubr.msk.bf16.gmra.mrb[4].mxu1 %vm3218_vm13, %v6256_v42  ;;  %v5141_v18 = vsel %vm7371_vm4, %v5136_v39, %v5140_v35  ;;  %v5310_v42 = vld [vmem:[#allocation2 + $0x20] sm:$0xe]  ;;  %v5391_v51 = vsel %vm8327_vm0, %v6277_v2, %v5390_v58  ;;  %v6289_v56 = vcombine.low %v5383_v12, %v5387_v25  ;;  %v5395_v1 = vsel %vm8327_vm0, %v6278_v15, %v5394_v53 }
 0x303   :  { %6779 = vmatprep.mubr.msk.bf16.mxu1 %vm3218_vm13, %v6257_v9  ;;  %v6260_v22 = vcombine.low %v5127_v33, %v5141_v18  ;;  %v6273_v9 = vrot.slane %v5312_v36, 9  ;;  %v6271_v62 = vrot.slane %v5310_v42, 9  ;;  %v5406_v39 = vrot.slane %v8726_v48, 5 }
 0x304   :  { %v6279_v35 = vrot.slane %v5318_v41, 9  ;;  %v5403_v5 = vsel %vm8327_vm0, %v6280_v29, %v5402_v63  ;;  %v6284_v43 = vrot.slane %v5323_v60, 9  ;;  %v5418_v36 = vrot.slane %v8740_v19, 5 }
 0x305   :  { %v5375_v17 = vsel %vm8327_vm0, %v6273_v9, %v5374_v31  ;;  %v5367_v46 = vsel %vm8327_vm0, %v6271_v62, %v5366_v44  ;;  %v5407_v8 = vsel %vm8327_vm0, %v6281_v49, %v5406_v39  ;;  %v5646_v9 = vpop.permute.xlu1 %5645 }
 0x306   :  { %v6287_v0 = vcombine.low %v5367_v46, %v5371_v3  ;;  %v6288_v30 = vcombine.low %v5375_v17, %v5379_v14  ;;  %v5399_v33 = vsel %vm8327_vm0, %v6279_v35, %v5398_v37  ;;  %v5419_v45 = vsel %vm8327_vm0, %v6284_v43, %v5418_v36 }
 0x307   :  { %v6291_v48 = vcombine.low %v5399_v33, %v5403_v5 }
 0x309   :  { %v5648_v46 = vpop.permute.xlu1 %5647 }
 0x30a   :  { %6780 = vmatmul.mubr.msk.bf16.gmra.mrb[8].mxu1 %vm3218_vm13, %v6258_v32  ;;  %v6290_v32 = vcombine.low %v5391_v51, %v5395_v1 }
 0x30b   :  { %6783 = vmatprep.mubr.msk.bf16.mxu1 %vm3218_vm13, %v6259_v52  ;;  %v5321_v52 = vld [vmem:[#allocation2 + $0x88] sm:$0xe] }
 0x30c   :  { %v6282_v55 = vrot.slane %v5321_v52, 9 }
 0x30d   :  { %v5644_v10 = vpop.permute.xlu1 %5643 }
 0x30e   :  { %v5411_v18 = vsel %vm8327_vm0, %v6282_v55, %v5410_v24 }
 0x30f   :  { %v6292_v34 = vcombine.low %v5407_v8, %v5411_v18 }
 0x311   :  { %v5654_v41 = vpop.permute.xlu1 %5653 }
 0x312   :  { %6784 = vmatmul.mubr.msk.bf16.gmra.mrb[12].mxu1 %vm3218_vm13, %v6260_v22  ;;  %v5415_v22 = vsel %vm8327_vm0, %v6283_v27, %v5414_v28 }
 0x313   :  { %6789 = vmatprep.mubr.msk.bf16.mxu1 %vm3218_vm13, %v6286_v57  ;;  %v6293_v42 = vcombine.low %v5415_v22, %v5419_v45  ;;  %v5630_v57 = vpop.permute.xlu0 %5629 }
 0x315   :  { %v5650_v23 = vpop.permute.xlu1 %5649 }
 0x317   :  { %v5626_v13 = vpop.permute.xlu0 %5625 }
 0x31a   :  { %6790 = vmatmul.mubr.msk.bf16.vlgmr.msra.gmra.mrb[0].mxu1 %vm3218_vm13, %v6287_v0 }
 0x31b   :  { %6793 = vmatprep.mubr.msk.bf16.mxu1 %vm3218_vm13, %v6288_v30  ;;  %v5632_v19 = vpop.permute.xlu0 %5631 }
 0x31f   :  { %v5642_v3 = vpop.permute.xlu0 %5641 }
 0x322   :  { %6794 = vmatmul.mubr.msk.bf16.gmra.mrb[4].mxu1 %vm3218_vm13, %v6289_v56 }
 0x323   :  { %6797 = vmatprep.mubr.msk.bf16.mxu1 %vm3218_vm13, %v6290_v32  ;;  %v5634_v20 = vpop.permute.xlu0 %5633 }
 0x327   :  { %v5636_v12 = vpop.permute.xlu0 %5635 }
 0x32a   :  { %6798 = vmatmul.mubr.msk.bf16.gmra.mrb[8].mxu1 %vm3218_vm13, %v6291_v48 }
 0x32b   :  { %6801 = vmatprep.mubr.msk.bf16.mxu1 %vm3218_vm13, %v6292_v34  ;;  %v5638_v24 = vpop.permute.xlu0 %5637 }
 0x32f   :  { %v5640_v36 = vpop.permute.xlu0 %5639 }
 0x332   :  { %6802 = vmatmul.mubr.msk.bf16.gmra.mrb[12].mxu1 %vm3218_vm13, %v6293_v42 }
 0x3ed   :  { %v6791_v6 = vpop.f32.mrb[0].mxu1 }
 0x3ee   :  { %v5507_v31 = vpop.f32.mrb[1].mxu1  ;;  %v5595_v11 = vadd.f32 %v6791_v6, %v8818_v4 }
 0x3ef   :  { %v5593_v62 = vadd.f32 %v8818_v4, %v5507_v31  ;;  %v6792_v44 = vpop.f32.mrb[2].mxu1 }
 0x3f0   :  { %v5510_v61 = vpop.f32.mrb[3].mxu1  ;;  %v5675_v14 = vadd.f32 %v5630_v57, %v5595_v11  ;;  %v5596_v47 = vadd.f32 %v6792_v44, %v8818_v4 }
 0x3f1   :  { %v5594_v26 = vadd.f32 %v8818_v4, %v5510_v61  ;;  %v5673_v59 = vadd.f32 %v5626_v13, %v5593_v62 }
 0x3f2   :  { %v5691_v58 = vmax.f32 %v5675_v14, 0.0  ;;  %v5676_v15 = vadd.f32 %v5632_v19, %v5596_v47 }
 0x3f3   :  { %v5674_v17 = vadd.f32 %v5628_v16, %v5594_v26  ;;  %v5689_v50 = vmax.f32 %v5673_v59, 0.0  ;;  %v5656_v16 = vpop.permute.xlu1 %5655 }
 0x3f4   :  { %v5692_v38 = vmax.f32 %v5676_v15, 0.0 }
 0x3f5   :  { %5705 = vxpose.xlu0.b32.start [1/8] (short) (narrow) %v5689_v50, 8  ;;  %v6795_v7 = vpop.f32.mrb[4].mxu1  ;;  %v5690_v30 = vmax.f32 %v5674_v17, 0.0 }
 0x3f6   :  { %v5523_v0 = vpop.f32.mrb[5].mxu1  ;;  %v5599_v52 = vadd.f32 %v6795_v7, %v8818_v4 }
 0x3f7   :  { %v6796_v21 = vpop.f32.mrb[6].mxu1  ;;  %v5597_v2 = vadd.f32 %v8818_v4, %v5523_v0  ;;  %v5652_v62 = vpop.permute.xlu1 %5651 }
 0x3f8   :  { %v5526_v54 = vpop.f32.mrb[7].mxu1  ;;  %v5679_v8 = vadd.f32 %v5638_v24, %v5599_v52  ;;  %v5600_v60 = vadd.f32 %v6796_v21, %v8818_v4 }
 0x3f9   :  { %5706 = vxpose.xlu0.b32.cont [2/8] (short) (narrow) %v5690_v30, 8  ;;  %v5677_v25 = vadd.f32 %v5634_v20, %v5597_v2  ;;  %v5598_v40 = vadd.f32 %v8818_v4, %v5526_v54 }
 0x3fa   :  { %v5695_v22 = vmax.f32 %v5679_v8, 0.0  ;;  %v5680_v45 = vadd.f32 %v5640_v36, %v5600_v60 }
 0x3fb   :  { %v5693_v49 = vmax.f32 %v5677_v25, 0.0  ;;  %v5678_v39 = vadd.f32 %v5636_v12, %v5598_v40 }
 0x3fc   :  { %v5696_v19 = vmax.f32 %v5680_v45, 0.0 }
 0x3fd   :  { %5707 = vxpose.xlu0.b32.cont [3/8] (short) (narrow) %v5691_v58, 8  ;;  %v6799_v53 = vpop.f32.mrb[8].mxu1  ;;  %v5694_v48 = vmax.f32 %v5678_v39, 0.0 }
 0x3fe   :  { %v5539_v51 = vpop.f32.mrb[9].mxu1  ;;  %v5603_v35 = vadd.f32 %v6799_v53, %v8818_v4 }
 0x3ff   :  { %v5601_v56 = vadd.f32 %v8818_v4, %v5539_v51  ;;  %v6800_v1 = vpop.f32.mrb[10].mxu1 }
 0x400   :  { %v5542_v32 = vpop.f32.mrb[11].mxu1  ;;  %v5683_v18 = vadd.f32 %v5646_v9, %v5603_v35  ;;  %v5604_v27 = vadd.f32 %v6800_v1, %v8818_v4 }
 0x401   :  { %v5602_v29 = vadd.f32 %v8818_v4, %v5542_v32  ;;  %5708 = vxpose.xlu0.b32.cont [4/8] (short) (narrow) %v5692_v38, 8  ;;  %v5681_v63 = vadd.f32 %v5642_v3, %v5601_v56 }
 0x402   :  { %v5699_v42 = vmax.f32 %v5683_v18, 0.0  ;;  %v5684_v57 = vadd.f32 %v5648_v46, %v5604_v27 }
 0x403   :  { %v5682_v37 = vadd.f32 %v5644_v10, %v5602_v29  ;;  %v5697_v55 = vmax.f32 %v5681_v63, 0.0 }
 0x404   :  { %v5700_v6 = vmax.f32 %v5684_v57, 0.0 }
 0x405   :  { %5709 = vxpose.xlu0.b32.cont [5/8] (short) (narrow) %v5693_v49, 8  ;;  %5739 = vxpose.xlu1.b32.start [1/8] (short) (narrow) %v5697_v55, 8  ;;  %v6803_v5 = vpop.f32.mrb[12].mxu1  ;;  %v5698_v34 = vmax.f32 %v5682_v37, 0.0 }
 0x406   :  { %v5555_v33 = vpop.f32.mrb[13].mxu1  ;;  %v5607_v44 = vadd.f32 %v6803_v5, %v8818_v4 }
 0x407   :  { %v6804_v28 = vpop.f32.mrb[14].mxu1  ;;  %v5605_v13 = vadd.f32 %v8818_v4, %v5555_v33 }
 0x408   :  { %v5558_v43 = vpop.f32.mrb[15].mxu1  ;;  %v5687_v59 = vadd.f32 %v5654_v41, %v5607_v44  ;;  %v5608_v3 = vadd.f32 %v6804_v28, %v8818_v4 }
 0x409   :  { %5710 = vxpose.xlu0.b32.cont [6/8] (short) (narrow) %v5694_v48, 8  ;;  %5740 = vxpose.xlu1.b32.cont [2/8] (short) (narrow) %v5698_v34, 8  ;;  %v5685_v9 = vadd.f32 %v5650_v23, %v5605_v13  ;;  %v5606_v31 = vadd.f32 %v8818_v4, %v5558_v43 }
 0x40a   :  { %v5703_v17 = vmax.f32 %v5687_v59, 0.0  ;;  %v5688_v50 = vadd.f32 %v5656_v16, %v5608_v3 }
 0x40b   :  { %v5701_v61 = vmax.f32 %v5685_v9, 0.0  ;;  %v5686_v26 = vadd.f32 %v5652_v62, %v5606_v31 }
 0x40c   :  { %v5704_v46 = vmax.f32 %v5688_v50, 0.0 }
 0x40d   :  { %5711 = vxpose.xlu0.b32.cont [7/8] (short) (narrow) %v5695_v22, 8  ;;  %5741 = vxpose.xlu1.b32.cont [3/8] (short) (narrow) %v5699_v42, 8  ;;  %v5702_v11 = vmax.f32 %v5686_v26, 0.0 }
 0x411   :  { %5712 = vxpose.xlu0.b32.end [8/8] (short) (narrow) %v5696_v19, 8  ;;  %5742 = vxpose.xlu1.b32.cont [4/8] (short) (narrow) %v5700_v6, 8 }
 0x415   :  { %5743 = vxpose.xlu1.b32.cont [5/8] (short) (narrow) %v5701_v61, 8 }
 0x419   :  { %5744 = vxpose.xlu1.b32.cont [6/8] (short) (narrow) %v5702_v11, 8 }
 0x41d   :  { %5745 = vxpose.xlu1.b32.cont [7/8] (short) (narrow) %v5703_v17, 8 }
 0x421   :  { %5746 = vxpose.xlu1.b32.end [8/8] (short) (narrow) %v5704_v46, 8 }
 0x475   :  { %v5721_v7 = vpop.trf.xlu0 }
 0x476   :  { %5738 = vst.msk [vmem:[#allocation3] sm:$0xff] %vm5737_vm1, %v5721_v7 }
 0x485   :  { %v5755_v0 = vpop.trf.xlu1 }
 0x486   :  { %5772 = vst.msk [vmem:[#allocation3 + $0x8] sm:$0xff] %vm5737_vm1, %v5755_v0 }
 0x487   :  { %7168 = shalt.err (!%p7165_p4)
}
 0x488   :  { %s7169_s18 = scalar_lea.hbm %s8853_s5, 256 }
 0x489   :  { %p7170_p5 = scmp.ne.s32.totalorder %s8853_s5, %s7169_s18  ;;  %p7173_p6 = scmp.lt.u32.totalorder %s7169_s18, %s8853_s5 }
 0x48b   :  { %p7175_p7 = pnand %p7173_p6, %p7170_p5 }
 0x48d   :  { %7178 = shalt.err (!%p7175_p7)
}
 0x48e   :  { %s7184_s22 = smov 128   ;;  %s7185_s23 = smov 8  }
 0x48f   :  { %5784 = dma.vmem_to_hbm [thread:$0]  %s5779_s14, 256, %s8853_s5, [#allocation4], %s7184_s22, %s7184_s22, %s7185_s23  }
 0x490   :  { %7179 = dma.done.wait [#allocation4], 256  }
 0x491   :  { %7180 = vsyncadd [#allocation4], 4294967040 }
 0x492   :  { %5788 = vsyncpa [#allocation4], 1 }

</bundles_post_ra>
